<compile_context>
chip_gen: v6e
topology: v6e:2x2x1
jax: 0.10.0
libtpu: 0.0.40
codegen_flags: <defaults>
</compile_context>

<pallas_src>
import math

import jax
import jax.numpy as jnp
from jax import lax
from jax.experimental import pallas as pl
from jax.experimental.pallas import tpu as pltpu

# ----------------------------- configuration -------------------------------
EMBED_DIM    = 32
HIDDEN_DIM   = 64
NUM_CHANNELS = 4
NUM_HEADS    = 4
NUM_LAYERS   = 2
NUM_CLASSES  = 10
PATCH_SIZE   = 4
IMG_SIZE     = 16
NUM_PATCHES  = (IMG_SIZE // PATCH_SIZE) ** 2          # 16
HEAD_DIM     = EMBED_DIM // NUM_HEADS                 # 8
SEQ_LEN      = NUM_PATCHES + 1                        # 17 (cls + patches)
LN_EPS       = 1e-5


# ------------------------------- glue (JAX) --------------------------------
def img_to_patch(x, patch_size):
    """x: [B, C, H, W]  ->  [B, T, C*p*p]  (matches PyTorch img_to_patch)."""
    B, C, H, W = x.shape
    x = x.reshape(B, C, H // patch_size, patch_size, W // patch_size, patch_size)
    x = x.transpose(0, 2, 4, 1, 3, 5)
    return x.reshape(B, (H // patch_size) * (W // patch_size),
                     C * patch_size * patch_size)


# --------------------------- in-kernel helpers ------------------------------
def _ln(x, g, b):
    mu = jnp.mean(x, axis=-1, keepdims=True)
    var = jnp.mean((x - mu) ** 2, axis=-1, keepdims=True)
    return (x - mu) * lax.rsqrt(var + LN_EPS) * g + b


def _gelu_exact(x):
    # nn.GELU() default = exact (erf-based) GELU
    return 0.5 * x * (1.0 + lax.erf(x / math.sqrt(2.0)))


# ------------------------------ fused kernel --------------------------------
def _vit_fused_kernel(patches_ref, in_wT_ref, in_b_ref, cls_pos_ref,
                      ln1g_ref, ln1b_ref, wqkvT_ref, bqkv_ref,
                      woT_ref, bo_ref, ln2g_ref, ln2b_ref,
                      w1T_ref, b1_ref, w2T_ref, b2_ref,
                      hlng_ref, hlnb_ref, hwT_ref, hb_ref,
                      out_ref):
    f32 = jnp.float32
    B = patches_ref.shape[0] // NUM_PATCHES
    scale = 1.0 / math.sqrt(HEAD_DIM)

    # ---- patch embedding, whole batch in one matmul: (B*T, D_in) @ (D_in, E)
    pe = jnp.dot(patches_ref[...], in_wT_ref[...],
                 preferred_element_type=f32) + in_b_ref[...]          # (B*T, E)
    cls_pos = cls_pos_ref[...]                                        # (S, E); row0 = cls + pos0

    xs = []
    for b in range(B):                                                # static unroll
        y = pe[b * NUM_PATCHES:(b + 1) * NUM_PATCHES, :]              # (T, E), aligned slice
        xs.append(jnp.concatenate([cls_pos[0:1, :], y + cls_pos[1:, :]], axis=0))

    # ---- transformer blocks (pre-LN), statically unrolled over layers/batch
    for l in range(NUM_LAYERS):
        ln1g, ln1b = ln1g_ref[l], ln1b_ref[l]
        wqkvT, bqkv = wqkvT_ref[l], bqkv_ref[l]
        woT, bo = woT_ref[l], bo_ref[l]
        ln2g, ln2b = ln2g_ref[l], ln2b_ref[l]
        w1T, b1 = w1T_ref[l], b1_ref[l]
        w2T, b2 = w2T_ref[l], b2_ref[l]

        for b in range(B):
            x = xs[b]                                                 # (S, E)

            # ---- multi-head self-attention + residual ----
            h = _ln(x, ln1g, ln1b)
            qkv = jnp.dot(h, wqkvT, preferred_element_type=f32) + bqkv   # (S, 3E)

            attn = bo                                                 # (1, E) out-proj bias
            for hd in range(NUM_HEADS):
                o = hd * HEAD_DIM
                qh = qkv[:, o:o + HEAD_DIM] * scale
                kh = qkv[:, EMBED_DIM + o:EMBED_DIM + o + HEAD_DIM]
                vh = qkv[:, 2 * EMBED_DIM + o:2 * EMBED_DIM + o + HEAD_DIM]
                # scores = q @ k^T without an explicit transpose
                s = lax.dot_general(qh, kh, (((1,), (1,)), ((), ())),
                                    preferred_element_type=f32)       # (S, S)
                s = s - jnp.max(s, axis=-1, keepdims=True)
                p = jnp.exp(s)
                p = p * pl.reciprocal(jnp.sum(p, axis=-1, keepdims=True),
                                      approx=True)
                ho = jnp.dot(p, vh, preferred_element_type=f32)       # (S, Dh)
                # fold head output through its slice of W_o^T (no concat)
                attn = attn + jnp.dot(ho, woT[o:o + HEAD_DIM, :],
                                      preferred_element_type=f32)
            x = x + attn

            # ---- feed-forward + residual ----
            h2 = _ln(x, ln2g, ln2b)
            m = jnp.dot(h2, w1T, preferred_element_type=f32) + b1
            m = _gelu_exact(m)
            m = jnp.dot(m, w2T, preferred_element_type=f32) + b2
            xs[b] = x + m

    # ---- classification head on CLS rows (all batches at once) ----
    cls_rows = jnp.concatenate([xs[b][0:1, :] for b in range(B)], axis=0)  # (B, E)
    hc = _ln(cls_rows, hlng_ref[...], hlnb_ref[...])
    logits = jnp.dot(hc, hwT_ref[...], preferred_element_type=f32) + hb_ref[...]
    out_ref[...] = logits.astype(out_ref.dtype)


# ------------------------------ model forward -------------------------------
def vit_forward(x_img, kp):
    """x_img: [B, C, H, W] (NCHW). kp: kernel-ready params (pre-transposed)."""
    B = x_img.shape[0]
    patches = img_to_patch(x_img, PATCH_SIZE).reshape(B * NUM_PATCHES, -1)

    n_in = 20
    in_specs = [pl.BlockSpec(memory_space=pltpu.MemorySpace.VMEM)
                for _ in range(n_in)]
    out_specs = pl.BlockSpec(memory_space=pltpu.MemorySpace.VMEM)

    return pl.pallas_call(
        _vit_fused_kernel,
        out_shape=jax.ShapeDtypeStruct((B, NUM_CLASSES), jnp.float32),
        in_specs=in_specs,
        out_specs=out_specs,
    )(patches,
      kp["in_wT"], kp["in_b"], kp["cls_pos"],
      kp["ln1_g"], kp["ln1_b"], kp["wqkvT"], kp["bqkv"],
      kp["woT"], kp["bo"], kp["ln2_g"], kp["ln2_b"],
      kp["w1T"], kp["b1"], kp["w2T"], kp["b2"],
      kp["head_ln_g"], kp["head_ln_b"], kp["head_wT"], kp["head_b"])


# ---------------------------- parameter creation ----------------------------
def init_params(key):
    """PyTorch-layout parameters (weights are (out, in) like nn.Linear)."""
    keys = iter(jax.random.split(key, 64))
    std = 0.02

    def w(shape):
        return (std * jax.random.normal(next(keys), shape)).astype(jnp.float32)

    params = {
        "in_w": w((EMBED_DIM, NUM_CHANNELS * PATCH_SIZE ** 2)),
        "in_b": jnp.zeros((EMBED_DIM,), jnp.float32),
        "cls_token": jax.random.normal(next(keys), (1, 1, EMBED_DIM), jnp.float32),
        "pos_embedding": jax.random.normal(next(keys), (1, 1 + NUM_PATCHES, EMBED_DIM),
                                           jnp.float32),
        "head_ln_g": jnp.ones((EMBED_DIM,), jnp.float32),
        "head_ln_b": jnp.zeros((EMBED_DIM,), jnp.float32),
        "head_w": w((NUM_CLASSES, EMBED_DIM)),
        "head_b": jnp.zeros((NUM_CLASSES,), jnp.float32),
        "layers": [],
    }
    for _ in range(NUM_LAYERS):
        params["layers"].append({
            "ln1_g": jnp.ones((EMBED_DIM,), jnp.float32),
            "ln1_b": jnp.zeros((EMBED_DIM,), jnp.float32),
            "w_qkv": w((3 * EMBED_DIM, EMBED_DIM)),
            "b_qkv": jnp.zeros((3 * EMBED_DIM,), jnp.float32),
            "w_o": w((EMBED_DIM, EMBED_DIM)),
            "b_o": jnp.zeros((EMBED_DIM,), jnp.float32),
            "ln2_g": jnp.ones((EMBED_DIM,), jnp.float32),
            "ln2_b": jnp.zeros((EMBED_DIM,), jnp.float32),
            "w_fc1": w((HIDDEN_DIM, EMBED_DIM)),
            "b_fc1": jnp.zeros((HIDDEN_DIM,), jnp.float32),
            "w_fc2": w((EMBED_DIM, HIDDEN_DIM)),
            "b_fc2": jnp.zeros((EMBED_DIM,), jnp.float32),
        })
    return params


def prepare_kernel_params(params):
    """One-time layout prep: transpose weights, reshape biases, stack layers."""
    E, H3, HID, C = EMBED_DIM, 3 * EMBED_DIM, HIDDEN_DIM, NUM_CLASSES
    L = params["layers"]

    pos = params["pos_embedding"][0, :SEQ_LEN]                       # (S, E)
    cls_pos = pos.at[0].add(params["cls_token"][0, 0])               # row0 = cls + pos0

    kp = {
        "in_wT": params["in_w"].T,                                   # (D_in, E)
        "in_b": params["in_b"].reshape(1, E),
        "cls_pos": cls_pos,
        "ln1_g": jnp.stack([lp["ln1_g"].reshape(1, E) for lp in L]),
        "ln1_b": jnp.stack([lp["ln1_b"].reshape(1, E) for lp in L]),
        "wqkvT": jnp.stack([lp["w_qkv"].T for lp in L]),             # (L, E, 3E)
        "bqkv": jnp.stack([lp["b_qkv"].reshape(1, H3) for lp in L]),
        "woT": jnp.stack([lp["w_o"].T for lp in L]),                 # (L, E, E)
        "bo": jnp.stack([lp["b_o"].reshape(1, E) for lp in L]),
        "ln2_g": jnp.stack([lp["ln2_g"].reshape(1, E) for lp in L]),
        "ln2_b": jnp.stack([lp["ln2_b"].reshape(1, E) for lp in L]),
        "w1T": jnp.stack([lp["w_fc1"].T for lp in L]),               # (L, E, HID)
        "b1": jnp.stack([lp["b_fc1"].reshape(1, HID) for lp in L]),
        "w2T": jnp.stack([lp["w_fc2"].T for lp in L]),               # (L, HID, E)
        "b2": jnp.stack([lp["b_fc2"].reshape(1, E) for lp in L]),
        "head_ln_g": params["head_ln_g"].reshape(1, E),
        "head_ln_b": params["head_ln_b"].reshape(1, E),
        "head_wT": params["head_w"].T,                               # (E, C)
        "head_b": params["head_b"].reshape(1, C),
    }
    return jax.tree_util.tree_map(jnp.asarray, kp)


# ---------------------------------- main ------------------------------------
if __name__ == "__main__":
    key = jax.random.PRNGKey(0)
    pkey, xkey = jax.random.split(key)
    params = init_params(pkey)
    kparams = prepare_kernel_params(params)      # layout work done once

    x = jax.random.normal(xkey, (2, NUM_CHANNELS, IMG_SIZE, IMG_SIZE), jnp.float32)

    fwd = jax.jit(vit_forward)
    out = jax.block_until_ready(fwd(x, kparams))
    assert out.shape == (2, NUM_CLASSES), out.shape
    print("KERNEL_OK")
</pallas_src>

<mosaic_0001>
module attributes {stable_mosaic.version = 11 : i64} {
  func.func @_vit_fused_kernel(%arg0: memref<32x64xf32, #tpu.memory_space<vmem>>, %arg1: memref<64x32xf32, #tpu.memory_space<vmem>>, %arg2: memref<1x32xf32, #tpu.memory_space<vmem>>, %arg3: memref<17x32xf32, #tpu.memory_space<vmem>>, %arg4: memref<2x1x32xf32, #tpu.memory_space<vmem>>, %arg5: memref<2x1x32xf32, #tpu.memory_space<vmem>>, %arg6: memref<2x32x96xf32, #tpu.memory_space<vmem>>, %arg7: memref<2x1x96xf32, #tpu.memory_space<vmem>>, %arg8: memref<2x32x32xf32, #tpu.memory_space<vmem>>, %arg9: memref<2x1x32xf32, #tpu.memory_space<vmem>>, %arg10: memref<2x1x32xf32, #tpu.memory_space<vmem>>, %arg11: memref<2x1x32xf32, #tpu.memory_space<vmem>>, %arg12: memref<2x32x64xf32, #tpu.memory_space<vmem>>, %arg13: memref<2x1x64xf32, #tpu.memory_space<vmem>>, %arg14: memref<2x64x32xf32, #tpu.memory_space<vmem>>, %arg15: memref<2x1x32xf32, #tpu.memory_space<vmem>>, %arg16: memref<1x32xf32, #tpu.memory_space<vmem>>, %arg17: memref<1x32xf32, #tpu.memory_space<vmem>>, %arg18: memref<32x10xf32, #tpu.memory_space<vmem>>, %arg19: memref<1x10xf32, #tpu.memory_space<vmem>>, %arg20: memref<2x10xf32, #tpu.memory_space<vmem>>) attributes {dimension_semantics = [], scalar_prefetch = 0 : i64, scratch_operands = 0 : i64, tpu.core_type = #tpu.core_type<tc>} {
    %c0 = arith.constant 0 : index
    %c0_0 = arith.constant 0 : index
    %0 = vector.load %arg0[%c0, %c0_0] : memref<32x64xf32, #tpu.memory_space<vmem>>, vector<32x64xf32>
    %c0_1 = arith.constant 0 : index
    %c0_2 = arith.constant 0 : index
    %1 = vector.load %arg1[%c0_1, %c0_2] : memref<64x32xf32, #tpu.memory_space<vmem>>, vector<64x32xf32>
    %cst = arith.constant dense<0.000000e+00> : vector<32x32xf32>
    %2 = tpu.matmul %0, %1, %cst {dimension_numbers = #tpu.dot_dimension_numbers<[1], [0], [0], [1], [0, 0, 1, 1], [], []>} : vector<32x64xf32>, vector<64x32xf32>, vector<32x32xf32> -> vector<32x32xf32>
    %c0_3 = arith.constant 0 : index
    %c0_4 = arith.constant 0 : index
    %3 = vector.load %arg2[%c0_3, %c0_4] : memref<1x32xf32, #tpu.memory_space<vmem>>, vector<1x32xf32>
    %4 = vector.broadcast %3 : vector<1x32xf32> to vector<32x32xf32>
    %5 = arith.addf %2, %4 : vector<32x32xf32>
    %c0_5 = arith.constant 0 : index
    %c0_6 = arith.constant 0 : index
    %6 = vector.load %arg3[%c0_5, %c0_6] : memref<17x32xf32, #tpu.memory_space<vmem>>, vector<17x32xf32>
    %7 = vector.extract_strided_slice %5 {offsets = [0, 0], sizes = [16, 32], strides = [1, 1]} : vector<32x32xf32> to vector<16x32xf32>
    %8 = vector.extract_strided_slice %6 {offsets = [0, 0], sizes = [1, 32], strides = [1, 1]} : vector<17x32xf32> to vector<1x32xf32>
    %9 = vector.extract_strided_slice %6 {offsets = [1, 0], sizes = [16, 32], strides = [1, 1]} : vector<17x32xf32> to vector<16x32xf32>
    %10 = arith.addf %7, %9 : vector<16x32xf32>
    %11 = tpu.concatenate %8, %10 in 0 : vector<1x32xf32>, vector<16x32xf32> -> vector<17x32xf32>
    %12 = vector.extract_strided_slice %5 {offsets = [16, 0], sizes = [16, 32], strides = [1, 1]} : vector<32x32xf32> to vector<16x32xf32>
    %13 = vector.extract_strided_slice %6 {offsets = [0, 0], sizes = [1, 32], strides = [1, 1]} : vector<17x32xf32> to vector<1x32xf32>
    %14 = vector.extract_strided_slice %6 {offsets = [1, 0], sizes = [16, 32], strides = [1, 1]} : vector<17x32xf32> to vector<16x32xf32>
    %15 = arith.addf %12, %14 : vector<16x32xf32>
    %16 = tpu.concatenate %13, %15 in 0 : vector<1x32xf32>, vector<16x32xf32> -> vector<17x32xf32>
    %c0_7 = arith.constant 0 : index
    %c0_8 = arith.constant 0 : index
    %c0_9 = arith.constant 0 : index
    %17 = vector.load %arg4[%c0_7, %c0_8, %c0_9] : memref<2x1x32xf32, #tpu.memory_space<vmem>>, vector<1x1x32xf32>
    %18 = vector.shape_cast %17 : vector<1x1x32xf32> to vector<1x32xf32>
    %c0_10 = arith.constant 0 : index
    %c0_11 = arith.constant 0 : index
    %c0_12 = arith.constant 0 : index
    %19 = vector.load %arg5[%c0_10, %c0_11, %c0_12] : memref<2x1x32xf32, #tpu.memory_space<vmem>>, vector<1x1x32xf32>
    %20 = vector.shape_cast %19 : vector<1x1x32xf32> to vector<1x32xf32>
    %c0_13 = arith.constant 0 : index
    %c0_14 = arith.constant 0 : index
    %c0_15 = arith.constant 0 : index
    %21 = vector.load %arg6[%c0_13, %c0_14, %c0_15] : memref<2x32x96xf32, #tpu.memory_space<vmem>>, vector<1x32x96xf32>
    %22 = vector.shape_cast %21 : vector<1x32x96xf32> to vector<32x96xf32>
    %c0_16 = arith.constant 0 : index
    %c0_17 = arith.constant 0 : index
    %c0_18 = arith.constant 0 : index
    %23 = vector.load %arg7[%c0_16, %c0_17, %c0_18] : memref<2x1x96xf32, #tpu.memory_space<vmem>>, vector<1x1x96xf32>
    %24 = vector.shape_cast %23 : vector<1x1x96xf32> to vector<1x96xf32>
    %c0_19 = arith.constant 0 : index
    %c0_20 = arith.constant 0 : index
    %c0_21 = arith.constant 0 : index
    %25 = vector.load %arg8[%c0_19, %c0_20, %c0_21] : memref<2x32x32xf32, #tpu.memory_space<vmem>>, vector<1x32x32xf32>
    %26 = vector.shape_cast %25 : vector<1x32x32xf32> to vector<32x32xf32>
    %c0_22 = arith.constant 0 : index
    %c0_23 = arith.constant 0 : index
    %c0_24 = arith.constant 0 : index
    %27 = vector.load %arg9[%c0_22, %c0_23, %c0_24] : memref<2x1x32xf32, #tpu.memory_space<vmem>>, vector<1x1x32xf32>
    %28 = vector.shape_cast %27 : vector<1x1x32xf32> to vector<1x32xf32>
    %c0_25 = arith.constant 0 : index
    %c0_26 = arith.constant 0 : index
    %c0_27 = arith.constant 0 : index
    %29 = vector.load %arg10[%c0_25, %c0_26, %c0_27] : memref<2x1x32xf32, #tpu.memory_space<vmem>>, vector<1x1x32xf32>
    %30 = vector.shape_cast %29 : vector<1x1x32xf32> to vector<1x32xf32>
    %c0_28 = arith.constant 0 : index
    %c0_29 = arith.constant 0 : index
    %c0_30 = arith.constant 0 : index
    %31 = vector.load %arg11[%c0_28, %c0_29, %c0_30] : memref<2x1x32xf32, #tpu.memory_space<vmem>>, vector<1x1x32xf32>
    %32 = vector.shape_cast %31 : vector<1x1x32xf32> to vector<1x32xf32>
    %c0_31 = arith.constant 0 : index
    %c0_32 = arith.constant 0 : index
    %c0_33 = arith.constant 0 : index
    %33 = vector.load %arg12[%c0_31, %c0_32, %c0_33] : memref<2x32x64xf32, #tpu.memory_space<vmem>>, vector<1x32x64xf32>
    %34 = vector.shape_cast %33 : vector<1x32x64xf32> to vector<32x64xf32>
    %c0_34 = arith.constant 0 : index
    %c0_35 = arith.constant 0 : index
    %c0_36 = arith.constant 0 : index
    %35 = vector.load %arg13[%c0_34, %c0_35, %c0_36] : memref<2x1x64xf32, #tpu.memory_space<vmem>>, vector<1x1x64xf32>
    %36 = vector.shape_cast %35 : vector<1x1x64xf32> to vector<1x64xf32>
    %c0_37 = arith.constant 0 : index
    %c0_38 = arith.constant 0 : index
    %c0_39 = arith.constant 0 : index
    %37 = vector.load %arg14[%c0_37, %c0_38, %c0_39] : memref<2x64x32xf32, #tpu.memory_space<vmem>>, vector<1x64x32xf32>
    %38 = vector.shape_cast %37 : vector<1x64x32xf32> to vector<64x32xf32>
    %c0_40 = arith.constant 0 : index
    %c0_41 = arith.constant 0 : index
    %c0_42 = arith.constant 0 : index
    %39 = vector.load %arg15[%c0_40, %c0_41, %c0_42] : memref<2x1x32xf32, #tpu.memory_space<vmem>>, vector<1x1x32xf32>
    %40 = vector.shape_cast %39 : vector<1x1x32xf32> to vector<1x32xf32>
    %cst_43 = arith.constant dense<0.000000e+00> : vector<17xf32>
    %41 = vector.multi_reduction <add>, %11, %cst_43 [1] : vector<17x32xf32> to vector<17xf32>
    %42 = vector.shape_cast %41 : vector<17xf32> to vector<17x1xf32>
    %cst_44 = arith.constant 3.200000e+01 : f32
    %43 = vector.broadcast %cst_44 : f32 to vector<17x1xf32>
    %44 = arith.divf %42, %43 : vector<17x1xf32>
    %45 = vector.broadcast %44 : vector<17x1xf32> to vector<17x32xf32>
    %46 = arith.subf %11, %45 : vector<17x32xf32>
    %47 = arith.mulf %46, %46 : vector<17x32xf32>
    %cst_45 = arith.constant dense<0.000000e+00> : vector<17xf32>
    %48 = vector.multi_reduction <add>, %47, %cst_45 [1] : vector<17x32xf32> to vector<17xf32>
    %49 = vector.shape_cast %48 : vector<17xf32> to vector<17x1xf32>
    %cst_46 = arith.constant 3.200000e+01 : f32
    %50 = vector.broadcast %cst_46 : f32 to vector<17x1xf32>
    %51 = arith.divf %49, %50 : vector<17x1xf32>
    %52 = vector.broadcast %44 : vector<17x1xf32> to vector<17x32xf32>
    %53 = arith.subf %11, %52 : vector<17x32xf32>
    %cst_47 = arith.constant 9.99999974E-6 : f32
    %54 = vector.broadcast %cst_47 : f32 to vector<17x1xf32>
    %55 = arith.addf %51, %54 : vector<17x1xf32>
    %56 = math.rsqrt %55 : vector<17x1xf32>
    %57 = vector.broadcast %56 : vector<17x1xf32> to vector<17x32xf32>
    %58 = arith.mulf %53, %57 : vector<17x32xf32>
    %59 = vector.broadcast %18 : vector<1x32xf32> to vector<17x32xf32>
    %60 = arith.mulf %58, %59 : vector<17x32xf32>
    %61 = vector.broadcast %20 : vector<1x32xf32> to vector<17x32xf32>
    %62 = arith.addf %60, %61 : vector<17x32xf32>
    %cst_48 = arith.constant dense<0.000000e+00> : vector<17x96xf32>
    %63 = tpu.matmul %62, %22, %cst_48 {dimension_numbers = #tpu.dot_dimension_numbers<[1], [0], [0], [1], [0, 0, 1, 1], [], []>} : vector<17x32xf32>, vector<32x96xf32>, vector<17x96xf32> -> vector<17x96xf32>
    %64 = vector.broadcast %24 : vector<1x96xf32> to vector<17x96xf32>
    %65 = arith.addf %63, %64 : vector<17x96xf32>
    %66 = vector.extract_strided_slice %65 {offsets = [0, 0], sizes = [17, 8], strides = [1, 1]} : vector<17x96xf32> to vector<17x8xf32>
    %cst_49 = arith.constant 0.353553385 : f32
    %67 = vector.broadcast %cst_49 : f32 to vector<17x8xf32>
    %68 = arith.mulf %66, %67 : vector<17x8xf32>
    %69 = vector.extract_strided_slice %65 {offsets = [0, 32], sizes = [17, 8], strides = [1, 1]} : vector<17x96xf32> to vector<17x8xf32>
    %70 = vector.extract_strided_slice %65 {offsets = [0, 64], sizes = [17, 8], strides = [1, 1]} : vector<17x96xf32> to vector<17x8xf32>
    %cst_50 = arith.constant dense<0.000000e+00> : vector<17x17xf32>
    %71 = tpu.matmul %68, %69, %cst_50 {dimension_numbers = #tpu.dot_dimension_numbers<[1], [1], [0], [0], [0, 0, 1, 0], [], []>} : vector<17x8xf32>, vector<17x8xf32>, vector<17x17xf32> -> vector<17x17xf32>
    %cst_51 = arith.constant dense<0xFF800000> : vector<17xf32>
    %72 = vector.multi_reduction <maximumf>, %71, %cst_51 [1] : vector<17x17xf32> to vector<17xf32>
    %73 = vector.shape_cast %72 : vector<17xf32> to vector<17x1xf32>
    %74 = vector.broadcast %73 : vector<17x1xf32> to vector<17x17xf32>
    %75 = arith.subf %71, %74 : vector<17x17xf32>
    %76 = math.exp %75 : vector<17x17xf32>
    %cst_52 = arith.constant dense<0.000000e+00> : vector<17xf32>
    %77 = vector.multi_reduction <add>, %76, %cst_52 [1] : vector<17x17xf32> to vector<17xf32>
    %78 = vector.shape_cast %77 : vector<17xf32> to vector<17x1xf32>
    %79 = tpu.reciprocal %78 {approx = true} : vector<17x1xf32> -> vector<17x1xf32>
    %80 = vector.broadcast %79 : vector<17x1xf32> to vector<17x17xf32>
    %81 = arith.mulf %76, %80 : vector<17x17xf32>
    %cst_53 = arith.constant dense<0.000000e+00> : vector<17x8xf32>
    %82 = tpu.matmul %81, %70, %cst_53 {dimension_numbers = #tpu.dot_dimension_numbers<[1], [0], [0], [1], [0, 0, 1, 1], [], []>} : vector<17x17xf32>, vector<17x8xf32>, vector<17x8xf32> -> vector<17x8xf32>
    %83 = vector.extract_strided_slice %26 {offsets = [0, 0], sizes = [8, 32], strides = [1, 1]} : vector<32x32xf32> to vector<8x32xf32>
    %cst_54 = arith.constant dense<0.000000e+00> : vector<17x32xf32>
    %84 = tpu.matmul %82, %83, %cst_54 {dimension_numbers = #tpu.dot_dimension_numbers<[1], [0], [0], [1], [0, 0, 1, 1], [], []>} : vector<17x8xf32>, vector<8x32xf32>, vector<17x32xf32> -> vector<17x32xf32>
    %85 = vector.broadcast %28 : vector<1x32xf32> to vector<17x32xf32>
    %86 = arith.addf %85, %84 : vector<17x32xf32>
    %87 = vector.extract_strided_slice %65 {offsets = [0, 8], sizes = [17, 8], strides = [1, 1]} : vector<17x96xf32> to vector<17x8xf32>
    %cst_55 = arith.constant 0.353553385 : f32
    %88 = vector.broadcast %cst_55 : f32 to vector<17x8xf32>
    %89 = arith.mulf %87, %88 : vector<17x8xf32>
    %90 = vector.extract_strided_slice %65 {offsets = [0, 40], sizes = [17, 8], strides = [1, 1]} : vector<17x96xf32> to vector<17x8xf32>
    %91 = vector.extract_strided_slice %65 {offsets = [0, 72], sizes = [17, 8], strides = [1, 1]} : vector<17x96xf32> to vector<17x8xf32>
    %cst_56 = arith.constant dense<0.000000e+00> : vector<17x17xf32>
    %92 = tpu.matmul %89, %90, %cst_56 {dimension_numbers = #tpu.dot_dimension_numbers<[1], [1], [0], [0], [0, 0, 1, 0], [], []>} : vector<17x8xf32>, vector<17x8xf32>, vector<17x17xf32> -> vector<17x17xf32>
    %cst_57 = arith.constant dense<0xFF800000> : vector<17xf32>
    %93 = vector.multi_reduction <maximumf>, %92, %cst_57 [1] : vector<17x17xf32> to vector<17xf32>
    %94 = vector.shape_cast %93 : vector<17xf32> to vector<17x1xf32>
    %95 = vector.broadcast %94 : vector<17x1xf32> to vector<17x17xf32>
    %96 = arith.subf %92, %95 : vector<17x17xf32>
    %97 = math.exp %96 : vector<17x17xf32>
    %cst_58 = arith.constant dense<0.000000e+00> : vector<17xf32>
    %98 = vector.multi_reduction <add>, %97, %cst_58 [1] : vector<17x17xf32> to vector<17xf32>
    %99 = vector.shape_cast %98 : vector<17xf32> to vector<17x1xf32>
    %100 = tpu.reciprocal %99 {approx = true} : vector<17x1xf32> -> vector<17x1xf32>
    %101 = vector.broadcast %100 : vector<17x1xf32> to vector<17x17xf32>
    %102 = arith.mulf %97, %101 : vector<17x17xf32>
    %cst_59 = arith.constant dense<0.000000e+00> : vector<17x8xf32>
    %103 = tpu.matmul %102, %91, %cst_59 {dimension_numbers = #tpu.dot_dimension_numbers<[1], [0], [0], [1], [0, 0, 1, 1], [], []>} : vector<17x17xf32>, vector<17x8xf32>, vector<17x8xf32> -> vector<17x8xf32>
    %104 = vector.extract_strided_slice %26 {offsets = [8, 0], sizes = [8, 32], strides = [1, 1]} : vector<32x32xf32> to vector<8x32xf32>
    %cst_60 = arith.constant dense<0.000000e+00> : vector<17x32xf32>
    %105 = tpu.matmul %103, %104, %cst_60 {dimension_numbers = #tpu.dot_dimension_numbers<[1], [0], [0], [1], [0, 0, 1, 1], [], []>} : vector<17x8xf32>, vector<8x32xf32>, vector<17x32xf32> -> vector<17x32xf32>
    %106 = arith.addf %86, %105 : vector<17x32xf32>
    %107 = vector.extract_strided_slice %65 {offsets = [0, 16], sizes = [17, 8], strides = [1, 1]} : vector<17x96xf32> to vector<17x8xf32>
    %cst_61 = arith.constant 0.353553385 : f32
    %108 = vector.broadcast %cst_61 : f32 to vector<17x8xf32>
    %109 = arith.mulf %107, %108 : vector<17x8xf32>
    %110 = vector.extract_strided_slice %65 {offsets = [0, 48], sizes = [17, 8], strides = [1, 1]} : vector<17x96xf32> to vector<17x8xf32>
    %111 = vector.extract_strided_slice %65 {offsets = [0, 80], sizes = [17, 8], strides = [1, 1]} : vector<17x96xf32> to vector<17x8xf32>
    %cst_62 = arith.constant dense<0.000000e+00> : vector<17x17xf32>
    %112 = tpu.matmul %109, %110, %cst_62 {dimension_numbers = #tpu.dot_dimension_numbers<[1], [1], [0], [0], [0, 0, 1, 0], [], []>} : vector<17x8xf32>, vector<17x8xf32>, vector<17x17xf32> -> vector<17x17xf32>
    %cst_63 = arith.constant dense<0xFF800000> : vector<17xf32>
    %113 = vector.multi_reduction <maximumf>, %112, %cst_63 [1] : vector<17x17xf32> to vector<17xf32>
    %114 = vector.shape_cast %113 : vector<17xf32> to vector<17x1xf32>
    %115 = vector.broadcast %114 : vector<17x1xf32> to vector<17x17xf32>
    %116 = arith.subf %112, %115 : vector<17x17xf32>
    %117 = math.exp %116 : vector<17x17xf32>
    %cst_64 = arith.constant dense<0.000000e+00> : vector<17xf32>
    %118 = vector.multi_reduction <add>, %117, %cst_64 [1] : vector<17x17xf32> to vector<17xf32>
    %119 = vector.shape_cast %118 : vector<17xf32> to vector<17x1xf32>
    %120 = tpu.reciprocal %119 {approx = true} : vector<17x1xf32> -> vector<17x1xf32>
    %121 = vector.broadcast %120 : vector<17x1xf32> to vector<17x17xf32>
    %122 = arith.mulf %117, %121 : vector<17x17xf32>
    %cst_65 = arith.constant dense<0.000000e+00> : vector<17x8xf32>
    %123 = tpu.matmul %122, %111, %cst_65 {dimension_numbers = #tpu.dot_dimension_numbers<[1], [0], [0], [1], [0, 0, 1, 1], [], []>} : vector<17x17xf32>, vector<17x8xf32>, vector<17x8xf32> -> vector<17x8xf32>
    %124 = vector.extract_strided_slice %26 {offsets = [16, 0], sizes = [8, 32], strides = [1, 1]} : vector<32x32xf32> to vector<8x32xf32>
    %cst_66 = arith.constant dense<0.000000e+00> : vector<17x32xf32>
    %125 = tpu.matmul %123, %124, %cst_66 {dimension_numbers = #tpu.dot_dimension_numbers<[1], [0], [0], [1], [0, 0, 1, 1], [], []>} : vector<17x8xf32>, vector<8x32xf32>, vector<17x32xf32> -> vector<17x32xf32>
    %126 = arith.addf %106, %125 : vector<17x32xf32>
    %127 = vector.extract_strided_slice %65 {offsets = [0, 24], sizes = [17, 8], strides = [1, 1]} : vector<17x96xf32> to vector<17x8xf32>
    %cst_67 = arith.constant 0.353553385 : f32
    %128 = vector.broadcast %cst_67 : f32 to vector<17x8xf32>
    %129 = arith.mulf %127, %128 : vector<17x8xf32>
    %130 = vector.extract_strided_slice %65 {offsets = [0, 56], sizes = [17, 8], strides = [1, 1]} : vector<17x96xf32> to vector<17x8xf32>
    %131 = vector.extract_strided_slice %65 {offsets = [0, 88], sizes = [17, 8], strides = [1, 1]} : vector<17x96xf32> to vector<17x8xf32>
    %cst_68 = arith.constant dense<0.000000e+00> : vector<17x17xf32>
    %132 = tpu.matmul %129, %130, %cst_68 {dimension_numbers = #tpu.dot_dimension_numbers<[1], [1], [0], [0], [0, 0, 1, 0], [], []>} : vector<17x8xf32>, vector<17x8xf32>, vector<17x17xf32> -> vector<17x17xf32>
    %cst_69 = arith.constant dense<0xFF800000> : vector<17xf32>
    %133 = vector.multi_reduction <maximumf>, %132, %cst_69 [1] : vector<17x17xf32> to vector<17xf32>
    %134 = vector.shape_cast %133 : vector<17xf32> to vector<17x1xf32>
    %135 = vector.broadcast %134 : vector<17x1xf32> to vector<17x17xf32>
    %136 = arith.subf %132, %135 : vector<17x17xf32>
    %137 = math.exp %136 : vector<17x17xf32>
    %cst_70 = arith.constant dense<0.000000e+00> : vector<17xf32>
    %138 = vector.multi_reduction <add>, %137, %cst_70 [1] : vector<17x17xf32> to vector<17xf32>
    %139 = vector.shape_cast %138 : vector<17xf32> to vector<17x1xf32>
    %140 = tpu.reciprocal %139 {approx = true} : vector<17x1xf32> -> vector<17x1xf32>
    %141 = vector.broadcast %140 : vector<17x1xf32> to vector<17x17xf32>
    %142 = arith.mulf %137, %141 : vector<17x17xf32>
    %cst_71 = arith.constant dense<0.000000e+00> : vector<17x8xf32>
    %143 = tpu.matmul %142, %131, %cst_71 {dimension_numbers = #tpu.dot_dimension_numbers<[1], [0], [0], [1], [0, 0, 1, 1], [], []>} : vector<17x17xf32>, vector<17x8xf32>, vector<17x8xf32> -> vector<17x8xf32>
    %144 = vector.extract_strided_slice %26 {offsets = [24, 0], sizes = [8, 32], strides = [1, 1]} : vector<32x32xf32> to vector<8x32xf32>
    %cst_72 = arith.constant dense<0.000000e+00> : vector<17x32xf32>
    %145 = tpu.matmul %143, %144, %cst_72 {dimension_numbers = #tpu.dot_dimension_numbers<[1], [0], [0], [1], [0, 0, 1, 1], [], []>} : vector<17x8xf32>, vector<8x32xf32>, vector<17x32xf32> -> vector<17x32xf32>
    %146 = arith.addf %126, %145 : vector<17x32xf32>
    %147 = arith.addf %11, %146 : vector<17x32xf32>
    %cst_73 = arith.constant dense<0.000000e+00> : vector<17xf32>
    %148 = vector.multi_reduction <add>, %147, %cst_73 [1] : vector<17x32xf32> to vector<17xf32>
    %149 = vector.shape_cast %148 : vector<17xf32> to vector<17x1xf32>
    %cst_74 = arith.constant 3.200000e+01 : f32
    %150 = vector.broadcast %cst_74 : f32 to vector<17x1xf32>
    %151 = arith.divf %149, %150 : vector<17x1xf32>
    %152 = vector.broadcast %151 : vector<17x1xf32> to vector<17x32xf32>
    %153 = arith.subf %147, %152 : vector<17x32xf32>
    %154 = arith.mulf %153, %153 : vector<17x32xf32>
    %cst_75 = arith.constant dense<0.000000e+00> : vector<17xf32>
    %155 = vector.multi_reduction <add>, %154, %cst_75 [1] : vector<17x32xf32> to vector<17xf32>
    %156 = vector.shape_cast %155 : vector<17xf32> to vector<17x1xf32>
    %cst_76 = arith.constant 3.200000e+01 : f32
    %157 = vector.broadcast %cst_76 : f32 to vector<17x1xf32>
    %158 = arith.divf %156, %157 : vector<17x1xf32>
    %159 = vector.broadcast %151 : vector<17x1xf32> to vector<17x32xf32>
    %160 = arith.subf %147, %159 : vector<17x32xf32>
    %cst_77 = arith.constant 9.99999974E-6 : f32
    %161 = vector.broadcast %cst_77 : f32 to vector<17x1xf32>
    %162 = arith.addf %158, %161 : vector<17x1xf32>
    %163 = math.rsqrt %162 : vector<17x1xf32>
    %164 = vector.broadcast %163 : vector<17x1xf32> to vector<17x32xf32>
    %165 = arith.mulf %160, %164 : vector<17x32xf32>
    %166 = vector.broadcast %30 : vector<1x32xf32> to vector<17x32xf32>
    %167 = arith.mulf %165, %166 : vector<17x32xf32>
    %168 = vector.broadcast %32 : vector<1x32xf32> to vector<17x32xf32>
    %169 = arith.addf %167, %168 : vector<17x32xf32>
    %cst_78 = arith.constant dense<0.000000e+00> : vector<17x64xf32>
    %170 = tpu.matmul %169, %34, %cst_78 {dimension_numbers = #tpu.dot_dimension_numbers<[1], [0], [0], [1], [0, 0, 1, 1], [], []>} : vector<17x32xf32>, vector<32x64xf32>, vector<17x64xf32> -> vector<17x64xf32>
    %171 = vector.broadcast %36 : vector<1x64xf32> to vector<17x64xf32>
    %172 = arith.addf %170, %171 : vector<17x64xf32>
    %cst_79 = arith.constant 5.000000e-01 : f32
    %173 = vector.broadcast %cst_79 : f32 to vector<17x64xf32>
    %174 = arith.mulf %173, %172 : vector<17x64xf32>
    %cst_80 = arith.constant 1.41421354 : f32
    %175 = vector.broadcast %cst_80 : f32 to vector<17x64xf32>
    %176 = arith.divf %172, %175 : vector<17x64xf32>
    %177 = math.erf %176 : vector<17x64xf32>
    %cst_81 = arith.constant 1.000000e+00 : f32
    %178 = vector.broadcast %cst_81 : f32 to vector<17x64xf32>
    %179 = arith.addf %178, %177 : vector<17x64xf32>
    %180 = arith.mulf %174, %179 : vector<17x64xf32>
    %cst_82 = arith.constant dense<0.000000e+00> : vector<17x32xf32>
    %181 = tpu.matmul %180, %38, %cst_82 {dimension_numbers = #tpu.dot_dimension_numbers<[1], [0], [0], [1], [0, 0, 1, 1], [], []>} : vector<17x64xf32>, vector<64x32xf32>, vector<17x32xf32> -> vector<17x32xf32>
    %182 = vector.broadcast %40 : vector<1x32xf32> to vector<17x32xf32>
    %183 = arith.addf %181, %182 : vector<17x32xf32>
    %184 = arith.addf %147, %183 : vector<17x32xf32>
    %cst_83 = arith.constant dense<0.000000e+00> : vector<17xf32>
    %185 = vector.multi_reduction <add>, %16, %cst_83 [1] : vector<17x32xf32> to vector<17xf32>
    %186 = vector.shape_cast %185 : vector<17xf32> to vector<17x1xf32>
    %cst_84 = arith.constant 3.200000e+01 : f32
    %187 = vector.broadcast %cst_84 : f32 to vector<17x1xf32>
    %188 = arith.divf %186, %187 : vector<17x1xf32>
    %189 = vector.broadcast %188 : vector<17x1xf32> to vector<17x32xf32>
    %190 = arith.subf %16, %189 : vector<17x32xf32>
    %191 = arith.mulf %190, %190 : vector<17x32xf32>
    %cst_85 = arith.constant dense<0.000000e+00> : vector<17xf32>
    %192 = vector.multi_reduction <add>, %191, %cst_85 [1] : vector<17x32xf32> to vector<17xf32>
    %193 = vector.shape_cast %192 : vector<17xf32> to vector<17x1xf32>
    %cst_86 = arith.constant 3.200000e+01 : f32
    %194 = vector.broadcast %cst_86 : f32 to vector<17x1xf32>
    %195 = arith.divf %193, %194 : vector<17x1xf32>
    %196 = vector.broadcast %188 : vector<17x1xf32> to vector<17x32xf32>
    %197 = arith.subf %16, %196 : vector<17x32xf32>
    %cst_87 = arith.constant 9.99999974E-6 : f32
    %198 = vector.broadcast %cst_87 : f32 to vector<17x1xf32>
    %199 = arith.addf %195, %198 : vector<17x1xf32>
    %200 = math.rsqrt %199 : vector<17x1xf32>
    %201 = vector.broadcast %200 : vector<17x1xf32> to vector<17x32xf32>
    %202 = arith.mulf %197, %201 : vector<17x32xf32>
    %203 = vector.broadcast %18 : vector<1x32xf32> to vector<17x32xf32>
    %204 = arith.mulf %202, %203 : vector<17x32xf32>
    %205 = vector.broadcast %20 : vector<1x32xf32> to vector<17x32xf32>
    %206 = arith.addf %204, %205 : vector<17x32xf32>
    %cst_88 = arith.constant dense<0.000000e+00> : vector<17x96xf32>
    %207 = tpu.matmul %206, %22, %cst_88 {dimension_numbers = #tpu.dot_dimension_numbers<[1], [0], [0], [1], [0, 0, 1, 1], [], []>} : vector<17x32xf32>, vector<32x96xf32>, vector<17x96xf32> -> vector<17x96xf32>
    %208 = vector.broadcast %24 : vector<1x96xf32> to vector<17x96xf32>
    %209 = arith.addf %207, %208 : vector<17x96xf32>
    %210 = vector.extract_strided_slice %209 {offsets = [0, 0], sizes = [17, 8], strides = [1, 1]} : vector<17x96xf32> to vector<17x8xf32>
    %cst_89 = arith.constant 0.353553385 : f32
    %211 = vector.broadcast %cst_89 : f32 to vector<17x8xf32>
    %212 = arith.mulf %210, %211 : vector<17x8xf32>
    %213 = vector.extract_strided_slice %209 {offsets = [0, 32], sizes = [17, 8], strides = [1, 1]} : vector<17x96xf32> to vector<17x8xf32>
    %214 = vector.extract_strided_slice %209 {offsets = [0, 64], sizes = [17, 8], strides = [1, 1]} : vector<17x96xf32> to vector<17x8xf32>
    %cst_90 = arith.constant dense<0.000000e+00> : vector<17x17xf32>
    %215 = tpu.matmul %212, %213, %cst_90 {dimension_numbers = #tpu.dot_dimension_numbers<[1], [1], [0], [0], [0, 0, 1, 0], [], []>} : vector<17x8xf32>, vector<17x8xf32>, vector<17x17xf32> -> vector<17x17xf32>
    %cst_91 = arith.constant dense<0xFF800000> : vector<17xf32>
    %216 = vector.multi_reduction <maximumf>, %215, %cst_91 [1] : vector<17x17xf32> to vector<17xf32>
    %217 = vector.shape_cast %216 : vector<17xf32> to vector<17x1xf32>
    %218 = vector.broadcast %217 : vector<17x1xf32> to vector<17x17xf32>
    %219 = arith.subf %215, %218 : vector<17x17xf32>
    %220 = math.exp %219 : vector<17x17xf32>
    %cst_92 = arith.constant dense<0.000000e+00> : vector<17xf32>
    %221 = vector.multi_reduction <add>, %220, %cst_92 [1] : vector<17x17xf32> to vector<17xf32>
    %222 = vector.shape_cast %221 : vector<17xf32> to vector<17x1xf32>
    %223 = tpu.reciprocal %222 {approx = true} : vector<17x1xf32> -> vector<17x1xf32>
    %224 = vector.broadcast %223 : vector<17x1xf32> to vector<17x17xf32>
    %225 = arith.mulf %220, %224 : vector<17x17xf32>
    %cst_93 = arith.constant dense<0.000000e+00> : vector<17x8xf32>
    %226 = tpu.matmul %225, %214, %cst_93 {dimension_numbers = #tpu.dot_dimension_numbers<[1], [0], [0], [1], [0, 0, 1, 1], [], []>} : vector<17x17xf32>, vector<17x8xf32>, vector<17x8xf32> -> vector<17x8xf32>
    %227 = vector.extract_strided_slice %26 {offsets = [0, 0], sizes = [8, 32], strides = [1, 1]} : vector<32x32xf32> to vector<8x32xf32>
    %cst_94 = arith.constant dense<0.000000e+00> : vector<17x32xf32>
    %228 = tpu.matmul %226, %227, %cst_94 {dimension_numbers = #tpu.dot_dimension_numbers<[1], [0], [0], [1], [0, 0, 1, 1], [], []>} : vector<17x8xf32>, vector<8x32xf32>, vector<17x32xf32> -> vector<17x32xf32>
    %229 = vector.broadcast %28 : vector<1x32xf32> to vector<17x32xf32>
    %230 = arith.addf %229, %228 : vector<17x32xf32>
    %231 = vector.extract_strided_slice %209 {offsets = [0, 8], sizes = [17, 8], strides = [1, 1]} : vector<17x96xf32> to vector<17x8xf32>
    %cst_95 = arith.constant 0.353553385 : f32
    %232 = vector.broadcast %cst_95 : f32 to vector<17x8xf32>
    %233 = arith.mulf %231, %232 : vector<17x8xf32>
    %234 = vector.extract_strided_slice %209 {offsets = [0, 40], sizes = [17, 8], strides = [1, 1]} : vector<17x96xf32> to vector<17x8xf32>
    %235 = vector.extract_strided_slice %209 {offsets = [0, 72], sizes = [17, 8], strides = [1, 1]} : vector<17x96xf32> to vector<17x8xf32>
    %cst_96 = arith.constant dense<0.000000e+00> : vector<17x17xf32>
    %236 = tpu.matmul %233, %234, %cst_96 {dimension_numbers = #tpu.dot_dimension_numbers<[1], [1], [0], [0], [0, 0, 1, 0], [], []>} : vector<17x8xf32>, vector<17x8xf32>, vector<17x17xf32> -> vector<17x17xf32>
    %cst_97 = arith.constant dense<0xFF800000> : vector<17xf32>
    %237 = vector.multi_reduction <maximumf>, %236, %cst_97 [1] : vector<17x17xf32> to vector<17xf32>
    %238 = vector.shape_cast %237 : vector<17xf32> to vector<17x1xf32>
    %239 = vector.broadcast %238 : vector<17x1xf32> to vector<17x17xf32>
    %240 = arith.subf %236, %239 : vector<17x17xf32>
    %241 = math.exp %240 : vector<17x17xf32>
    %cst_98 = arith.constant dense<0.000000e+00> : vector<17xf32>
    %242 = vector.multi_reduction <add>, %241, %cst_98 [1] : vector<17x17xf32> to vector<17xf32>
    %243 = vector.shape_cast %242 : vector<17xf32> to vector<17x1xf32>
    %244 = tpu.reciprocal %243 {approx = true} : vector<17x1xf32> -> vector<17x1xf32>
    %245 = vector.broadcast %244 : vector<17x1xf32> to vector<17x17xf32>
    %246 = arith.mulf %241, %245 : vector<17x17xf32>
    %cst_99 = arith.constant dense<0.000000e+00> : vector<17x8xf32>
    %247 = tpu.matmul %246, %235, %cst_99 {dimension_numbers = #tpu.dot_dimension_numbers<[1], [0], [0], [1], [0, 0, 1, 1], [], []>} : vector<17x17xf32>, vector<17x8xf32>, vector<17x8xf32> -> vector<17x8xf32>
    %248 = vector.extract_strided_slice %26 {offsets = [8, 0], sizes = [8, 32], strides = [1, 1]} : vector<32x32xf32> to vector<8x32xf32>
    %cst_100 = arith.constant dense<0.000000e+00> : vector<17x32xf32>
    %249 = tpu.matmul %247, %248, %cst_100 {dimension_numbers = #tpu.dot_dimension_numbers<[1], [0], [0], [1], [0, 0, 1, 1], [], []>} : vector<17x8xf32>, vector<8x32xf32>, vector<17x32xf32> -> vector<17x32xf32>
    %250 = arith.addf %230, %249 : vector<17x32xf32>
    %251 = vector.extract_strided_slice %209 {offsets = [0, 16], sizes = [17, 8], strides = [1, 1]} : vector<17x96xf32> to vector<17x8xf32>
    %cst_101 = arith.constant 0.353553385 : f32
    %252 = vector.broadcast %cst_101 : f32 to vector<17x8xf32>
    %253 = arith.mulf %251, %252 : vector<17x8xf32>
    %254 = vector.extract_strided_slice %209 {offsets = [0, 48], sizes = [17, 8], strides = [1, 1]} : vector<17x96xf32> to vector<17x8xf32>
    %255 = vector.extract_strided_slice %209 {offsets = [0, 80], sizes = [17, 8], strides = [1, 1]} : vector<17x96xf32> to vector<17x8xf32>
    %cst_102 = arith.constant dense<0.000000e+00> : vector<17x17xf32>
    %256 = tpu.matmul %253, %254, %cst_102 {dimension_numbers = #tpu.dot_dimension_numbers<[1], [1], [0], [0], [0, 0, 1, 0], [], []>} : vector<17x8xf32>, vector<17x8xf32>, vector<17x17xf32> -> vector<17x17xf32>
    %cst_103 = arith.constant dense<0xFF800000> : vector<17xf32>
    %257 = vector.multi_reduction <maximumf>, %256, %cst_103 [1] : vector<17x17xf32> to vector<17xf32>
    %258 = vector.shape_cast %257 : vector<17xf32> to vector<17x1xf32>
    %259 = vector.broadcast %258 : vector<17x1xf32> to vector<17x17xf32>
    %260 = arith.subf %256, %259 : vector<17x17xf32>
    %261 = math.exp %260 : vector<17x17xf32>
    %cst_104 = arith.constant dense<0.000000e+00> : vector<17xf32>
    %262 = vector.multi_reduction <add>, %261, %cst_104 [1] : vector<17x17xf32> to vector<17xf32>
    %263 = vector.shape_cast %262 : vector<17xf32> to vector<17x1xf32>
    %264 = tpu.reciprocal %263 {approx = true} : vector<17x1xf32> -> vector<17x1xf32>
    %265 = vector.broadcast %264 : vector<17x1xf32> to vector<17x17xf32>
    %266 = arith.mulf %261, %265 : vector<17x17xf32>
    %cst_105 = arith.constant dense<0.000000e+00> : vector<17x8xf32>
    %267 = tpu.matmul %266, %255, %cst_105 {dimension_numbers = #tpu.dot_dimension_numbers<[1], [0], [0], [1], [0, 0, 1, 1], [], []>} : vector<17x17xf32>, vector<17x8xf32>, vector<17x8xf32> -> vector<17x8xf32>
    %268 = vector.extract_strided_slice %26 {offsets = [16, 0], sizes = [8, 32], strides = [1, 1]} : vector<32x32xf32> to vector<8x32xf32>
    %cst_106 = arith.constant dense<0.000000e+00> : vector<17x32xf32>
    %269 = tpu.matmul %267, %268, %cst_106 {dimension_numbers = #tpu.dot_dimension_numbers<[1], [0], [0], [1], [0, 0, 1, 1], [], []>} : vector<17x8xf32>, vector<8x32xf32>, vector<17x32xf32> -> vector<17x32xf32>
    %270 = arith.addf %250, %269 : vector<17x32xf32>
    %271 = vector.extract_strided_slice %209 {offsets = [0, 24], sizes = [17, 8], strides = [1, 1]} : vector<17x96xf32> to vector<17x8xf32>
    %cst_107 = arith.constant 0.353553385 : f32
    %272 = vector.broadcast %cst_107 : f32 to vector<17x8xf32>
    %273 = arith.mulf %271, %272 : vector<17x8xf32>
    %274 = vector.extract_strided_slice %209 {offsets = [0, 56], sizes = [17, 8], strides = [1, 1]} : vector<17x96xf32> to vector<17x8xf32>
    %275 = vector.extract_strided_slice %209 {offsets = [0, 88], sizes = [17, 8], strides = [1, 1]} : vector<17x96xf32> to vector<17x8xf32>
    %cst_108 = arith.constant dense<0.000000e+00> : vector<17x17xf32>
    %276 = tpu.matmul %273, %274, %cst_108 {dimension_numbers = #tpu.dot_dimension_numbers<[1], [1], [0], [0], [0, 0, 1, 0], [], []>} : vector<17x8xf32>, vector<17x8xf32>, vector<17x17xf32> -> vector<17x17xf32>
    %cst_109 = arith.constant dense<0xFF800000> : vector<17xf32>
    %277 = vector.multi_reduction <maximumf>, %276, %cst_109 [1] : vector<17x17xf32> to vector<17xf32>
    %278 = vector.shape_cast %277 : vector<17xf32> to vector<17x1xf32>
    %279 = vector.broadcast %278 : vector<17x1xf32> to vector<17x17xf32>
    %280 = arith.subf %276, %279 : vector<17x17xf32>
    %281 = math.exp %280 : vector<17x17xf32>
    %cst_110 = arith.constant dense<0.000000e+00> : vector<17xf32>
    %282 = vector.multi_reduction <add>, %281, %cst_110 [1] : vector<17x17xf32> to vector<17xf32>
    %283 = vector.shape_cast %282 : vector<17xf32> to vector<17x1xf32>
    %284 = tpu.reciprocal %283 {approx = true} : vector<17x1xf32> -> vector<17x1xf32>
    %285 = vector.broadcast %284 : vector<17x1xf32> to vector<17x17xf32>
    %286 = arith.mulf %281, %285 : vector<17x17xf32>
    %cst_111 = arith.constant dense<0.000000e+00> : vector<17x8xf32>
    %287 = tpu.matmul %286, %275, %cst_111 {dimension_numbers = #tpu.dot_dimension_numbers<[1], [0], [0], [1], [0, 0, 1, 1], [], []>} : vector<17x17xf32>, vector<17x8xf32>, vector<17x8xf32> -> vector<17x8xf32>
    %288 = vector.extract_strided_slice %26 {offsets = [24, 0], sizes = [8, 32], strides = [1, 1]} : vector<32x32xf32> to vector<8x32xf32>
    %cst_112 = arith.constant dense<0.000000e+00> : vector<17x32xf32>
    %289 = tpu.matmul %287, %288, %cst_112 {dimension_numbers = #tpu.dot_dimension_numbers<[1], [0], [0], [1], [0, 0, 1, 1], [], []>} : vector<17x8xf32>, vector<8x32xf32>, vector<17x32xf32> -> vector<17x32xf32>
    %290 = arith.addf %270, %289 : vector<17x32xf32>
    %291 = arith.addf %16, %290 : vector<17x32xf32>
    %cst_113 = arith.constant dense<0.000000e+00> : vector<17xf32>
    %292 = vector.multi_reduction <add>, %291, %cst_113 [1] : vector<17x32xf32> to vector<17xf32>
    %293 = vector.shape_cast %292 : vector<17xf32> to vector<17x1xf32>
    %cst_114 = arith.constant 3.200000e+01 : f32
    %294 = vector.broadcast %cst_114 : f32 to vector<17x1xf32>
    %295 = arith.divf %293, %294 : vector<17x1xf32>
    %296 = vector.broadcast %295 : vector<17x1xf32> to vector<17x32xf32>
    %297 = arith.subf %291, %296 : vector<17x32xf32>
    %298 = arith.mulf %297, %297 : vector<17x32xf32>
    %cst_115 = arith.constant dense<0.000000e+00> : vector<17xf32>
    %299 = vector.multi_reduction <add>, %298, %cst_115 [1] : vector<17x32xf32> to vector<17xf32>
    %300 = vector.shape_cast %299 : vector<17xf32> to vector<17x1xf32>
    %cst_116 = arith.constant 3.200000e+01 : f32
    %301 = vector.broadcast %cst_116 : f32 to vector<17x1xf32>
    %302 = arith.divf %300, %301 : vector<17x1xf32>
    %303 = vector.broadcast %295 : vector<17x1xf32> to vector<17x32xf32>
    %304 = arith.subf %291, %303 : vector<17x32xf32>
    %cst_117 = arith.constant 9.99999974E-6 : f32
    %305 = vector.broadcast %cst_117 : f32 to vector<17x1xf32>
    %306 = arith.addf %302, %305 : vector<17x1xf32>
    %307 = math.rsqrt %306 : vector<17x1xf32>
    %308 = vector.broadcast %307 : vector<17x1xf32> to vector<17x32xf32>
    %309 = arith.mulf %304, %308 : vector<17x32xf32>
    %310 = vector.broadcast %30 : vector<1x32xf32> to vector<17x32xf32>
    %311 = arith.mulf %309, %310 : vector<17x32xf32>
    %312 = vector.broadcast %32 : vector<1x32xf32> to vector<17x32xf32>
    %313 = arith.addf %311, %312 : vector<17x32xf32>
    %cst_118 = arith.constant dense<0.000000e+00> : vector<17x64xf32>
    %314 = tpu.matmul %313, %34, %cst_118 {dimension_numbers = #tpu.dot_dimension_numbers<[1], [0], [0], [1], [0, 0, 1, 1], [], []>} : vector<17x32xf32>, vector<32x64xf32>, vector<17x64xf32> -> vector<17x64xf32>
    %315 = vector.broadcast %36 : vector<1x64xf32> to vector<17x64xf32>
    %316 = arith.addf %314, %315 : vector<17x64xf32>
    %cst_119 = arith.constant 5.000000e-01 : f32
    %317 = vector.broadcast %cst_119 : f32 to vector<17x64xf32>
    %318 = arith.mulf %317, %316 : vector<17x64xf32>
    %cst_120 = arith.constant 1.41421354 : f32
    %319 = vector.broadcast %cst_120 : f32 to vector<17x64xf32>
    %320 = arith.divf %316, %319 : vector<17x64xf32>
    %321 = math.erf %320 : vector<17x64xf32>
    %cst_121 = arith.constant 1.000000e+00 : f32
    %322 = vector.broadcast %cst_121 : f32 to vector<17x64xf32>
    %323 = arith.addf %322, %321 : vector<17x64xf32>
    %324 = arith.mulf %318, %323 : vector<17x64xf32>
    %cst_122 = arith.constant dense<0.000000e+00> : vector<17x32xf32>
    %325 = tpu.matmul %324, %38, %cst_122 {dimension_numbers = #tpu.dot_dimension_numbers<[1], [0], [0], [1], [0, 0, 1, 1], [], []>} : vector<17x64xf32>, vector<64x32xf32>, vector<17x32xf32> -> vector<17x32xf32>
    %326 = vector.broadcast %40 : vector<1x32xf32> to vector<17x32xf32>
    %327 = arith.addf %325, %326 : vector<17x32xf32>
    %328 = arith.addf %291, %327 : vector<17x32xf32>
    %c1 = arith.constant 1 : index
    %c0_123 = arith.constant 0 : index
    %c0_124 = arith.constant 0 : index
    %329 = vector.load %arg4[%c1, %c0_123, %c0_124] : memref<2x1x32xf32, #tpu.memory_space<vmem>>, vector<1x1x32xf32>
    %330 = vector.shape_cast %329 : vector<1x1x32xf32> to vector<1x32xf32>
    %c1_125 = arith.constant 1 : index
    %c0_126 = arith.constant 0 : index
    %c0_127 = arith.constant 0 : index
    %331 = vector.load %arg5[%c1_125, %c0_126, %c0_127] : memref<2x1x32xf32, #tpu.memory_space<vmem>>, vector<1x1x32xf32>
    %332 = vector.shape_cast %331 : vector<1x1x32xf32> to vector<1x32xf32>
    %c1_128 = arith.constant 1 : index
    %c0_129 = arith.constant 0 : index
    %c0_130 = arith.constant 0 : index
    %333 = vector.load %arg6[%c1_128, %c0_129, %c0_130] : memref<2x32x96xf32, #tpu.memory_space<vmem>>, vector<1x32x96xf32>
    %334 = vector.shape_cast %333 : vector<1x32x96xf32> to vector<32x96xf32>
    %c1_131 = arith.constant 1 : index
    %c0_132 = arith.constant 0 : index
    %c0_133 = arith.constant 0 : index
    %335 = vector.load %arg7[%c1_131, %c0_132, %c0_133] : memref<2x1x96xf32, #tpu.memory_space<vmem>>, vector<1x1x96xf32>
    %336 = vector.shape_cast %335 : vector<1x1x96xf32> to vector<1x96xf32>
    %c1_134 = arith.constant 1 : index
    %c0_135 = arith.constant 0 : index
    %c0_136 = arith.constant 0 : index
    %337 = vector.load %arg8[%c1_134, %c0_135, %c0_136] : memref<2x32x32xf32, #tpu.memory_space<vmem>>, vector<1x32x32xf32>
    %338 = vector.shape_cast %337 : vector<1x32x32xf32> to vector<32x32xf32>
    %c1_137 = arith.constant 1 : index
    %c0_138 = arith.constant 0 : index
    %c0_139 = arith.constant 0 : index
    %339 = vector.load %arg9[%c1_137, %c0_138, %c0_139] : memref<2x1x32xf32, #tpu.memory_space<vmem>>, vector<1x1x32xf32>
    %340 = vector.shape_cast %339 : vector<1x1x32xf32> to vector<1x32xf32>
    %c1_140 = arith.constant 1 : index
    %c0_141 = arith.constant 0 : index
    %c0_142 = arith.constant 0 : index
    %341 = vector.load %arg10[%c1_140, %c0_141, %c0_142] : memref<2x1x32xf32, #tpu.memory_space<vmem>>, vector<1x1x32xf32>
    %342 = vector.shape_cast %341 : vector<1x1x32xf32> to vector<1x32xf32>
    %c1_143 = arith.constant 1 : index
    %c0_144 = arith.constant 0 : index
    %c0_145 = arith.constant 0 : index
    %343 = vector.load %arg11[%c1_143, %c0_144, %c0_145] : memref<2x1x32xf32, #tpu.memory_space<vmem>>, vector<1x1x32xf32>
    %344 = vector.shape_cast %343 : vector<1x1x32xf32> to vector<1x32xf32>
    %c1_146 = arith.constant 1 : index
    %c0_147 = arith.constant 0 : index
    %c0_148 = arith.constant 0 : index
    %345 = vector.load %arg12[%c1_146, %c0_147, %c0_148] : memref<2x32x64xf32, #tpu.memory_space<vmem>>, vector<1x32x64xf32>
    %346 = vector.shape_cast %345 : vector<1x32x64xf32> to vector<32x64xf32>
    %c1_149 = arith.constant 1 : index
    %c0_150 = arith.constant 0 : index
    %c0_151 = arith.constant 0 : index
    %347 = vector.load %arg13[%c1_149, %c0_150, %c0_151] : memref<2x1x64xf32, #tpu.memory_space<vmem>>, vector<1x1x64xf32>
    %348 = vector.shape_cast %347 : vector<1x1x64xf32> to vector<1x64xf32>
    %c1_152 = arith.constant 1 : index
    %c0_153 = arith.constant 0 : index
    %c0_154 = arith.constant 0 : index
    %349 = vector.load %arg14[%c1_152, %c0_153, %c0_154] : memref<2x64x32xf32, #tpu.memory_space<vmem>>, vector<1x64x32xf32>
    %350 = vector.shape_cast %349 : vector<1x64x32xf32> to vector<64x32xf32>
    %c1_155 = arith.constant 1 : index
    %c0_156 = arith.constant 0 : index
    %c0_157 = arith.constant 0 : index
    %351 = vector.load %arg15[%c1_155, %c0_156, %c0_157] : memref<2x1x32xf32, #tpu.memory_space<vmem>>, vector<1x1x32xf32>
    %352 = vector.shape_cast %351 : vector<1x1x32xf32> to vector<1x32xf32>
    %cst_158 = arith.constant dense<0.000000e+00> : vector<17xf32>
    %353 = vector.multi_reduction <add>, %184, %cst_158 [1] : vector<17x32xf32> to vector<17xf32>
    %354 = vector.shape_cast %353 : vector<17xf32> to vector<17x1xf32>
    %cst_159 = arith.constant 3.200000e+01 : f32
    %355 = vector.broadcast %cst_159 : f32 to vector<17x1xf32>
    %356 = arith.divf %354, %355 : vector<17x1xf32>
    %357 = vector.broadcast %356 : vector<17x1xf32> to vector<17x32xf32>
    %358 = arith.subf %184, %357 : vector<17x32xf32>
    %359 = arith.mulf %358, %358 : vector<17x32xf32>
    %cst_160 = arith.constant dense<0.000000e+00> : vector<17xf32>
    %360 = vector.multi_reduction <add>, %359, %cst_160 [1] : vector<17x32xf32> to vector<17xf32>
    %361 = vector.shape_cast %360 : vector<17xf32> to vector<17x1xf32>
    %cst_161 = arith.constant 3.200000e+01 : f32
    %362 = vector.broadcast %cst_161 : f32 to vector<17x1xf32>
    %363 = arith.divf %361, %362 : vector<17x1xf32>
    %364 = vector.broadcast %356 : vector<17x1xf32> to vector<17x32xf32>
    %365 = arith.subf %184, %364 : vector<17x32xf32>
    %cst_162 = arith.constant 9.99999974E-6 : f32
    %366 = vector.broadcast %cst_162 : f32 to vector<17x1xf32>
    %367 = arith.addf %363, %366 : vector<17x1xf32>
    %368 = math.rsqrt %367 : vector<17x1xf32>
    %369 = vector.broadcast %368 : vector<17x1xf32> to vector<17x32xf32>
    %370 = arith.mulf %365, %369 : vector<17x32xf32>
    %371 = vector.broadcast %330 : vector<1x32xf32> to vector<17x32xf32>
    %372 = arith.mulf %370, %371 : vector<17x32xf32>
    %373 = vector.broadcast %332 : vector<1x32xf32> to vector<17x32xf32>
    %374 = arith.addf %372, %373 : vector<17x32xf32>
    %cst_163 = arith.constant dense<0.000000e+00> : vector<17x96xf32>
    %375 = tpu.matmul %374, %334, %cst_163 {dimension_numbers = #tpu.dot_dimension_numbers<[1], [0], [0], [1], [0, 0, 1, 1], [], []>} : vector<17x32xf32>, vector<32x96xf32>, vector<17x96xf32> -> vector<17x96xf32>
    %376 = vector.broadcast %336 : vector<1x96xf32> to vector<17x96xf32>
    %377 = arith.addf %375, %376 : vector<17x96xf32>
    %378 = vector.extract_strided_slice %377 {offsets = [0, 0], sizes = [17, 8], strides = [1, 1]} : vector<17x96xf32> to vector<17x8xf32>
    %cst_164 = arith.constant 0.353553385 : f32
    %379 = vector.broadcast %cst_164 : f32 to vector<17x8xf32>
    %380 = arith.mulf %378, %379 : vector<17x8xf32>
    %381 = vector.extract_strided_slice %377 {offsets = [0, 32], sizes = [17, 8], strides = [1, 1]} : vector<17x96xf32> to vector<17x8xf32>
    %382 = vector.extract_strided_slice %377 {offsets = [0, 64], sizes = [17, 8], strides = [1, 1]} : vector<17x96xf32> to vector<17x8xf32>
    %cst_165 = arith.constant dense<0.000000e+00> : vector<17x17xf32>
    %383 = tpu.matmul %380, %381, %cst_165 {dimension_numbers = #tpu.dot_dimension_numbers<[1], [1], [0], [0], [0, 0, 1, 0], [], []>} : vector<17x8xf32>, vector<17x8xf32>, vector<17x17xf32> -> vector<17x17xf32>
    %cst_166 = arith.constant dense<0xFF800000> : vector<17xf32>
    %384 = vector.multi_reduction <maximumf>, %383, %cst_166 [1] : vector<17x17xf32> to vector<17xf32>
    %385 = vector.shape_cast %384 : vector<17xf32> to vector<17x1xf32>
    %386 = vector.broadcast %385 : vector<17x1xf32> to vector<17x17xf32>
    %387 = arith.subf %383, %386 : vector<17x17xf32>
    %388 = math.exp %387 : vector<17x17xf32>
    %cst_167 = arith.constant dense<0.000000e+00> : vector<17xf32>
    %389 = vector.multi_reduction <add>, %388, %cst_167 [1] : vector<17x17xf32> to vector<17xf32>
    %390 = vector.shape_cast %389 : vector<17xf32> to vector<17x1xf32>
    %391 = tpu.reciprocal %390 {approx = true} : vector<17x1xf32> -> vector<17x1xf32>
    %392 = vector.broadcast %391 : vector<17x1xf32> to vector<17x17xf32>
    %393 = arith.mulf %388, %392 : vector<17x17xf32>
    %cst_168 = arith.constant dense<0.000000e+00> : vector<17x8xf32>
    %394 = tpu.matmul %393, %382, %cst_168 {dimension_numbers = #tpu.dot_dimension_numbers<[1], [0], [0], [1], [0, 0, 1, 1], [], []>} : vector<17x17xf32>, vector<17x8xf32>, vector<17x8xf32> -> vector<17x8xf32>
    %395 = vector.extract_strided_slice %338 {offsets = [0, 0], sizes = [8, 32], strides = [1, 1]} : vector<32x32xf32> to vector<8x32xf32>
    %cst_169 = arith.constant dense<0.000000e+00> : vector<17x32xf32>
    %396 = tpu.matmul %394, %395, %cst_169 {dimension_numbers = #tpu.dot_dimension_numbers<[1], [0], [0], [1], [0, 0, 1, 1], [], []>} : vector<17x8xf32>, vector<8x32xf32>, vector<17x32xf32> -> vector<17x32xf32>
    %397 = vector.broadcast %340 : vector<1x32xf32> to vector<17x32xf32>
    %398 = arith.addf %397, %396 : vector<17x32xf32>
    %399 = vector.extract_strided_slice %377 {offsets = [0, 8], sizes = [17, 8], strides = [1, 1]} : vector<17x96xf32> to vector<17x8xf32>
    %cst_170 = arith.constant 0.353553385 : f32
    %400 = vector.broadcast %cst_170 : f32 to vector<17x8xf32>
    %401 = arith.mulf %399, %400 : vector<17x8xf32>
    %402 = vector.extract_strided_slice %377 {offsets = [0, 40], sizes = [17, 8], strides = [1, 1]} : vector<17x96xf32> to vector<17x8xf32>
    %403 = vector.extract_strided_slice %377 {offsets = [0, 72], sizes = [17, 8], strides = [1, 1]} : vector<17x96xf32> to vector<17x8xf32>
    %cst_171 = arith.constant dense<0.000000e+00> : vector<17x17xf32>
    %404 = tpu.matmul %401, %402, %cst_171 {dimension_numbers = #tpu.dot_dimension_numbers<[1], [1], [0], [0], [0, 0, 1, 0], [], []>} : vector<17x8xf32>, vector<17x8xf32>, vector<17x17xf32> -> vector<17x17xf32>
    %cst_172 = arith.constant dense<0xFF800000> : vector<17xf32>
    %405 = vector.multi_reduction <maximumf>, %404, %cst_172 [1] : vector<17x17xf32> to vector<17xf32>
    %406 = vector.shape_cast %405 : vector<17xf32> to vector<17x1xf32>
    %407 = vector.broadcast %406 : vector<17x1xf32> to vector<17x17xf32>
    %408 = arith.subf %404, %407 : vector<17x17xf32>
    %409 = math.exp %408 : vector<17x17xf32>
    %cst_173 = arith.constant dense<0.000000e+00> : vector<17xf32>
    %410 = vector.multi_reduction <add>, %409, %cst_173 [1] : vector<17x17xf32> to vector<17xf32>
    %411 = vector.shape_cast %410 : vector<17xf32> to vector<17x1xf32>
    %412 = tpu.reciprocal %411 {approx = true} : vector<17x1xf32> -> vector<17x1xf32>
    %413 = vector.broadcast %412 : vector<17x1xf32> to vector<17x17xf32>
    %414 = arith.mulf %409, %413 : vector<17x17xf32>
    %cst_174 = arith.constant dense<0.000000e+00> : vector<17x8xf32>
    %415 = tpu.matmul %414, %403, %cst_174 {dimension_numbers = #tpu.dot_dimension_numbers<[1], [0], [0], [1], [0, 0, 1, 1], [], []>} : vector<17x17xf32>, vector<17x8xf32>, vector<17x8xf32> -> vector<17x8xf32>
    %416 = vector.extract_strided_slice %338 {offsets = [8, 0], sizes = [8, 32], strides = [1, 1]} : vector<32x32xf32> to vector<8x32xf32>
    %cst_175 = arith.constant dense<0.000000e+00> : vector<17x32xf32>
    %417 = tpu.matmul %415, %416, %cst_175 {dimension_numbers = #tpu.dot_dimension_numbers<[1], [0], [0], [1], [0, 0, 1, 1], [], []>} : vector<17x8xf32>, vector<8x32xf32>, vector<17x32xf32> -> vector<17x32xf32>
    %418 = arith.addf %398, %417 : vector<17x32xf32>
    %419 = vector.extract_strided_slice %377 {offsets = [0, 16], sizes = [17, 8], strides = [1, 1]} : vector<17x96xf32> to vector<17x8xf32>
    %cst_176 = arith.constant 0.353553385 : f32
    %420 = vector.broadcast %cst_176 : f32 to vector<17x8xf32>
    %421 = arith.mulf %419, %420 : vector<17x8xf32>
    %422 = vector.extract_strided_slice %377 {offsets = [0, 48], sizes = [17, 8], strides = [1, 1]} : vector<17x96xf32> to vector<17x8xf32>
    %423 = vector.extract_strided_slice %377 {offsets = [0, 80], sizes = [17, 8], strides = [1, 1]} : vector<17x96xf32> to vector<17x8xf32>
    %cst_177 = arith.constant dense<0.000000e+00> : vector<17x17xf32>
    %424 = tpu.matmul %421, %422, %cst_177 {dimension_numbers = #tpu.dot_dimension_numbers<[1], [1], [0], [0], [0, 0, 1, 0], [], []>} : vector<17x8xf32>, vector<17x8xf32>, vector<17x17xf32> -> vector<17x17xf32>
    %cst_178 = arith.constant dense<0xFF800000> : vector<17xf32>
    %425 = vector.multi_reduction <maximumf>, %424, %cst_178 [1] : vector<17x17xf32> to vector<17xf32>
    %426 = vector.shape_cast %425 : vector<17xf32> to vector<17x1xf32>
    %427 = vector.broadcast %426 : vector<17x1xf32> to vector<17x17xf32>
    %428 = arith.subf %424, %427 : vector<17x17xf32>
    %429 = math.exp %428 : vector<17x17xf32>
    %cst_179 = arith.constant dense<0.000000e+00> : vector<17xf32>
    %430 = vector.multi_reduction <add>, %429, %cst_179 [1] : vector<17x17xf32> to vector<17xf32>
    %431 = vector.shape_cast %430 : vector<17xf32> to vector<17x1xf32>
    %432 = tpu.reciprocal %431 {approx = true} : vector<17x1xf32> -> vector<17x1xf32>
    %433 = vector.broadcast %432 : vector<17x1xf32> to vector<17x17xf32>
    %434 = arith.mulf %429, %433 : vector<17x17xf32>
    %cst_180 = arith.constant dense<0.000000e+00> : vector<17x8xf32>
    %435 = tpu.matmul %434, %423, %cst_180 {dimension_numbers = #tpu.dot_dimension_numbers<[1], [0], [0], [1], [0, 0, 1, 1], [], []>} : vector<17x17xf32>, vector<17x8xf32>, vector<17x8xf32> -> vector<17x8xf32>
    %436 = vector.extract_strided_slice %338 {offsets = [16, 0], sizes = [8, 32], strides = [1, 1]} : vector<32x32xf32> to vector<8x32xf32>
    %cst_181 = arith.constant dense<0.000000e+00> : vector<17x32xf32>
    %437 = tpu.matmul %435, %436, %cst_181 {dimension_numbers = #tpu.dot_dimension_numbers<[1], [0], [0], [1], [0, 0, 1, 1], [], []>} : vector<17x8xf32>, vector<8x32xf32>, vector<17x32xf32> -> vector<17x32xf32>
    %438 = arith.addf %418, %437 : vector<17x32xf32>
    %439 = vector.extract_strided_slice %377 {offsets = [0, 24], sizes = [17, 8], strides = [1, 1]} : vector<17x96xf32> to vector<17x8xf32>
    %cst_182 = arith.constant 0.353553385 : f32
    %440 = vector.broadcast %cst_182 : f32 to vector<17x8xf32>
    %441 = arith.mulf %439, %440 : vector<17x8xf32>
    %442 = vector.extract_strided_slice %377 {offsets = [0, 56], sizes = [17, 8], strides = [1, 1]} : vector<17x96xf32> to vector<17x8xf32>
    %443 = vector.extract_strided_slice %377 {offsets = [0, 88], sizes = [17, 8], strides = [1, 1]} : vector<17x96xf32> to vector<17x8xf32>
    %cst_183 = arith.constant dense<0.000000e+00> : vector<17x17xf32>
    %444 = tpu.matmul %441, %442, %cst_183 {dimension_numbers = #tpu.dot_dimension_numbers<[1], [1], [0], [0], [0, 0, 1, 0], [], []>} : vector<17x8xf32>, vector<17x8xf32>, vector<17x17xf32> -> vector<17x17xf32>
    %cst_184 = arith.constant dense<0xFF800000> : vector<17xf32>
    %445 = vector.multi_reduction <maximumf>, %444, %cst_184 [1] : vector<17x17xf32> to vector<17xf32>
    %446 = vector.shape_cast %445 : vector<17xf32> to vector<17x1xf32>
    %447 = vector.broadcast %446 : vector<17x1xf32> to vector<17x17xf32>
    %448 = arith.subf %444, %447 : vector<17x17xf32>
    %449 = math.exp %448 : vector<17x17xf32>
    %cst_185 = arith.constant dense<0.000000e+00> : vector<17xf32>
    %450 = vector.multi_reduction <add>, %449, %cst_185 [1] : vector<17x17xf32> to vector<17xf32>
    %451 = vector.shape_cast %450 : vector<17xf32> to vector<17x1xf32>
    %452 = tpu.reciprocal %451 {approx = true} : vector<17x1xf32> -> vector<17x1xf32>
    %453 = vector.broadcast %452 : vector<17x1xf32> to vector<17x17xf32>
    %454 = arith.mulf %449, %453 : vector<17x17xf32>
    %cst_186 = arith.constant dense<0.000000e+00> : vector<17x8xf32>
    %455 = tpu.matmul %454, %443, %cst_186 {dimension_numbers = #tpu.dot_dimension_numbers<[1], [0], [0], [1], [0, 0, 1, 1], [], []>} : vector<17x17xf32>, vector<17x8xf32>, vector<17x8xf32> -> vector<17x8xf32>
    %456 = vector.extract_strided_slice %338 {offsets = [24, 0], sizes = [8, 32], strides = [1, 1]} : vector<32x32xf32> to vector<8x32xf32>
    %cst_187 = arith.constant dense<0.000000e+00> : vector<17x32xf32>
    %457 = tpu.matmul %455, %456, %cst_187 {dimension_numbers = #tpu.dot_dimension_numbers<[1], [0], [0], [1], [0, 0, 1, 1], [], []>} : vector<17x8xf32>, vector<8x32xf32>, vector<17x32xf32> -> vector<17x32xf32>
    %458 = arith.addf %438, %457 : vector<17x32xf32>
    %459 = arith.addf %184, %458 : vector<17x32xf32>
    %cst_188 = arith.constant dense<0.000000e+00> : vector<17xf32>
    %460 = vector.multi_reduction <add>, %459, %cst_188 [1] : vector<17x32xf32> to vector<17xf32>
    %461 = vector.shape_cast %460 : vector<17xf32> to vector<17x1xf32>
    %cst_189 = arith.constant 3.200000e+01 : f32
    %462 = vector.broadcast %cst_189 : f32 to vector<17x1xf32>
    %463 = arith.divf %461, %462 : vector<17x1xf32>
    %464 = vector.broadcast %463 : vector<17x1xf32> to vector<17x32xf32>
    %465 = arith.subf %459, %464 : vector<17x32xf32>
    %466 = arith.mulf %465, %465 : vector<17x32xf32>
    %cst_190 = arith.constant dense<0.000000e+00> : vector<17xf32>
    %467 = vector.multi_reduction <add>, %466, %cst_190 [1] : vector<17x32xf32> to vector<17xf32>
    %468 = vector.shape_cast %467 : vector<17xf32> to vector<17x1xf32>
    %cst_191 = arith.constant 3.200000e+01 : f32
    %469 = vector.broadcast %cst_191 : f32 to vector<17x1xf32>
    %470 = arith.divf %468, %469 : vector<17x1xf32>
    %471 = vector.broadcast %463 : vector<17x1xf32> to vector<17x32xf32>
    %472 = arith.subf %459, %471 : vector<17x32xf32>
    %cst_192 = arith.constant 9.99999974E-6 : f32
    %473 = vector.broadcast %cst_192 : f32 to vector<17x1xf32>
    %474 = arith.addf %470, %473 : vector<17x1xf32>
    %475 = math.rsqrt %474 : vector<17x1xf32>
    %476 = vector.broadcast %475 : vector<17x1xf32> to vector<17x32xf32>
    %477 = arith.mulf %472, %476 : vector<17x32xf32>
    %478 = vector.broadcast %342 : vector<1x32xf32> to vector<17x32xf32>
    %479 = arith.mulf %477, %478 : vector<17x32xf32>
    %480 = vector.broadcast %344 : vector<1x32xf32> to vector<17x32xf32>
    %481 = arith.addf %479, %480 : vector<17x32xf32>
    %cst_193 = arith.constant dense<0.000000e+00> : vector<17x64xf32>
    %482 = tpu.matmul %481, %346, %cst_193 {dimension_numbers = #tpu.dot_dimension_numbers<[1], [0], [0], [1], [0, 0, 1, 1], [], []>} : vector<17x32xf32>, vector<32x64xf32>, vector<17x64xf32> -> vector<17x64xf32>
    %483 = vector.broadcast %348 : vector<1x64xf32> to vector<17x64xf32>
    %484 = arith.addf %482, %483 : vector<17x64xf32>
    %cst_194 = arith.constant 5.000000e-01 : f32
    %485 = vector.broadcast %cst_194 : f32 to vector<17x64xf32>
    %486 = arith.mulf %485, %484 : vector<17x64xf32>
    %cst_195 = arith.constant 1.41421354 : f32
    %487 = vector.broadcast %cst_195 : f32 to vector<17x64xf32>
    %488 = arith.divf %484, %487 : vector<17x64xf32>
    %489 = math.erf %488 : vector<17x64xf32>
    %cst_196 = arith.constant 1.000000e+00 : f32
    %490 = vector.broadcast %cst_196 : f32 to vector<17x64xf32>
    %491 = arith.addf %490, %489 : vector<17x64xf32>
    %492 = arith.mulf %486, %491 : vector<17x64xf32>
    %cst_197 = arith.constant dense<0.000000e+00> : vector<17x32xf32>
    %493 = tpu.matmul %492, %350, %cst_197 {dimension_numbers = #tpu.dot_dimension_numbers<[1], [0], [0], [1], [0, 0, 1, 1], [], []>} : vector<17x64xf32>, vector<64x32xf32>, vector<17x32xf32> -> vector<17x32xf32>
    %494 = vector.broadcast %352 : vector<1x32xf32> to vector<17x32xf32>
    %495 = arith.addf %493, %494 : vector<17x32xf32>
    %496 = arith.addf %459, %495 : vector<17x32xf32>
    %cst_198 = arith.constant dense<0.000000e+00> : vector<17xf32>
    %497 = vector.multi_reduction <add>, %328, %cst_198 [1] : vector<17x32xf32> to vector<17xf32>
    %498 = vector.shape_cast %497 : vector<17xf32> to vector<17x1xf32>
    %cst_199 = arith.constant 3.200000e+01 : f32
    %499 = vector.broadcast %cst_199 : f32 to vector<17x1xf32>
    %500 = arith.divf %498, %499 : vector<17x1xf32>
    %501 = vector.broadcast %500 : vector<17x1xf32> to vector<17x32xf32>
    %502 = arith.subf %328, %501 : vector<17x32xf32>
    %503 = arith.mulf %502, %502 : vector<17x32xf32>
    %cst_200 = arith.constant dense<0.000000e+00> : vector<17xf32>
    %504 = vector.multi_reduction <add>, %503, %cst_200 [1] : vector<17x32xf32> to vector<17xf32>
    %505 = vector.shape_cast %504 : vector<17xf32> to vector<17x1xf32>
    %cst_201 = arith.constant 3.200000e+01 : f32
    %506 = vector.broadcast %cst_201 : f32 to vector<17x1xf32>
    %507 = arith.divf %505, %506 : vector<17x1xf32>
    %508 = vector.broadcast %500 : vector<17x1xf32> to vector<17x32xf32>
    %509 = arith.subf %328, %508 : vector<17x32xf32>
    %cst_202 = arith.constant 9.99999974E-6 : f32
    %510 = vector.broadcast %cst_202 : f32 to vector<17x1xf32>
    %511 = arith.addf %507, %510 : vector<17x1xf32>
    %512 = math.rsqrt %511 : vector<17x1xf32>
    %513 = vector.broadcast %512 : vector<17x1xf32> to vector<17x32xf32>
    %514 = arith.mulf %509, %513 : vector<17x32xf32>
    %515 = vector.broadcast %330 : vector<1x32xf32> to vector<17x32xf32>
    %516 = arith.mulf %514, %515 : vector<17x32xf32>
    %517 = vector.broadcast %332 : vector<1x32xf32> to vector<17x32xf32>
    %518 = arith.addf %516, %517 : vector<17x32xf32>
    %cst_203 = arith.constant dense<0.000000e+00> : vector<17x96xf32>
    %519 = tpu.matmul %518, %334, %cst_203 {dimension_numbers = #tpu.dot_dimension_numbers<[1], [0], [0], [1], [0, 0, 1, 1], [], []>} : vector<17x32xf32>, vector<32x96xf32>, vector<17x96xf32> -> vector<17x96xf32>
    %520 = vector.broadcast %336 : vector<1x96xf32> to vector<17x96xf32>
    %521 = arith.addf %519, %520 : vector<17x96xf32>
    %522 = vector.extract_strided_slice %521 {offsets = [0, 0], sizes = [17, 8], strides = [1, 1]} : vector<17x96xf32> to vector<17x8xf32>
    %cst_204 = arith.constant 0.353553385 : f32
    %523 = vector.broadcast %cst_204 : f32 to vector<17x8xf32>
    %524 = arith.mulf %522, %523 : vector<17x8xf32>
    %525 = vector.extract_strided_slice %521 {offsets = [0, 32], sizes = [17, 8], strides = [1, 1]} : vector<17x96xf32> to vector<17x8xf32>
    %526 = vector.extract_strided_slice %521 {offsets = [0, 64], sizes = [17, 8], strides = [1, 1]} : vector<17x96xf32> to vector<17x8xf32>
    %cst_205 = arith.constant dense<0.000000e+00> : vector<17x17xf32>
    %527 = tpu.matmul %524, %525, %cst_205 {dimension_numbers = #tpu.dot_dimension_numbers<[1], [1], [0], [0], [0, 0, 1, 0], [], []>} : vector<17x8xf32>, vector<17x8xf32>, vector<17x17xf32> -> vector<17x17xf32>
    %cst_206 = arith.constant dense<0xFF800000> : vector<17xf32>
    %528 = vector.multi_reduction <maximumf>, %527, %cst_206 [1] : vector<17x17xf32> to vector<17xf32>
    %529 = vector.shape_cast %528 : vector<17xf32> to vector<17x1xf32>
    %530 = vector.broadcast %529 : vector<17x1xf32> to vector<17x17xf32>
    %531 = arith.subf %527, %530 : vector<17x17xf32>
    %532 = math.exp %531 : vector<17x17xf32>
    %cst_207 = arith.constant dense<0.000000e+00> : vector<17xf32>
    %533 = vector.multi_reduction <add>, %532, %cst_207 [1] : vector<17x17xf32> to vector<17xf32>
    %534 = vector.shape_cast %533 : vector<17xf32> to vector<17x1xf32>
    %535 = tpu.reciprocal %534 {approx = true} : vector<17x1xf32> -> vector<17x1xf32>
    %536 = vector.broadcast %535 : vector<17x1xf32> to vector<17x17xf32>
    %537 = arith.mulf %532, %536 : vector<17x17xf32>
    %cst_208 = arith.constant dense<0.000000e+00> : vector<17x8xf32>
    %538 = tpu.matmul %537, %526, %cst_208 {dimension_numbers = #tpu.dot_dimension_numbers<[1], [0], [0], [1], [0, 0, 1, 1], [], []>} : vector<17x17xf32>, vector<17x8xf32>, vector<17x8xf32> -> vector<17x8xf32>
    %539 = vector.extract_strided_slice %338 {offsets = [0, 0], sizes = [8, 32], strides = [1, 1]} : vector<32x32xf32> to vector<8x32xf32>
    %cst_209 = arith.constant dense<0.000000e+00> : vector<17x32xf32>
    %540 = tpu.matmul %538, %539, %cst_209 {dimension_numbers = #tpu.dot_dimension_numbers<[1], [0], [0], [1], [0, 0, 1, 1], [], []>} : vector<17x8xf32>, vector<8x32xf32>, vector<17x32xf32> -> vector<17x32xf32>
    %541 = vector.broadcast %340 : vector<1x32xf32> to vector<17x32xf32>
    %542 = arith.addf %541, %540 : vector<17x32xf32>
    %543 = vector.extract_strided_slice %521 {offsets = [0, 8], sizes = [17, 8], strides = [1, 1]} : vector<17x96xf32> to vector<17x8xf32>
    %cst_210 = arith.constant 0.353553385 : f32
    %544 = vector.broadcast %cst_210 : f32 to vector<17x8xf32>
    %545 = arith.mulf %543, %544 : vector<17x8xf32>
    %546 = vector.extract_strided_slice %521 {offsets = [0, 40], sizes = [17, 8], strides = [1, 1]} : vector<17x96xf32> to vector<17x8xf32>
    %547 = vector.extract_strided_slice %521 {offsets = [0, 72], sizes = [17, 8], strides = [1, 1]} : vector<17x96xf32> to vector<17x8xf32>
    %cst_211 = arith.constant dense<0.000000e+00> : vector<17x17xf32>
    %548 = tpu.matmul %545, %546, %cst_211 {dimension_numbers = #tpu.dot_dimension_numbers<[1], [1], [0], [0], [0, 0, 1, 0], [], []>} : vector<17x8xf32>, vector<17x8xf32>, vector<17x17xf32> -> vector<17x17xf32>
    %cst_212 = arith.constant dense<0xFF800000> : vector<17xf32>
    %549 = vector.multi_reduction <maximumf>, %548, %cst_212 [1] : vector<17x17xf32> to vector<17xf32>
    %550 = vector.shape_cast %549 : vector<17xf32> to vector<17x1xf32>
    %551 = vector.broadcast %550 : vector<17x1xf32> to vector<17x17xf32>
    %552 = arith.subf %548, %551 : vector<17x17xf32>
    %553 = math.exp %552 : vector<17x17xf32>
    %cst_213 = arith.constant dense<0.000000e+00> : vector<17xf32>
    %554 = vector.multi_reduction <add>, %553, %cst_213 [1] : vector<17x17xf32> to vector<17xf32>
    %555 = vector.shape_cast %554 : vector<17xf32> to vector<17x1xf32>
    %556 = tpu.reciprocal %555 {approx = true} : vector<17x1xf32> -> vector<17x1xf32>
    %557 = vector.broadcast %556 : vector<17x1xf32> to vector<17x17xf32>
    %558 = arith.mulf %553, %557 : vector<17x17xf32>
    %cst_214 = arith.constant dense<0.000000e+00> : vector<17x8xf32>
    %559 = tpu.matmul %558, %547, %cst_214 {dimension_numbers = #tpu.dot_dimension_numbers<[1], [0], [0], [1], [0, 0, 1, 1], [], []>} : vector<17x17xf32>, vector<17x8xf32>, vector<17x8xf32> -> vector<17x8xf32>
    %560 = vector.extract_strided_slice %338 {offsets = [8, 0], sizes = [8, 32], strides = [1, 1]} : vector<32x32xf32> to vector<8x32xf32>
    %cst_215 = arith.constant dense<0.000000e+00> : vector<17x32xf32>
    %561 = tpu.matmul %559, %560, %cst_215 {dimension_numbers = #tpu.dot_dimension_numbers<[1], [0], [0], [1], [0, 0, 1, 1], [], []>} : vector<17x8xf32>, vector<8x32xf32>, vector<17x32xf32> -> vector<17x32xf32>
    %562 = arith.addf %542, %561 : vector<17x32xf32>
    %563 = vector.extract_strided_slice %521 {offsets = [0, 16], sizes = [17, 8], strides = [1, 1]} : vector<17x96xf32> to vector<17x8xf32>
    %cst_216 = arith.constant 0.353553385 : f32
    %564 = vector.broadcast %cst_216 : f32 to vector<17x8xf32>
    %565 = arith.mulf %563, %564 : vector<17x8xf32>
    %566 = vector.extract_strided_slice %521 {offsets = [0, 48], sizes = [17, 8], strides = [1, 1]} : vector<17x96xf32> to vector<17x8xf32>
    %567 = vector.extract_strided_slice %521 {offsets = [0, 80], sizes = [17, 8], strides = [1, 1]} : vector<17x96xf32> to vector<17x8xf32>
    %cst_217 = arith.constant dense<0.000000e+00> : vector<17x17xf32>
    %568 = tpu.matmul %565, %566, %cst_217 {dimension_numbers = #tpu.dot_dimension_numbers<[1], [1], [0], [0], [0, 0, 1, 0], [], []>} : vector<17x8xf32>, vector<17x8xf32>, vector<17x17xf32> -> vector<17x17xf32>
    %cst_218 = arith.constant dense<0xFF800000> : vector<17xf32>
    %569 = vector.multi_reduction <maximumf>, %568, %cst_218 [1] : vector<17x17xf32> to vector<17xf32>
    %570 = vector.shape_cast %569 : vector<17xf32> to vector<17x1xf32>
    %571 = vector.broadcast %570 : vector<17x1xf32> to vector<17x17xf32>
    %572 = arith.subf %568, %571 : vector<17x17xf32>
    %573 = math.exp %572 : vector<17x17xf32>
    %cst_219 = arith.constant dense<0.000000e+00> : vector<17xf32>
    %574 = vector.multi_reduction <add>, %573, %cst_219 [1] : vector<17x17xf32> to vector<17xf32>
    %575 = vector.shape_cast %574 : vector<17xf32> to vector<17x1xf32>
    %576 = tpu.reciprocal %575 {approx = true} : vector<17x1xf32> -> vector<17x1xf32>
    %577 = vector.broadcast %576 : vector<17x1xf32> to vector<17x17xf32>
    %578 = arith.mulf %573, %577 : vector<17x17xf32>
    %cst_220 = arith.constant dense<0.000000e+00> : vector<17x8xf32>
    %579 = tpu.matmul %578, %567, %cst_220 {dimension_numbers = #tpu.dot_dimension_numbers<[1], [0], [0], [1], [0, 0, 1, 1], [], []>} : vector<17x17xf32>, vector<17x8xf32>, vector<17x8xf32> -> vector<17x8xf32>
    %580 = vector.extract_strided_slice %338 {offsets = [16, 0], sizes = [8, 32], strides = [1, 1]} : vector<32x32xf32> to vector<8x32xf32>
    %cst_221 = arith.constant dense<0.000000e+00> : vector<17x32xf32>
    %581 = tpu.matmul %579, %580, %cst_221 {dimension_numbers = #tpu.dot_dimension_numbers<[1], [0], [0], [1], [0, 0, 1, 1], [], []>} : vector<17x8xf32>, vector<8x32xf32>, vector<17x32xf32> -> vector<17x32xf32>
    %582 = arith.addf %562, %581 : vector<17x32xf32>
    %583 = vector.extract_strided_slice %521 {offsets = [0, 24], sizes = [17, 8], strides = [1, 1]} : vector<17x96xf32> to vector<17x8xf32>
    %cst_222 = arith.constant 0.353553385 : f32
    %584 = vector.broadcast %cst_222 : f32 to vector<17x8xf32>
    %585 = arith.mulf %583, %584 : vector<17x8xf32>
    %586 = vector.extract_strided_slice %521 {offsets = [0, 56], sizes = [17, 8], strides = [1, 1]} : vector<17x96xf32> to vector<17x8xf32>
    %587 = vector.extract_strided_slice %521 {offsets = [0, 88], sizes = [17, 8], strides = [1, 1]} : vector<17x96xf32> to vector<17x8xf32>
    %cst_223 = arith.constant dense<0.000000e+00> : vector<17x17xf32>
    %588 = tpu.matmul %585, %586, %cst_223 {dimension_numbers = #tpu.dot_dimension_numbers<[1], [1], [0], [0], [0, 0, 1, 0], [], []>} : vector<17x8xf32>, vector<17x8xf32>, vector<17x17xf32> -> vector<17x17xf32>
    %cst_224 = arith.constant dense<0xFF800000> : vector<17xf32>
    %589 = vector.multi_reduction <maximumf>, %588, %cst_224 [1] : vector<17x17xf32> to vector<17xf32>
    %590 = vector.shape_cast %589 : vector<17xf32> to vector<17x1xf32>
    %591 = vector.broadcast %590 : vector<17x1xf32> to vector<17x17xf32>
    %592 = arith.subf %588, %591 : vector<17x17xf32>
    %593 = math.exp %592 : vector<17x17xf32>
    %cst_225 = arith.constant dense<0.000000e+00> : vector<17xf32>
    %594 = vector.multi_reduction <add>, %593, %cst_225 [1] : vector<17x17xf32> to vector<17xf32>
    %595 = vector.shape_cast %594 : vector<17xf32> to vector<17x1xf32>
    %596 = tpu.reciprocal %595 {approx = true} : vector<17x1xf32> -> vector<17x1xf32>
    %597 = vector.broadcast %596 : vector<17x1xf32> to vector<17x17xf32>
    %598 = arith.mulf %593, %597 : vector<17x17xf32>
    %cst_226 = arith.constant dense<0.000000e+00> : vector<17x8xf32>
    %599 = tpu.matmul %598, %587, %cst_226 {dimension_numbers = #tpu.dot_dimension_numbers<[1], [0], [0], [1], [0, 0, 1, 1], [], []>} : vector<17x17xf32>, vector<17x8xf32>, vector<17x8xf32> -> vector<17x8xf32>
    %600 = vector.extract_strided_slice %338 {offsets = [24, 0], sizes = [8, 32], strides = [1, 1]} : vector<32x32xf32> to vector<8x32xf32>
    %cst_227 = arith.constant dense<0.000000e+00> : vector<17x32xf32>
    %601 = tpu.matmul %599, %600, %cst_227 {dimension_numbers = #tpu.dot_dimension_numbers<[1], [0], [0], [1], [0, 0, 1, 1], [], []>} : vector<17x8xf32>, vector<8x32xf32>, vector<17x32xf32> -> vector<17x32xf32>
    %602 = arith.addf %582, %601 : vector<17x32xf32>
    %603 = arith.addf %328, %602 : vector<17x32xf32>
    %cst_228 = arith.constant dense<0.000000e+00> : vector<17xf32>
    %604 = vector.multi_reduction <add>, %603, %cst_228 [1] : vector<17x32xf32> to vector<17xf32>
    %605 = vector.shape_cast %604 : vector<17xf32> to vector<17x1xf32>
    %cst_229 = arith.constant 3.200000e+01 : f32
    %606 = vector.broadcast %cst_229 : f32 to vector<17x1xf32>
    %607 = arith.divf %605, %606 : vector<17x1xf32>
    %608 = vector.broadcast %607 : vector<17x1xf32> to vector<17x32xf32>
    %609 = arith.subf %603, %608 : vector<17x32xf32>
    %610 = arith.mulf %609, %609 : vector<17x32xf32>
    %cst_230 = arith.constant dense<0.000000e+00> : vector<17xf32>
    %611 = vector.multi_reduction <add>, %610, %cst_230 [1] : vector<17x32xf32> to vector<17xf32>
    %612 = vector.shape_cast %611 : vector<17xf32> to vector<17x1xf32>
    %cst_231 = arith.constant 3.200000e+01 : f32
    %613 = vector.broadcast %cst_231 : f32 to vector<17x1xf32>
    %614 = arith.divf %612, %613 : vector<17x1xf32>
    %615 = vector.broadcast %607 : vector<17x1xf32> to vector<17x32xf32>
    %616 = arith.subf %603, %615 : vector<17x32xf32>
    %cst_232 = arith.constant 9.99999974E-6 : f32
    %617 = vector.broadcast %cst_232 : f32 to vector<17x1xf32>
    %618 = arith.addf %614, %617 : vector<17x1xf32>
    %619 = math.rsqrt %618 : vector<17x1xf32>
    %620 = vector.broadcast %619 : vector<17x1xf32> to vector<17x32xf32>
    %621 = arith.mulf %616, %620 : vector<17x32xf32>
    %622 = vector.broadcast %342 : vector<1x32xf32> to vector<17x32xf32>
    %623 = arith.mulf %621, %622 : vector<17x32xf32>
    %624 = vector.broadcast %344 : vector<1x32xf32> to vector<17x32xf32>
    %625 = arith.addf %623, %624 : vector<17x32xf32>
    %cst_233 = arith.constant dense<0.000000e+00> : vector<17x64xf32>
    %626 = tpu.matmul %625, %346, %cst_233 {dimension_numbers = #tpu.dot_dimension_numbers<[1], [0], [0], [1], [0, 0, 1, 1], [], []>} : vector<17x32xf32>, vector<32x64xf32>, vector<17x64xf32> -> vector<17x64xf32>
    %627 = vector.broadcast %348 : vector<1x64xf32> to vector<17x64xf32>
    %628 = arith.addf %626, %627 : vector<17x64xf32>
    %cst_234 = arith.constant 5.000000e-01 : f32
    %629 = vector.broadcast %cst_234 : f32 to vector<17x64xf32>
    %630 = arith.mulf %629, %628 : vector<17x64xf32>
    %cst_235 = arith.constant 1.41421354 : f32
    %631 = vector.broadcast %cst_235 : f32 to vector<17x64xf32>
    %632 = arith.divf %628, %631 : vector<17x64xf32>
    %633 = math.erf %632 : vector<17x64xf32>
    %cst_236 = arith.constant 1.000000e+00 : f32
    %634 = vector.broadcast %cst_236 : f32 to vector<17x64xf32>
    %635 = arith.addf %634, %633 : vector<17x64xf32>
    %636 = arith.mulf %630, %635 : vector<17x64xf32>
    %cst_237 = arith.constant dense<0.000000e+00> : vector<17x32xf32>
    %637 = tpu.matmul %636, %350, %cst_237 {dimension_numbers = #tpu.dot_dimension_numbers<[1], [0], [0], [1], [0, 0, 1, 1], [], []>} : vector<17x64xf32>, vector<64x32xf32>, vector<17x32xf32> -> vector<17x32xf32>
    %638 = vector.broadcast %352 : vector<1x32xf32> to vector<17x32xf32>
    %639 = arith.addf %637, %638 : vector<17x32xf32>
    %640 = arith.addf %603, %639 : vector<17x32xf32>
    %641 = vector.extract_strided_slice %496 {offsets = [0, 0], sizes = [1, 32], strides = [1, 1]} : vector<17x32xf32> to vector<1x32xf32>
    %642 = vector.extract_strided_slice %640 {offsets = [0, 0], sizes = [1, 32], strides = [1, 1]} : vector<17x32xf32> to vector<1x32xf32>
    %643 = tpu.concatenate %641, %642 in 0 : vector<1x32xf32>, vector<1x32xf32> -> vector<2x32xf32>
    %c0_238 = arith.constant 0 : index
    %c0_239 = arith.constant 0 : index
    %644 = vector.load %arg16[%c0_238, %c0_239] : memref<1x32xf32, #tpu.memory_space<vmem>>, vector<1x32xf32>
    %c0_240 = arith.constant 0 : index
    %c0_241 = arith.constant 0 : index
    %645 = vector.load %arg17[%c0_240, %c0_241] : memref<1x32xf32, #tpu.memory_space<vmem>>, vector<1x32xf32>
    %cst_242 = arith.constant dense<0.000000e+00> : vector<2xf32>
    %646 = vector.multi_reduction <add>, %643, %cst_242 [1] : vector<2x32xf32> to vector<2xf32>
    %647 = vector.shape_cast %646 : vector<2xf32> to vector<2x1xf32>
    %cst_243 = arith.constant 3.200000e+01 : f32
    %648 = vector.broadcast %cst_243 : f32 to vector<2x1xf32>
    %649 = arith.divf %647, %648 : vector<2x1xf32>
    %650 = vector.broadcast %649 : vector<2x1xf32> to vector<2x32xf32>
    %651 = arith.subf %643, %650 : vector<2x32xf32>
    %652 = arith.mulf %651, %651 : vector<2x32xf32>
    %cst_244 = arith.constant dense<0.000000e+00> : vector<2xf32>
    %653 = vector.multi_reduction <add>, %652, %cst_244 [1] : vector<2x32xf32> to vector<2xf32>
    %654 = vector.shape_cast %653 : vector<2xf32> to vector<2x1xf32>
    %cst_245 = arith.constant 3.200000e+01 : f32
    %655 = vector.broadcast %cst_245 : f32 to vector<2x1xf32>
    %656 = arith.divf %654, %655 : vector<2x1xf32>
    %657 = vector.broadcast %649 : vector<2x1xf32> to vector<2x32xf32>
    %658 = arith.subf %643, %657 : vector<2x32xf32>
    %cst_246 = arith.constant 9.99999974E-6 : f32
    %659 = vector.broadcast %cst_246 : f32 to vector<2x1xf32>
    %660 = arith.addf %656, %659 : vector<2x1xf32>
    %661 = math.rsqrt %660 : vector<2x1xf32>
    %662 = vector.broadcast %661 : vector<2x1xf32> to vector<2x32xf32>
    %663 = arith.mulf %658, %662 : vector<2x32xf32>
    %664 = vector.broadcast %644 : vector<1x32xf32> to vector<2x32xf32>
    %665 = arith.mulf %663, %664 : vector<2x32xf32>
    %666 = vector.broadcast %645 : vector<1x32xf32> to vector<2x32xf32>
    %667 = arith.addf %665, %666 : vector<2x32xf32>
    %c0_247 = arith.constant 0 : index
    %c0_248 = arith.constant 0 : index
    %668 = vector.load %arg18[%c0_247, %c0_248] : memref<32x10xf32, #tpu.memory_space<vmem>>, vector<32x10xf32>
    %cst_249 = arith.constant dense<0.000000e+00> : vector<2x10xf32>
    %669 = tpu.matmul %667, %668, %cst_249 {dimension_numbers = #tpu.dot_dimension_numbers<[1], [0], [0], [1], [0, 0, 1, 1], [], []>} : vector<2x32xf32>, vector<32x10xf32>, vector<2x10xf32> -> vector<2x10xf32>
    %c0_250 = arith.constant 0 : index
    %c0_251 = arith.constant 0 : index
    %670 = vector.load %arg19[%c0_250, %c0_251] : memref<1x10xf32, #tpu.memory_space<vmem>>, vector<1x10xf32>
    %671 = vector.broadcast %670 : vector<1x10xf32> to vector<2x10xf32>
    %672 = arith.addf %669, %671 : vector<2x10xf32>
    %c0_252 = arith.constant 0 : index
    %c0_253 = arith.constant 0 : index
    %673 = vector.load %arg20[%c0_252, %c0_253] : memref<2x10xf32, #tpu.memory_space<vmem>>, vector<2x10xf32>
    tpu.vector_store %arg20[%c0_252, %c0_253], %672 {strides = array<i32>} : memref<2x10xf32, #tpu.memory_space<vmem>>, vector<2x10xf32>,
    return
  }
}

</mosaic_0001>

<bundles_post_ra>
// kernel: vit_forward.1
= control target key start
LH: loop header
LB: loop body
LE: loop exit
PB: predicated region body
PF: predicated region fallthrough
CT: control target
= control target key end

     0   :  { %s11388_s0 = inlined_call_operand.vmem [shape: f32[32,64], index: 0, kind: input, shape index: {}]   ;;  %s11389_s1 = inlined_call_operand.vmem [shape: f32[64,32], index: 1, kind: input, shape index: {}]   ;;  %s11390_s2 = inlined_call_operand.vmem [shape: f32[1,32], index: 2, kind: input, shape index: {}]   ;;  %s11391_s3 = inlined_call_operand.vmem [shape: f32[17,32], index: 3, kind: input, shape index: {}]   ;;  %s11392_s4 = inlined_call_operand.vmem [shape: f32[2,1,32], index: 4, kind: input, shape index: {}]   ;;  %s11393_s5 = inlined_call_operand.vmem [shape: f32[2,1,32], index: 5, kind: input, shape index: {}]   ;;  %s11394_s6 = inlined_call_operand.vmem [shape: f32[2,32,96], index: 6, kind: input, shape index: {}]   ;;  %s11395_s7 = inlined_call_operand.vmem [shape: f32[2,1,96], index: 7, kind: input, shape index: {}]   ;;  %s11396_s8 = inlined_call_operand.vmem [shape: f32[2,32,32], index: 8, kind: input, shape index: {}]   ;;  %s11397_s9 = inlined_call_operand.vmem [shape: f32[2,1,32], index: 9, kind: input, shape index: {}]   ;;  %s11398_s10 = inlined_call_operand.vmem [shape: f32[2,1,32], index: 10, kind: input, shape index: {}]   ;;  %s11399_s11 = inlined_call_operand.vmem [shape: f32[2,1,32], index: 11, kind: input, shape index: {}]   ;;  %s11400_s12 = inlined_call_operand.vmem [shape: f32[2,32,64], index: 12, kind: input, shape index: {}]   ;;  %s11401_s13 = inlined_call_operand.vmem [shape: f32[2,1,64], index: 13, kind: input, shape index: {}]   ;;  %s11402_s14 = inlined_call_operand.vmem [shape: f32[2,64,32], index: 14, kind: input, shape index: {}]   ;;  %s11403_s15 = inlined_call_operand.vmem [shape: f32[2,1,32], index: 15, kind: input, shape index: {}]   ;;  %s11404_s16 = inlined_call_operand.vmem [shape: f32[1,32], index: 16, kind: input, shape index: {}]   ;;  %s11405_s17 = inlined_call_operand.vmem [shape: f32[1,32], index: 17, kind: input, shape index: {}]   ;;  %s11406_s18 = inlined_call_operand.vmem [shape: f32[32,10], index: 18, kind: input, shape index: {}]   ;;  %s11407_s19 = inlined_call_operand.vmem [shape: f32[1,10], index: 19, kind: input, shape index: {}]   ;;  %s11408_s20 = inlined_call_operand.hbm [shape: f32[2,10], index: 20, kind: output, shape index: {}]  }
   0x1   :  { %11436 = sst [smem:[#allocation5_spill]] %s11388_s0 }
   0x2   :  { %11437 = sst [smem:[#allocation6_spill]] %s11389_s1 }
   0x3   :  { %11438 = sst [smem:[#allocation7_spill]] %s11390_s2 }
   0x4   :  { %11439 = sst [smem:[#allocation8_spill]] %s11391_s3 }
   0x5   :  { %11440 = sst [smem:[#allocation9_spill]] %s11392_s4 }
   0x6   :  { %11441 = sst [smem:[#allocation10_spill]] %s11407_s19 }
   0x7   :  { %11442 = sst [smem:[#allocation11_spill]] %s11408_s20 }
   0x8   :  { %s11443_s23 = sld [smem:[#allocation6_spill]]  ;;  %vm85_vm0 = vcmask 523264  }
   0x9   :  { %s11444_s28 = sld [smem:[#allocation5_spill]] }
   0xe   :  { %v77_v0 = vld [vmem:[%s11443_s23 + $0x38] sm:$0xff]  ;;  %v76_v1 = vld [vmem:[%s11443_s23 + $0x30] sm:$0xff]  ;;  %v75_v2 = vld [vmem:[%s11443_s23 + $0x28] sm:$0xff] }
   0xf   :  { %7959 = vmatprep.subr.mxu0 %v77_v0  ;;  %v66_v3 = vld [vmem:[%s11444_s28] sm:$0xff] }
  0x10   :  { %7960 = vmatpush3.msra.mxu0 %v77_v0  ;;  %7975 = vmatprep.mubr.msk.f32.mxu0 %vm85_vm0, %v66_v3 }
  0x11   :  { %7961 = vmatprep.subr.mxu0 %v76_v1 }
  0x12   :  { %25 = vsyncpa [#allocation3], 0  ;;  %7962 = vmatpush3.msra.mxu0 %v76_v1  ;;  %v74_v4 = vld [vmem:[%s11443_s23 + $0x20] sm:$0xff]  ;;  %v73_v5 = vld [vmem:[%s11443_s23 + $0x18] sm:$0xff]  ;;  %s11445_s29 = sld [smem:[#allocation8_spill]]  ;;  %vm189_vm1 = vcmask 1046528  }
  0x13   :  { %7963 = vmatprep.subr.mxu0 %v75_v2  ;;  %v72_v6 = vld [vmem:[%s11443_s23 + $0x10] sm:$0xff]  ;;  %v71_v7 = vld [vmem:[%s11443_s23 + $0x8] sm:$0xff]  ;;  %v70_v8 = vld [vmem:[%s11443_s23] sm:$0xff]  ;;  %s11446_s24 = sld [smem:[#allocation7_spill]]  ;;  %vm255_vm2 = vcmask 253952   ;;  %vm201_vm3 = vcmask 1040384  }
  0x14   :  { %7964 = vmatpush3.msra.mxu0 %v75_v2  ;;  %v67_v9 = vld [vmem:[%s11444_s28 + $0x8] sm:$0xff]  ;;  %vm248_vm4 = vcmask 261120   ;;  %v225_v47 = vld [vmem:[%s11394_s6 + $0x18] sm:$0xff]  ;;  %v9227_v48 = vmov 0.0   ;;  %v224_v49 = vld [vmem:[%s11394_s6 + $0x10] sm:$0xff]  ;;  %vm9228_vm5 = vmmov 0  }
  0x15   :  { %7965 = vmatprep.subr.mxu0 %v74_v4  ;;  %7981 = vmatprep.subr.mxu1 %v9227_v48  ;;  %v223_v50 = vld [vmem:[%s11394_s6 + $0x8] sm:$0xff]  ;;  %v222_v51 = vld [vmem:[%s11394_s6] sm:$0xff]  ;;  %s11447_s1 = sld [smem:[#allocation9_spill]]  ;;  %s11434_s26 = smov 96   ;;  %vm415_vm6 = vcmask 64512   ;;  %vm511_vm7 = vcmask 138240  }
  0x16   :  { %7966 = vmatpush3.msra.mxu0 %v74_v4  ;;  %7989 = vmatprep.mubr.msk.f32.mxu1 %vm9228_vm5, %v9227_v48  ;;  %v7295_v0 = vld [vmem:[%s11393_s5] ss:$0 sm:$0xff]  ;;  %vm518_vm8 = vcmask 131072   ;;  %s11432_s27 = smov 64   ;;  %s11430_s4 = smov 88   ;;  %vm7161_vm9 = vcmask 254976  }
  0x17   :  { %7967 = vmatprep.subr.mxu0 %v73_v5  ;;  %7982 = vmatpush3.msra.mxu1 %v225_v47  ;;  %s11428_s21 = smov 120   ;;  %s11426_s25 = smov 56   ;;  %vm7273_vm10 = vcmask 74752  }
  0x18   :  { %7968 = vmatpush3.msra.mxu0 %v73_v5  ;;  %v184_v10 = vld [vmem:[%s11445_s29 + $0x8] sm:$0xff]  ;;  %v185_v11 = vld [vmem:[%s11445_s29 + $0x10] sm:$0x1]  ;;  %v183_v12 = vld [vmem:[%s11445_s29] sm:$0xff]  ;;  %7983 = vmatprep.subr.mxu1 %v9227_v48  ;;  %s11424_s3 = smov 80   ;;  %s11422_s30 = smov 112  }
  0x19   :  { %7969 = vmatprep.subr.mxu0 %v72_v6  ;;  %v191_v13 = vrot.slane %v184_v10, 1  ;;  %v193_v14 = vrot.slane %v185_v11, 1  ;;  %v7289_v15 = vld [vmem:[%s11446_s24] ss:$0 sm:$0xff]  ;;  %v190_v16 = vrot.slane %v183_v12, 1  ;;  %7984 = vmatpush3.msra.mxu1 %v224_v49  ;;  %s11420_s22 = smov 48  }
  0x1a   :  { %7970 = vmatpush3.msra.mxu0 %v72_v6  ;;  %7985 = vmatprep.subr.mxu1 %v9227_v48  ;;  %s11414_s23 = smov 104   ;;  %s11416_s2 = smov 40  }
  0x1b   :  { %7971 = vmatprep.subr.mxu0 %v71_v7  ;;  %v9390_v18 = vsel %vm189_vm1, %v191_v13, %v193_v14  ;;  %v9392_v21 = vsel %vm189_vm1, %v190_v16, %v191_v13  ;;  %7986 = vmatpush3.msra.mxu1 %v223_v50  ;;  %v7294_v62 = vld [vmem:[%s11447_s1] ss:$0 sm:$0xff]  ;;  %s11454_s0 = smov 56   ;;  %s11457_s20 = smov 96  }
  0x1c   :  { %7972 = vmatpush3.msra.mxu0 %v71_v7  ;;  %7987 = vmatprep.subr.mxu1 %v9227_v48  ;;  %v7296_v13 = vld [vmem:[%s11395_s7] ss:$0 sm:$0xff] }
  0x1d   :  { %7973 = vmatprep.subr.mxu0 %v70_v8  ;;  %7988 = vmatpush3.msra.mxu1 %v222_v51 }
  0x1e   :  { %7974 = vmatpush3.msra.mxu0 %v70_v8  ;;  %7998 = vmatprep.subr.mxu1 %v9227_v48 }
  0x1f   :  { %7976 = vmatmul.mubr.msk.f32.vlgmr.msra.gmra.mxu0 %vm85_vm0, %v67_v9  ;;  %8013 = vmatprep.subr.mxu0 %v9227_v48 }
  0xdf   :  { %v7977_v17 = vpop.f32.mrf.mxu0 }
  0xe0   :  { %v170_v19 = vadd.f32 %v7977_v17, %v7289_v15 }
  0xe1   :  { %v164_v20 = vpop.f32.mrf.mxu0 }
  0xe2   :  { %v198_v22 = vadd.f32 %v9390_v18, %v170_v19  ;;  %v165_v23 = vadd.f32 %v7289_v15, %v164_v20 }
  0xe4   :  { %v9395_v24 = vrot.slane %v198_v22, 7  ;;  %v197_v25 = vadd.f32 %v9392_v21, %v165_v23 }
  0xe6   :  { %v202_v26 = vrot.slane %v197_v25, 7  ;;  %v256_v27 = vsel %vm255_vm2, %v9395_v24, 0.0 }
  0xe7   :  { %257 = vadd.xlane.f32.xlu1 %v256_v27 }
  0xe8   :  { %v9401_v28 = vsel %vm201_vm3, %v183_v12, %v202_v26  ;;  %v9407_v30 = vsel %vm201_vm3, %v202_v26, %v9395_v24 }
  0xe9   :  { %v249_v29 = vsel %vm248_vm4, %v9401_v28, 0.0  ;;  %v252_v31 = vsel %vm248_vm4, %v9407_v30, 0.0 }
  0xea   :  { %250 = vadd.xlane.f32.xlu0 %v249_v29 }
  0xee   :  { %253 = vadd.xlane.f32.xlu0 %v252_v31 }
 0x170   :  { %v258_v32 = vpop.xlane.xlu1 %257 }
 0x171   :  { %v262_v33 = vmul.f32 0.03125, %v258_v32 }
 0x173   :  { %v251_v34 = vpop.xlane.xlu0 %250  ;;  %v265_v36 = vsub.f32 %v9395_v24, %v262_v33 }
 0x174   :  { %v260_v35 = vmul.f32 0.03125, %v251_v34 }
 0x175   :  { %v268_v43 = vmul.f32 %v265_v36, %v265_v36 }
 0x176   :  { %v263_v37 = vsub.f32 %v9401_v28, %v260_v35 }
 0x177   :  { %v254_v38 = vpop.xlane.xlu0 %253  ;;  %v275_v45 = vsel %vm255_vm2, %v268_v43, 0.0 }
 0x178   :  { %v261_v39 = vmul.f32 0.03125, %v254_v38  ;;  %v266_v40 = vmul.f32 %v263_v37, %v263_v37 }
 0x17a   :  { %v264_v41 = vsub.f32 %v9407_v30, %v261_v39  ;;  %v269_v42 = vsel %vm248_vm4, %v266_v40, 0.0 }
 0x17b   :  { %270 = vadd.xlane.f32.xlu1 %v269_v42 }
 0x17c   :  { %v267_v44 = vmul.f32 %v264_v41, %v264_v41 }
 0x17e   :  { %v272_v46 = vsel %vm248_vm4, %v267_v44, 0.0 }
 0x17f   :  { %276 = vadd.xlane.f32.xlu1 %v275_v45  ;;  %273 = vadd.xlane.f32.xlu0 %v272_v46 }
 0x204   :  { %v271_v52 = vpop.xlane.xlu1 %270 }
 0x205   :  { %v278_v53 = vmul.f32 0.03125, %v271_v52 }
 0x207   :  { %v281_v54 = vadd.f32 1e-05, %v278_v53  ;;  %v68_v53 = vld [vmem:[%s11444_s28 + $0x10] sm:$0xff] }
 0x208   :  { %v277_v55 = vpop.xlane.xlu1 %276  ;;  %v274_v56 = vpop.xlane.xlu0 %273  ;;  %7978 = vmatprep.mubr.msk.f32.mxu0 %vm85_vm0, %v68_v53 }
 0x209   :  { %8898 = vrsqrt.f32 %v281_v54  ;;  %v280_v57 = vmul.f32 0.03125, %v277_v55  ;;  %v279_v58 = vmul.f32 0.03125, %v274_v56  ;;  %v69_v54 = vld [vmem:[%s11444_s28 + $0x18] sm:$0xff]  ;;  %s11418_s28 = smov 72  }
 0x20a   :  { %7979 = vmatmul.mubr.msk.f32.gmra.mxu0 %vm85_vm0, %v69_v54 }
 0x20b   :  { %v283_v59 = vadd.f32 1e-05, %v280_v57  ;;  %v282_v60 = vadd.f32 1e-05, %v279_v58  ;;  %8019 = vmatprep.mubr.msk.f32.mxu0 %vm9228_vm5, %v9227_v48 }
 0x20d   :  { %8900 = vrsqrt.f32 %v283_v59 }
 0x20e   :  { %8902 = vrsqrt.f32 %v282_v60 }
 0x216   :  { %v8899_v61 = vpop.eup %8898 }
 0x217   :  { %v287_v63 = vmul.f32 %v8899_v61, %v263_v37 }
 0x219   :  { %v296_v1 = vmul.f32 %v7294_v62, %v287_v63 }
 0x21a   :  { %v8901_v2 = vpop.eup %8900 }
 0x21b   :  { %v8903_v3 = vpop.eup %8902  ;;  %v305_v4 = vadd.f32 %v7295_v0, %v296_v1  ;;  %v289_v6 = vmul.f32 %v8901_v2, %v265_v36 }
 0x21c   :  { %v288_v5 = vmul.f32 %v8903_v3, %v264_v41 }
 0x21d   :  { %7990 = vmatmul.mubr.msk.f32.vlgmr.msra.gmra.mxu1 %vm248_vm4, %v305_v4  ;;  %v298_v9 = vmul.f32 %v7294_v62, %v289_v6 }
 0x21e   :  { %7992 = vmatprep.mubr.msk.f32.mxu1 %vm9228_vm5, %v9227_v48  ;;  %v297_v7 = vmul.f32 %v7294_v62, %v288_v5 }
 0x21f   :  { %v307_v10 = vadd.f32 %v7295_v0, %v298_v9 }
 0x220   :  { %v306_v8 = vadd.f32 %v7295_v0, %v297_v7 }
 0x222   :  { %7993 = vmatmul.mubr.msk.f32.gmra.mxu1 %vm248_vm4, %v306_v8 }
 0x223   :  { %7995 = vmatprep.mubr.msk.f32.mxu1 %vm9228_vm5, %v9227_v48 }
 0x226   :  { %7996 = vmatmul.mubr.msk.f32.gmra.mxu1 %vm248_vm4, %v307_v10 }
 0x227   :  { %8004 = vmatprep.mubr.msk.f32.mxu1 %vm9228_vm5, %v9227_v48 }
 0x2dd   :  { %v389_v11 = vpop.f32.mrf.mxu1 }
 0x2de   :  { %v9459_v19 = vadd.f32 %v7296_v13, %v389_v11 }
 0x2df   :  { %v7991_v12 = vpop.f32.mrf.mxu1 }
 0x2e0   :  { %v9473_v27 = vmul.f32 0.35355338, %v9459_v19 }
 0x2e2   :  { %v394_v14 = vpop.f32.mrf.mxu1 }
 0x2e3   :  { %v9455_v15 = vadd.f32 %v7296_v13, %v394_v14  ;;  %v9560_v14 = vpop.f32.mrf.mxu0 }
 0x2e4   :  { %v7994_v16 = vpop.f32.mrf.mxu1 }
 0x2e5   :  { %411 = vrot.lane.b32.xlu1 %v9455_v15, %s11434_s26  ;;  %v9481_v29 = vmul.f32 0.35355338, %v9455_v15  ;;  %v9562_v16 = vpop.f32.mrf.mxu0 }
 0x2e6   :  { %v399_v17 = vpop.f32.mrf.mxu1 }
 0x2e7   :  { %v9461_v20 = vadd.f32 %v7296_v13, %v399_v17  ;;  %v227_v13 = vld [vmem:[%s11396_s8] sm:$0xff] }
 0x2e8   :  { %v7997_v22 = vpop.f32.mrf.mxu1 }
 0x2e9   :  { %409 = vrot.lane.b32.xlu1 %v9459_v19, %s11434_s26  ;;  %413 = vrot.lane.b32.xlu0 %v9461_v20, %s11434_s26  ;;  %v9488_v31 = vmul.f32 0.35355338, %v9461_v20 }
 0x357   :  { %v412_v25 = vpop.permute.xlu1 %411 }
 0x35b   :  { %v414_v23 = vpop.permute.xlu0 %413  ;;  %v410_v26 = vpop.permute.xlu1 %409 }
 0x35c   :  { %7999 = vmatpush3.xpose.msk.msra.mxu1 %vm415_vm6, %v414_v23 }
 0x35d   :  { %8000 = vmatprep.subr.mxu1 %v9227_v48 }
 0x360   :  { %8001 = vmatpush3.xpose.msk.msra.mxu1 %vm415_vm6, %v412_v25 }
 0x361   :  { %8002 = vmatprep.subr.mxu1 %v9227_v48 }
 0x364   :  { %8003 = vmatpush3.xpose.msk.msra.mxu1 %vm415_vm6, %v410_v26 }
 0x365   :  { %8028 = vmatprep.subr.mxu1 %v9227_v48 }
 0x367   :  { %8005 = vmatmul.mubr.msk.f32.vlgmr.msra.gmra.mxu1 %vm415_vm6, %v9473_v27 }
 0x368   :  { %8007 = vmatprep.mubr.msk.f32.mxu1 %vm9228_vm5, %v9227_v48  ;;  %8029 = vmatpush3.msra.mxu1 %v227_v13 }
 0x369   :  { %8054 = vmatprep.subr.mxu1 %v9227_v48 }
 0x36b   :  { %8008 = vmatmul.mubr.msk.f32.gmra.mxu1 %vm415_vm6, %v9481_v29 }
 0x36c   :  { %8010 = vmatprep.mubr.msk.f32.mxu1 %vm9228_vm5, %v9227_v48 }
 0x36f   :  { %8011 = vmatmul.mubr.msk.f32.gmra.mxu1 %vm415_vm6, %v9488_v31 }
 0x370   :  { %8030 = vmatprep.mubr.msk.f32.mxu1 %vm9228_vm5, %v9227_v48 }
 0x427   :  { %v497_v32 = vpop.f32.mrf.mxu1 }
 0x428   :  { %v512_v33 = vsel %vm511_vm7, %v497_v32, -inf }
 0x429   :  { %513 = vmax.xlane.f32.xlu1 %v512_v33  ;;  %v8006_v34 = vpop.f32.mrf.mxu1 }
 0x42b   :  { %v502_v35 = vpop.f32.mrf.mxu1 }
 0x42c   :  { %v515_v36 = vsel %vm511_vm7, %v502_v35, -inf }
 0x42d   :  { %516 = vmax.xlane.f32.xlu0 %v515_v36  ;;  %v8009_v37 = vpop.f32.mrf.mxu1 }
 0x42f   :  { %v507_v38 = vpop.f32.mrf.mxu1 }
 0x430   :  { %v519_v39 = vsel %vm518_vm8, %v507_v38, -inf }
 0x431   :  { %520 = vmax.xlane.f32.xlu0 %v519_v39  ;;  %v8012_v40 = vpop.f32.mrf.mxu1 }
 0x43a   :  { %550 = vrot.lane.b32.xlu1 %v9461_v20, %s11432_s27 }
 0x43e   :  { %546 = vrot.lane.b32.xlu1 %v9459_v19, %s11432_s27 }
 0x442   :  { %753 = vrot.lane.b32.xlu1 %v9461_v20, %s11430_s4 }
 0x446   :  { %751 = vrot.lane.b32.xlu1 %v9455_v15, %s11430_s4 }
 0x4b2   :  { %v514_v41 = vpop.xlane.xlu1 %513 }
 0x4b3   :  { %v522_v42 = vsub.f32 %v497_v32, %v514_v41 }
 0x4b5   :  { %v525_v43 = vmul.f32 1.442695, %v522_v42 }
 0x4b6   :  { %v551_v44 = vpop.permute.xlu1 %550  ;;  %v517_v45 = vpop.xlane.xlu0 %516 }
 0x4b7   :  { %8904 = vpow2.f32 %v525_v43  ;;  %v523_v46 = vsub.f32 %v502_v35, %v517_v45  ;;  %8014 = vmatpush3.msk.msra.mxu0 %vm201_vm3, %v551_v44 }
 0x4b8   :  { %8015 = vmatprep.subr.mxu0 %v9227_v48 }
 0x4b9   :  { %v527_v47 = vmul.f32 1.442695, %v523_v46 }
 0x4ba   :  { %v521_v55 = vpop.xlane.xlu0 %520  ;;  %v547_v60 = vpop.permute.xlu1 %546 }
 0x4bb   :  { %8906 = vpow2.f32 %v527_v47  ;;  %v524_v56 = vsub.f32 %v507_v38, %v521_v55 }
 0x4bd   :  { %v529_v57 = vmul.f32 1.442695, %v524_v56 }
 0x4be   :  { %v754_v61 = vpop.permute.xlu1 %753 }
 0x4bf   :  { %8908 = vpow2.f32 %v529_v57 }
 0x4c2   :  { %v752_v62 = vpop.permute.xlu1 %751 }
 0x4c4   :  { %v8905_v49 = vpop.eup %8904 }
 0x4c5   :  { %v531_v50 = vsel %vm511_vm7, %v8905_v49, 0.0 }
 0x4c6   :  { %532 = vadd.xlane.f32.xlu0 %v531_v50 }
 0x4c8   :  { %v8907_v51 = vpop.eup %8906 }
 0x4c9   :  { %v534_v52 = vsel %vm511_vm7, %v8907_v51, 0.0 }
 0x4ca   :  { %535 = vadd.xlane.f32.xlu1 %v534_v52 }
 0x4cc   :  { %v8909_v58 = vpop.eup %8908 }
 0x4cd   :  { %v537_v59 = vsel %vm518_vm8, %v8909_v58, 0.0 }
 0x4db   :  { %743 = vrot.lane.b32.xlu1 %v9473_v27, %s11428_s21 }
 0x4dc   :  { %548 = vrot.lane.b32.xlu0 %v9455_v15, %s11432_s27 }
 0x4df   :  { %747 = vrot.lane.b32.xlu1 %v9488_v31, %s11428_s21 }
 0x4fb   :  { %538 = vadd.xlane.f32.xlu0 %v537_v59 }
 0x511   :  { %749 = vrot.lane.b32.xlu0 %v9459_v19, %s11430_s4 }
 0x515   :  { %745 = vrot.lane.b32.xlu0 %v9481_v29, %s11428_s21 }
 0x54f   :  { %v533_v63 = vpop.xlane.xlu0 %532 }
 0x550   :  { %8910 = vrcp.f32 %v533_v63 }
 0x553   :  { %v536_v0 = vpop.xlane.xlu1 %535  ;;  %v549_v1 = vpop.permute.xlu0 %548 }
 0x554   :  { %8912 = vrcp.f32 %v536_v0  ;;  %8016 = vmatpush3.msra.mxu0 %v549_v1 }
 0x555   :  { %8017 = vmatprep.subr.mxu0 %v9227_v48 }
 0x556   :  { %8018 = vmatpush3.msra.mxu0 %v547_v60 }
 0x557   :  { %8039 = vmatprep.subr.mxu0 %v9227_v48  ;;  %v744_v10 = vpop.permute.xlu1 %743 }
 0x55b   :  { %v748_v12 = vpop.permute.xlu1 %747 }
 0x55d   :  { %v8911_v2 = vpop.eup %8910 }
 0x55e   :  { %v543_v3 = vmul.f32 %v8911_v2, %v8905_v49 }
 0x560   :  { %8020 = vmatmul.mubr.msk.f32.vlgmr.msra.gmra.mxu0 %vm511_vm7, %v543_v3 }
 0x561   :  { %v8913_v4 = vpop.eup %8912  ;;  %8040 = vmatpush3.xpose.msk.msra.mxu0 %vm415_vm6, %v754_v61  ;;  %8022 = vmatprep.mubr.msk.f32.mxu0 %vm9228_vm5, %v9227_v48 }
 0x562   :  { %8041 = vmatprep.subr.mxu0 %v9227_v48  ;;  %v544_v5 = vmul.f32 %v8913_v4, %v8907_v51 }
 0x564   :  { %8023 = vmatmul.mubr.msk.f32.gmra.mxu0 %vm511_vm7, %v544_v5 }
 0x565   :  { %8042 = vmatpush3.xpose.msk.msra.mxu0 %vm415_vm6, %v752_v62  ;;  %8025 = vmatprep.mubr.msk.f32.mxu0 %vm9228_vm5, %v9227_v48 }
 0x566   :  { %8043 = vmatprep.subr.mxu0 %v9227_v48 }
 0x584   :  { %v539_v6 = vpop.xlane.xlu0 %538 }
 0x585   :  { %8914 = vrcp.f32 %v539_v6 }
 0x588   :  { %v750_v7 = vpop.permute.xlu0 %749 }
 0x589   :  { %8044 = vmatpush3.xpose.msk.msra.mxu0 %vm415_vm6, %v750_v7 }
 0x58a   :  { %8069 = vmatprep.subr.mxu0 %v9227_v48 }
 0x58c   :  { %v746_v11 = vpop.permute.xlu0 %745 }
 0x592   :  { %v8915_v8 = vpop.eup %8914 }
 0x593   :  { %v545_v9 = vmul.f32 %v8915_v8, %v8909_v58 }
 0x595   :  { %8026 = vmatmul.mubr.msk.f32.gmra.mxu0 %vm511_vm7, %v545_v9 }
 0x596   :  { %8045 = vmatprep.mubr.msk.f32.mxu0 %vm9228_vm5, %v9227_v48 }
 0x599   :  { %8046 = vmatmul.mubr.msk.f32.vlgmr.msra.gmra.mxu0 %vm415_vm6, %v744_v10 }
 0x59a   :  { %8048 = vmatprep.mubr.msk.f32.mxu0 %vm9228_vm5, %v9227_v48 }
 0x59d   :  { %8049 = vmatmul.mubr.msk.f32.gmra.mxu0 %vm415_vm6, %v746_v11 }
 0x59e   :  { %8051 = vmatprep.mubr.msk.f32.mxu0 %vm9228_vm5, %v9227_v48 }
 0x5a1   :  { %8052 = vmatmul.mubr.msk.f32.gmra.mxu0 %vm415_vm6, %v748_v12 }
 0x5a2   :  { %8071 = vmatprep.mubr.msk.f32.mxu0 %vm9228_vm5, %v9227_v48 }
 0x620   :  { %v631_v17 = vpop.f32.mrf.mxu0 }
 0x621   :  { %8031 = vmatmul.mubr.msk.f32.vlgmr.msra.gmra.mxu1 %vm415_vm6, %v631_v17 }
 0x622   :  { %v8021_v22 = vpop.f32.mrf.mxu0  ;;  %8033 = vmatprep.mubr.msk.f32.mxu1 %vm9228_vm5, %v9227_v48 }
 0x624   :  { %v636_v23 = vpop.f32.mrf.mxu0 }
 0x625   :  { %8034 = vmatmul.mubr.msk.f32.gmra.mxu1 %vm415_vm6, %v636_v23 }
 0x626   :  { %v8024_v25 = vpop.f32.mrf.mxu0  ;;  %8036 = vmatprep.mubr.msk.f32.mxu1 %vm9228_vm5, %v9227_v48 }
 0x655   :  { %v641_v26 = vpop.f32.mrf.mxu0 }
 0x656   :  { %8037 = vmatmul.mubr.msk.f32.gmra.mxu1 %vm415_vm6, %v641_v26  ;;  %v228_v26 = vld [vmem:[%s11396_s8 + $0x8] sm:$0xff] }
 0x657   :  { %v8027_v32 = vpop.f32.mrf.mxu0  ;;  %8060 = vmatprep.mubr.msk.f32.mxu1 %vm9228_vm5, %v9227_v48  ;;  %8070 = vmatpush3.msra.mxu0 %v228_v26 }
 0x658   :  { %8095 = vmatprep.subr.mxu0 %v9227_v48 }
 0x659   :  { %v833_v33 = vpop.f32.mrf.mxu0 }
 0x65a   :  { %v847_v34 = vsel %vm511_vm7, %v833_v33, -inf }
 0x65b   :  { %848 = vmax.xlane.f32.xlu0 %v847_v34  ;;  %v8047_v35 = vpop.f32.mrf.mxu0 }
 0x65d   :  { %v838_v36 = vpop.f32.mrf.mxu0 }
 0x65e   :  { %v850_v37 = vsel %vm511_vm7, %v838_v36, -inf }
 0x65f   :  { %851 = vmax.xlane.f32.xlu1 %v850_v37  ;;  %v8050_v38 = vpop.f32.mrf.mxu0 }
 0x661   :  { %v843_v39 = vpop.f32.mrf.mxu0 }
 0x662   :  { %v853_v40 = vsel %vm518_vm8, %v843_v39, -inf }
 0x663   :  { %854 = vmax.xlane.f32.xlu0 %v853_v40  ;;  %v8053_v41 = vpop.f32.mrf.mxu0 }
 0x670   :  { %882 = vrot.lane.b32.xlu1 %v9455_v15, %s11426_s25 }
 0x674   :  { %880 = vrot.lane.b32.xlu1 %v9459_v19, %s11426_s25 }
 0x678   :  { %1081 = vrot.lane.b32.xlu1 %v9461_v20, %s11424_s3 }
 0x679   :  { %884 = vrot.lane.b32.xlu0 %v9461_v20, %s11426_s25 }
 0x67c   :  { %1077 = vrot.lane.b32.xlu1 %v9459_v19, %s11424_s3 }
 0x6e1   :  { %v9586_v42 = vpop.f32.mrf.mxu1 }
 0x6e3   :  { %v8032_v43 = vpop.f32.mrf.mxu1 }
 0x6e4   :  { %v849_v44 = vpop.xlane.xlu0 %848 }
 0x6e5   :  { %v856_v45 = vsub.f32 %v833_v33, %v849_v44  ;;  %v9588_v46 = vpop.f32.mrf.mxu1 }
 0x6e7   :  { %v859_v47 = vmul.f32 1.442695, %v856_v45  ;;  %v8035_v49 = vpop.f32.mrf.mxu1 }
 0x6e8   :  { %v852_v50 = vpop.xlane.xlu1 %851 }
 0x6e9   :  { %8916 = vpow2.f32 %v859_v47  ;;  %v857_v51 = vsub.f32 %v838_v36, %v852_v50 }
 0x6eb   :  { %v861_v52 = vmul.f32 1.442695, %v857_v51 }
 0x6ec   :  { %v855_v53 = vpop.xlane.xlu0 %854  ;;  %v883_v55 = vpop.permute.xlu1 %882 }
 0x6ed   :  { %8918 = vpow2.f32 %v861_v52  ;;  %v858_v54 = vsub.f32 %v843_v39, %v855_v53 }
 0x6ef   :  { %v863_v56 = vmul.f32 1.442695, %v858_v54 }
 0x6f0   :  { %v885_v57 = vpop.permute.xlu0 %884  ;;  %v881_v58 = vpop.permute.xlu1 %880 }
 0x6f1   :  { %8920 = vpow2.f32 %v863_v56  ;;  %8055 = vmatpush3.msk.msra.mxu1 %vm201_vm3, %v885_v57 }
 0x6f2   :  { %8056 = vmatprep.subr.mxu1 %v9227_v48 }
 0x6f3   :  { %8057 = vmatpush3.msra.mxu1 %v883_v55 }
 0x6f4   :  { %8058 = vmatprep.subr.mxu1 %v9227_v48  ;;  %v1082_v3 = vpop.permute.xlu1 %1081 }
 0x6f5   :  { %8059 = vmatpush3.msra.mxu1 %v881_v58 }
 0x6f6   :  { %v8917_v59 = vpop.eup %8916  ;;  %8080 = vmatprep.subr.mxu1 %v9227_v48 }
 0x6f7   :  { %v865_v60 = vsel %vm511_vm7, %v8917_v59, 0.0 }
 0x6f8   :  { %866 = vadd.xlane.f32.xlu0 %v865_v60  ;;  %v1078_v5 = vpop.permute.xlu1 %1077 }
 0x6fa   :  { %v8919_v61 = vpop.eup %8918 }
 0x6fb   :  { %v868_v62 = vsel %vm511_vm7, %v8919_v61, 0.0 }
 0x6fc   :  { %869 = vadd.xlane.f32.xlu0 %v868_v62 }
 0x6fe   :  { %v8921_v63 = vpop.eup %8920 }
 0x6ff   :  { %v871_v0 = vsel %vm518_vm8, %v8921_v63, 0.0 }
 0x700   :  { %872 = vadd.xlane.f32.xlu1 %v871_v0 }
 0x711   :  { %1073 = vrot.lane.b32.xlu1 %v9481_v29, %s11422_s30 }
 0x712   :  { %1079 = vrot.lane.b32.xlu0 %v9455_v15, %s11424_s3 }
 0x716   :  { %1071 = vrot.lane.b32.xlu0 %v9473_v27, %s11422_s30  ;;  %v9603_v1 = vpop.f32.mrf.mxu1 }
 0x718   :  { %v8038_v2 = vpop.f32.mrf.mxu1 }
 0x71a   :  { %1075 = vrot.lane.b32.xlu0 %v9488_v31, %s11422_s30 }
 0x781   :  { %v867_v4 = vpop.xlane.xlu0 %866 }
 0x782   :  { %8922 = vrcp.f32 %v867_v4 }
 0x785   :  { %v870_v6 = vpop.xlane.xlu0 %869 }
 0x786   :  { %8924 = vrcp.f32 %v870_v6 }
 0x789   :  { %v873_v7 = vpop.xlane.xlu1 %872  ;;  %v1080_v12 = vpop.permute.xlu0 %1079 }
 0x78a   :  { %8926 = vrcp.f32 %v873_v7 }
 0x78d   :  { %v1072_v22 = vpop.permute.xlu0 %1071  ;;  %v1074_v23 = vpop.permute.xlu1 %1073 }
 0x78f   :  { %v8923_v8 = vpop.eup %8922 }
 0x790   :  { %v877_v9 = vmul.f32 %v8923_v8, %v8917_v59 }
 0x791   :  { %v1076_v25 = vpop.permute.xlu0 %1075 }
 0x792   :  { %8061 = vmatmul.mubr.msk.f32.vlgmr.msra.gmra.mxu1 %vm511_vm7, %v877_v9 }
 0x793   :  { %v8925_v10 = vpop.eup %8924  ;;  %8081 = vmatpush3.xpose.msk.msra.mxu1 %vm415_vm6, %v1082_v3  ;;  %8063 = vmatprep.mubr.msk.f32.mxu1 %vm9228_vm5, %v9227_v48 }
 0x794   :  { %8082 = vmatprep.subr.mxu1 %v9227_v48  ;;  %v878_v11 = vmul.f32 %v8925_v10, %v8919_v61  ;;  %v7313_v61 = vld [vmem:[%s11397_s9] ss:$0 sm:$0xff] }
 0x795   :  { %v740_v62 = vadd.f32 %v7313_v61, %v9586_v42  ;;  %v741_v3 = vadd.f32 %v7313_v61, %v9588_v46 }
 0x796   :  { %8064 = vmatmul.mubr.msk.f32.gmra.mxu1 %vm511_vm7, %v878_v11 }
 0x797   :  { %v8927_v13 = vpop.eup %8926  ;;  %8083 = vmatpush3.xpose.msk.msra.mxu1 %vm415_vm6, %v1080_v12  ;;  %8066 = vmatprep.mubr.msk.f32.mxu1 %vm9228_vm5, %v9227_v48 }
 0x798   :  { %8084 = vmatprep.subr.mxu1 %v9227_v48  ;;  %v879_v17 = vmul.f32 %v8927_v13, %v8921_v63 }
 0x79a   :  { %8067 = vmatmul.mubr.msk.f32.gmra.mxu1 %vm511_vm7, %v879_v17 }
 0x79b   :  { %8085 = vmatpush3.xpose.msk.msra.mxu1 %vm415_vm6, %v1078_v5  ;;  %8086 = vmatprep.mubr.msk.f32.mxu1 %vm9228_vm5, %v9227_v48 }
 0x79c   :  { %8110 = vmatprep.subr.mxu1 %v9227_v48 }
 0x79e   :  { %8087 = vmatmul.mubr.msk.f32.vlgmr.msra.gmra.mxu1 %vm415_vm6, %v1072_v22 }
 0x79f   :  { %8089 = vmatprep.mubr.msk.f32.mxu1 %vm9228_vm5, %v9227_v48 }
 0x7a2   :  { %8090 = vmatmul.mubr.msk.f32.gmra.mxu1 %vm415_vm6, %v1074_v23 }
 0x7a3   :  { %8092 = vmatprep.mubr.msk.f32.mxu1 %vm9228_vm5, %v9227_v48 }
 0x7a6   :  { %8093 = vmatmul.mubr.msk.f32.gmra.mxu1 %vm415_vm6, %v1076_v25 }
 0x7a7   :  { %8112 = vmatprep.mubr.msk.f32.mxu1 %vm9228_vm5, %v9227_v48 }
 0x852   :  { %v965_v32 = vpop.f32.mrf.mxu1 }
 0x853   :  { %8072 = vmatmul.mubr.msk.f32.vlgmr.msra.gmra.mxu0 %vm415_vm6, %v965_v32 }
 0x854   :  { %v8062_v33 = vpop.f32.mrf.mxu1  ;;  %8074 = vmatprep.mubr.msk.f32.mxu0 %vm9228_vm5, %v9227_v48 }
 0x856   :  { %v970_v34 = vpop.f32.mrf.mxu1 }
 0x857   :  { %8075 = vmatmul.mubr.msk.f32.gmra.mxu0 %vm415_vm6, %v970_v34 }
 0x858   :  { %v8065_v35 = vpop.f32.mrf.mxu1  ;;  %8077 = vmatprep.mubr.msk.f32.mxu0 %vm9228_vm5, %v9227_v48 }
 0x85a   :  { %v975_v36 = vpop.f32.mrf.mxu1 }
 0x85b   :  { %8078 = vmatmul.mubr.msk.f32.gmra.mxu0 %vm415_vm6, %v975_v36 }
 0x85c   :  { %v8068_v37 = vpop.f32.mrf.mxu1  ;;  %8101 = vmatprep.mubr.msk.f32.mxu0 %vm9228_vm5, %v9227_v48 }
 0x85e   :  { %v1161_v38 = vpop.f32.mrf.mxu1 }
 0x85f   :  { %v1175_v39 = vsel %vm511_vm7, %v1161_v38, -inf }
 0x860   :  { %1176 = vmax.xlane.f32.xlu1 %v1175_v39  ;;  %v8088_v40 = vpop.f32.mrf.mxu1 }
 0x861   :  { %v229_v40 = vld [vmem:[%s11396_s8 + $0x10] sm:$0xff] }
 0x862   :  { %v1166_v41 = vpop.f32.mrf.mxu1  ;;  %8111 = vmatpush3.msra.mxu1 %v229_v40 }
 0x863   :  { %v1178_v43 = vsel %vm511_vm7, %v1166_v41, -inf  ;;  %8136 = vmatprep.subr.mxu1 %v9227_v48 }
 0x864   :  { %1179 = vmax.xlane.f32.xlu0 %v1178_v43  ;;  %v8091_v44 = vpop.f32.mrf.mxu1 }
 0x866   :  { %v1171_v45 = vpop.f32.mrf.mxu1 }
 0x867   :  { %v1181_v47 = vsel %vm518_vm8, %v1171_v45, -inf }
 0x868   :  { %1182 = vmax.xlane.f32.xlu0 %v1181_v47  ;;  %v8094_v49 = vpop.f32.mrf.mxu1 }
 0x871   :  { %1212 = vrot.lane.b32.xlu1 %v9461_v20, %s11420_s22 }
 0x875   :  { %1208 = vrot.lane.b32.xlu1 %v9459_v19, %s11420_s22 }
 0x879   :  { %1409 = vrot.lane.b32.xlu1 %v9461_v20, %s11418_s28 }
 0x87d   :  { %1407 = vrot.lane.b32.xlu1 %v9455_v15, %s11418_s28 }
 0x8e9   :  { %v1177_v50 = vpop.xlane.xlu1 %1176 }
 0x8ea   :  { %v1184_v51 = vsub.f32 %v1161_v38, %v1177_v50 }
 0x8ec   :  { %v1187_v52 = vmul.f32 1.442695, %v1184_v51 }
 0x8ed   :  { %v1213_v53 = vpop.permute.xlu1 %1212  ;;  %v1180_v54 = vpop.xlane.xlu0 %1179 }
 0x8ee   :  { %8928 = vpow2.f32 %v1187_v52  ;;  %v1185_v55 = vsub.f32 %v1166_v41, %v1180_v54  ;;  %8096 = vmatpush3.msk.msra.mxu0 %vm201_vm3, %v1213_v53 }
 0x8ef   :  { %8097 = vmatprep.subr.mxu0 %v9227_v48 }
 0x8f0   :  { %v1189_v56 = vmul.f32 1.442695, %v1185_v55 }
 0x8f1   :  { %v1183_v4 = vpop.xlane.xlu0 %1182 }
 0x8f2   :  { %8930 = vpow2.f32 %v1189_v56  ;;  %v1186_v42 = vsub.f32 %v1171_v45, %v1183_v4 }
 0x8f4   :  { %v1191_v10 = vmul.f32 1.442695, %v1186_v42 }
 0x8f6   :  { %8932 = vpow2.f32 %v1191_v10 }
 0x8fb   :  { %v8929_v57 = vpop.eup %8928 }
 0x8fc   :  { %v1193_v58 = vsel %vm511_vm7, %v8929_v57, 0.0 }
 0x8fd   :  { %1194 = vadd.xlane.f32.xlu0 %v1193_v58 }
 0x8ff   :  { %v8931_v59 = vpop.eup %8930 }
 0x900   :  { %v1196_v60 = vsel %vm511_vm7, %v8931_v59, 0.0 }
 0x901   :  { %1197 = vadd.xlane.f32.xlu1 %v1196_v60 }
 0x903   :  { %v8933_v12 = vpop.eup %8932 }
 0x904   :  { %v1199_v46 = vsel %vm518_vm8, %v8933_v12, 0.0 }
 0x912   :  { %1399 = vrot.lane.b32.xlu1 %v9473_v27, %s11414_s23  ;;  %v742_v27 = vadd.f32 %v7313_v61, %v9603_v1 }
 0x913   :  { %v1054_v63 = vpop.f32.mrf.mxu0  ;;  %1210 = vrot.lane.b32.xlu0 %v9455_v15, %s11420_s22  ;;  %s11448_s22 = smov 48  }
 0x914   :  { %v9667_v0 = vadd.f32 %v1054_v63, %v740_v62 }
 0x915   :  { %v8073_v2 = vpop.f32.mrf.mxu0 }
 0x916   :  { %1403 = vrot.lane.b32.xlu1 %v9488_v31, %s11414_s23  ;;  %v1209_v31 = vpop.permute.xlu1 %1208 }
 0x917   :  { %v1059_v5 = vpop.f32.mrf.mxu0 }
 0x918   :  { %v9672_v6 = vadd.f32 %v1059_v5, %v741_v3 }
 0x919   :  { %v8076_v7 = vpop.f32.mrf.mxu0 }
 0x91a   :  { %v1410_v13 = vpop.permute.xlu1 %1409 }
 0x91b   :  { %v1064_v8 = vpop.f32.mrf.mxu0 }
 0x91c   :  { %v9675_v9 = vadd.f32 %v1064_v8, %v742_v27 }
 0x91d   :  { %v8079_v11 = vpop.f32.mrf.mxu0 }
 0x91e   :  { %v1408_v17 = vpop.permute.xlu1 %1407 }
 0x932   :  { %1200 = vadd.xlane.f32.xlu0 %v1199_v46 }
 0x948   :  { %1405 = vrot.lane.b32.xlu0 %v9459_v19, %s11418_s28  ;;  %s11449_s28 = smov 72  }
 0x94c   :  { %1401 = vrot.lane.b32.xlu0 %v9481_v29, %s11414_s23  ;;  %s11455_s23 = smov 80  }
 0x986   :  { %v1195_v1 = vpop.xlane.xlu0 %1194 }
 0x987   :  { %8934 = vrcp.f32 %v1195_v1 }
 0x98a   :  { %v1198_v22 = vpop.xlane.xlu1 %1197  ;;  %v1211_v23 = vpop.permute.xlu0 %1210 }
 0x98b   :  { %8936 = vrcp.f32 %v1198_v22  ;;  %8098 = vmatpush3.msra.mxu0 %v1211_v23  ;;  %v230_v22 = vld [vmem:[%s11396_s8 + $0x18] sm:$0xff] }
 0x98c   :  { %8099 = vmatprep.subr.mxu0 %v9227_v48 }
 0x98d   :  { %8100 = vmatpush3.msra.mxu0 %v1209_v31 }
 0x98e   :  { %8121 = vmatprep.subr.mxu0 %v9227_v48  ;;  %v1400_v37 = vpop.permute.xlu1 %1399 }
 0x992   :  { %v1404_v39 = vpop.permute.xlu1 %1403 }
 0x994   :  { %v8935_v25 = vpop.eup %8934 }
 0x995   :  { %v1205_v26 = vmul.f32 %v8935_v25, %v8929_v57 }
 0x997   :  { %8102 = vmatmul.mubr.msk.f32.vlgmr.msra.gmra.mxu0 %vm511_vm7, %v1205_v26 }
 0x998   :  { %v8937_v32 = vpop.eup %8936  ;;  %8122 = vmatpush3.xpose.msk.msra.mxu0 %vm415_vm6, %v1410_v13  ;;  %8104 = vmatprep.mubr.msk.f32.mxu0 %vm9228_vm5, %v9227_v48 }
 0x999   :  { %8123 = vmatprep.subr.mxu0 %v9227_v48  ;;  %v1206_v29 = vmul.f32 %v8937_v32, %v8931_v59 }
 0x99b   :  { %8105 = vmatmul.mubr.msk.f32.gmra.mxu0 %vm511_vm7, %v1206_v29 }
 0x99c   :  { %8124 = vmatpush3.xpose.msk.msra.mxu0 %vm415_vm6, %v1408_v17  ;;  %8107 = vmatprep.mubr.msk.f32.mxu0 %vm9228_vm5, %v9227_v48 }
 0x99d   :  { %8125 = vmatprep.subr.mxu0 %v9227_v48 }
 0x9bb   :  { %v1201_v33 = vpop.xlane.xlu0 %1200 }
 0x9bc   :  { %8938 = vrcp.f32 %v1201_v33 }
 0x9bf   :  { %v1406_v34 = vpop.permute.xlu0 %1405 }
 0x9c0   :  { %8126 = vmatpush3.xpose.msk.msra.mxu0 %vm415_vm6, %v1406_v34 }
 0x9c1   :  { %8151 = vmatprep.subr.mxu0 %v9227_v48 }
 0x9c3   :  { %v1402_v38 = vpop.permute.xlu0 %1401 }
 0x9c9   :  { %v8939_v35 = vpop.eup %8938 }
 0x9ca   :  { %v1207_v36 = vmul.f32 %v8939_v35, %v8933_v12 }
 0x9cc   :  { %8108 = vmatmul.mubr.msk.f32.gmra.mxu0 %vm511_vm7, %v1207_v36 }
 0x9cd   :  { %8127 = vmatprep.mubr.msk.f32.mxu0 %vm9228_vm5, %v9227_v48 }
 0x9d0   :  { %8128 = vmatmul.mubr.msk.f32.vlgmr.msra.gmra.mxu0 %vm415_vm6, %v1400_v37 }
 0x9d1   :  { %8130 = vmatprep.mubr.msk.f32.mxu0 %vm9228_vm5, %v9227_v48  ;;  %8152 = vmatpush3.msra.mxu0 %v230_v22 }
 0x9d2   :  { %8179 = vmatprep.subr.mxu0 %v9227_v48 }
 0x9d4   :  { %8131 = vmatmul.mubr.msk.f32.gmra.mxu0 %vm415_vm6, %v1402_v38 }
 0x9d5   :  { %8133 = vmatprep.mubr.msk.f32.mxu0 %vm9228_vm5, %v9227_v48 }
 0x9d8   :  { %8134 = vmatmul.mubr.msk.f32.gmra.mxu0 %vm415_vm6, %v1404_v39 }
 0x9d9   :  { %8153 = vmatprep.mubr.msk.f32.mxu0 %vm9228_vm5, %v9227_v48 }
 0xa57   :  { %v1293_v41 = vpop.f32.mrf.mxu0 }
 0xa58   :  { %8113 = vmatmul.mubr.msk.f32.vlgmr.msra.gmra.mxu1 %vm415_vm6, %v1293_v41 }
 0xa59   :  { %v8103_v43 = vpop.f32.mrf.mxu0  ;;  %8115 = vmatprep.mubr.msk.f32.mxu1 %vm9228_vm5, %v9227_v48 }
 0xa5b   :  { %v1298_v44 = vpop.f32.mrf.mxu0 }
 0xa5c   :  { %8116 = vmatmul.mubr.msk.f32.gmra.mxu1 %vm415_vm6, %v1298_v44  ;;  %v9164_v44 = vld [vmem:[%s11446_s24] ss:$0 sm:$0xff]  ;;  %s11450_s24 = smov 104  }
 0xa5d   :  { %v8106_v45 = vpop.f32.mrf.mxu0  ;;  %8118 = vmatprep.mubr.msk.f32.mxu1 %vm9228_vm5, %v9227_v48 }
 0xa5e   :  { %v180_v45 = vadd.f32 %v9164_v44, %v9560_v14 }
 0xa8c   :  { %v1303_v47 = vpop.f32.mrf.mxu0 }
 0xa8d   :  { %8119 = vmatmul.mubr.msk.f32.gmra.mxu1 %vm415_vm6, %v1303_v47  ;;  %v175_v47 = vadd.f32 %v9164_v44, %v9562_v16 }
 0xa8e   :  { %v8109_v49 = vpop.f32.mrf.mxu0  ;;  %8142 = vmatprep.mubr.msk.f32.mxu1 %vm9228_vm5, %v9227_v48 }
 0xa8f   :  { %v210_v49 = vadd.f32 %v9390_v18, %v180_v45 }
 0xa90   :  { %v1489_v50 = vpop.f32.mrf.mxu0 }
 0xa91   :  { %v1503_v51 = vsel %vm511_vm7, %v1489_v50, -inf }
 0xa92   :  { %1504 = vmax.xlane.f32.xlu0 %v1503_v51  ;;  %v8129_v52 = vpop.f32.mrf.mxu0 }
 0xa94   :  { %v1494_v53 = vpop.f32.mrf.mxu0 }
 0xa95   :  { %v1506_v54 = vsel %vm511_vm7, %v1494_v53, -inf }
 0xa96   :  { %1507 = vmax.xlane.f32.xlu1 %v1506_v54  ;;  %v8132_v55 = vpop.f32.mrf.mxu0 }
 0xa98   :  { %v1499_v56 = vpop.f32.mrf.mxu0 }
 0xa99   :  { %v1509_v57 = vsel %vm518_vm8, %v1499_v56, -inf }
 0xa9a   :  { %1510 = vmax.xlane.f32.xlu0 %v1509_v57  ;;  %v8135_v58 = vpop.f32.mrf.mxu0 }
 0xaa7   :  { %1538 = vrot.lane.b32.xlu1 %v9455_v15, %s11416_s2 }
 0xb18   :  { %v1382_v59 = vpop.f32.mrf.mxu1 }
 0xb19   :  { %v9727_v60 = vadd.f32 %v1382_v59, %v9667_v0 }
 0xb1a   :  { %v8114_v61 = vpop.f32.mrf.mxu1 }
 0xb1b   :  { %v1505_v62 = vpop.xlane.xlu0 %1504 }
 0xb1c   :  { %v1512_v63 = vsub.f32 %v1489_v50, %v1505_v62  ;;  %v1387_v2 = vpop.f32.mrf.mxu1  ;;  %v209_v50 = vadd.f32 %v9392_v21, %v175_v47 }
 0xb1d   :  { %v9730_v3 = vadd.f32 %v1387_v2, %v9672_v6 }
 0xb1e   :  { %v1515_v4 = vmul.f32 1.442695, %v1512_v63  ;;  %v8117_v5 = vpop.f32.mrf.mxu1  ;;  %v213_v54 = vrot.slane %v209_v50, 7 }
 0xb1f   :  { %v1508_v42 = vpop.xlane.xlu1 %1507 }
 0xb20   :  { %8940 = vpow2.f32 %v1515_v4  ;;  %v1513_v7 = vsub.f32 %v1494_v53, %v1508_v42  ;;  %v9776_v53 = vrot.slane %v210_v49, 7 }
 0xb22   :  { %v1517_v27 = vmul.f32 1.442695, %v1513_v7  ;;  %v9786_v21 = vsel %vm201_vm3, %v213_v54, %v9776_v53  ;;  %v2002_v5 = vsel %vm255_vm2, %v9776_v53, 0.0 }
 0xb23   :  { %v1511_v8 = vpop.xlane.xlu0 %1510  ;;  %v1539_v25 = vpop.permute.xlu1 %1538 }
 0xb24   :  { %8942 = vpow2.f32 %v1517_v27  ;;  %v1514_v15 = vsub.f32 %v1499_v56, %v1511_v8 }
 0xb26   :  { %v1519_v10 = vmul.f32 1.442695, %v1514_v15 }
 0xb28   :  { %8944 = vpow2.f32 %v1519_v10 }
 0xb2d   :  { %v8941_v0 = vpop.eup %8940 }
 0xb2e   :  { %v1521_v11 = vsel %vm511_vm7, %v8941_v0, 0.0 }
 0xb2f   :  { %1522 = vadd.xlane.f32.xlu0 %v1521_v11 }
 0xb31   :  { %v8943_v12 = vpop.eup %8942 }
 0xb32   :  { %v1524_v46 = vsel %vm511_vm7, %v8943_v12, 0.0 }
 0xb33   :  { %1525 = vadd.xlane.f32.xlu0 %v1524_v46 }
 0xb35   :  { %v8945_v6 = vpop.eup %8944 }
 0xb36   :  { %v1527_v31 = vsel %vm518_vm8, %v8945_v6, 0.0 }
 0xb37   :  { %1528 = vadd.xlane.f32.xlu1 %v1527_v31 }
 0xb48   :  { %1536 = vrot.lane.b32.xlu1 %v9459_v19, %s11416_s2 }
 0xb49   :  { %1540 = vrot.lane.b32.xlu0 %v9461_v20, %s11416_s2  ;;  %s11451_s2 = smov 40  }
 0xb4d   :  { %v1392_v13 = vpop.f32.mrf.mxu1 }
 0xb4e   :  { %v9740_v17 = vadd.f32 %v1392_v13, %v9675_v9 }
 0xb4f   :  { %v8120_v1 = vpop.f32.mrf.mxu1 }
 0xbb8   :  { %v1523_v23 = vpop.xlane.xlu0 %1522 }
 0xbb9   :  { %8946 = vrcp.f32 %v1523_v23 }
 0xbbc   :  { %v1526_v26 = vpop.xlane.xlu0 %1525 }
 0xbbd   :  { %8948 = vrcp.f32 %v1526_v26 }
 0xbc0   :  { %v1529_v19 = vpop.xlane.xlu1 %1528  ;;  %v1541_v32 = vpop.permute.xlu0 %1540 }
 0xbc1   :  { %8950 = vrcp.f32 %v1529_v19  ;;  %8137 = vmatpush3.msk.msra.mxu1 %vm201_vm3, %v1541_v32 }
 0xbc2   :  { %8138 = vmatprep.subr.mxu1 %v9227_v48 }
 0xbc3   :  { %8139 = vmatpush3.msra.mxu1 %v1539_v25 }
 0xbc4   :  { %v1537_v20 = vpop.permute.xlu1 %1536  ;;  %8140 = vmatprep.subr.mxu1 %v9227_v48 }
 0xbc5   :  { %8141 = vmatpush3.msra.mxu1 %v1537_v20 }
 0xbc6   :  { %v8947_v9 = vpop.eup %8946  ;;  %8162 = vmatprep.subr.mxu1 %v9227_v48 }
 0xbc7   :  { %v1533_v29 = vmul.f32 %v8947_v9, %v8941_v0 }
 0xbc9   :  { %8143 = vmatmul.mubr.msk.f32.vlgmr.msra.gmra.mxu1 %vm511_vm7, %v1533_v29 }
 0xbca   :  { %v8949_v33 = vpop.eup %8948  ;;  %8145 = vmatprep.mubr.msk.f32.mxu1 %vm9228_vm5, %v9227_v48 }
 0xbcb   :  { %v1534_v34 = vmul.f32 %v8949_v33, %v8943_v12 }
 0xbcd   :  { %8146 = vmatmul.mubr.msk.f32.gmra.mxu1 %vm511_vm7, %v1534_v34 }
 0xbce   :  { %v8951_v35 = vpop.eup %8950  ;;  %8148 = vmatprep.mubr.msk.f32.mxu1 %vm9228_vm5, %v9227_v48 }
 0xbcf   :  { %v1535_v36 = vmul.f32 %v8951_v35, %v8945_v6 }
 0xbd1   :  { %8149 = vmatmul.mubr.msk.f32.gmra.mxu1 %vm511_vm7, %v1535_v36 }
 0xbd2   :  { %8170 = vmatprep.mubr.msk.f32.mxu1 %vm9228_vm5, %v9227_v48 }
 0xc89   :  { %v1621_v37 = vpop.f32.mrf.mxu1 }
 0xc8a   :  { %8154 = vmatmul.mubr.msk.f32.vlgmr.msra.gmra.mxu0 %vm415_vm6, %v1621_v37 }
 0xc8b   :  { %v8144_v38 = vpop.f32.mrf.mxu1  ;;  %8156 = vmatprep.mubr.msk.f32.mxu0 %vm9228_vm5, %v9227_v48 }
 0xc8c   :  { %v237_v38 = vld [vmem:[%s11400_s12 + $0x18] sm:$0xff] }
 0xc8d   :  { %v1626_v39 = vpop.f32.mrf.mxu1  ;;  %8163 = vmatpush3.msra.mxu1 %v237_v38  ;;  %v9939_v38 = vld [vmem:[%s11402_s14 + $0x20] sm:$0xff] }
 0xc8e   :  { %8157 = vmatmul.mubr.msk.f32.gmra.mxu0 %vm415_vm6, %v1626_v39  ;;  %8164 = vmatprep.subr.mxu1 %v9227_v48  ;;  %v236_v39 = vld [vmem:[%s11400_s12 + $0x10] sm:$0xff] }
 0xc8f   :  { %v8147_v40 = vpop.f32.mrf.mxu1  ;;  %8159 = vmatprep.mubr.msk.f32.mxu0 %vm9228_vm5, %v9227_v48  ;;  %8165 = vmatpush3.msra.mxu1 %v236_v39  ;;  %v9946_v39 = vld [vmem:[%s11402_s14 + $0x18] sm:$0xff] }
 0xc90   :  { %8166 = vmatprep.subr.mxu1 %v9227_v48  ;;  %v235_v40 = vld [vmem:[%s11400_s12 + $0x8] sm:$0xff] }
 0xc91   :  { %v1631_v41 = vpop.f32.mrf.mxu1  ;;  %8167 = vmatpush3.msra.mxu1 %v235_v40  ;;  %v9953_v40 = vld [vmem:[%s11402_s14 + $0x10] sm:$0xff] }
 0xc92   :  { %8160 = vmatmul.mubr.msk.f32.gmra.mxu0 %vm415_vm6, %v1631_v41  ;;  %8168 = vmatprep.subr.mxu1 %v9227_v48  ;;  %v234_v41 = vld [vmem:[%s11400_s12] sm:$0xff] }
 0xc93   :  { %v8150_v43 = vpop.f32.mrf.mxu1  ;;  %8195 = vmatprep.mubr.msk.f32.mxu0 %vm9228_vm5, %v9227_v48  ;;  %8169 = vmatpush3.msra.mxu1 %v234_v41  ;;  %v9960_v41 = vld [vmem:[%s11402_s14 + $0x8] sm:$0xff] }
 0xc94   :  { %8204 = vmatprep.subr.mxu1 %v9227_v48 }
 0xd4a   :  { %v1710_v51 = vpop.f32.mrf.mxu0 }
 0xd4b   :  { %v1724_v52 = vadd.f32 %v1710_v51, %v9727_v60 }
 0xd4c   :  { %v8155_v55 = vpop.f32.mrf.mxu0 }
 0xd4d   :  { %v9779_v56 = vadd.f32 %v1724_v52, %v9401_v28  ;;  %v1999_v28 = vsel %vm248_vm4, %v9786_v21, 0.0 }
 0xd4e   :  { %v1715_v57 = vpop.f32.mrf.mxu0 }
 0xd4f   :  { %v1725_v58 = vadd.f32 %v1715_v57, %v9730_v3  ;;  %v1730_v14 = vsel %vm248_vm4, %v9779_v56, 0.0 }
 0xd50   :  { %1731 = vadd.xlane.f32.xlu1 %v1730_v14  ;;  %v8158_v18 = vpop.f32.mrf.mxu0 }
 0xd51   :  { %v9789_v16 = vadd.f32 %v1725_v58, %v9407_v30  ;;  %v9165_v30 = vld [vmem:[%s11445_s29] sm:$0xff] }
 0xd52   :  { %v1720_v59 = vpop.f32.mrf.mxu0  ;;  %v9805_v3 = vsel %vm201_vm3, %v9165_v30, %v213_v54 }
 0xd53   :  { %v1726_v60 = vadd.f32 %v1720_v59, %v9740_v17  ;;  %v1733_v61 = vsel %vm248_vm4, %v9789_v16, 0.0  ;;  %v1996_v4 = vsel %vm248_vm4, %v9805_v3, 0.0 }
 0xd54   :  { %2000 = vadd.xlane.f32.xlu1 %v1999_v28  ;;  %1734 = vadd.xlane.f32.xlu0 %v1733_v61  ;;  %v8161_v62 = vpop.f32.mrf.mxu0 }
 0xd55   :  { %v9797_v63 = vadd.f32 %v1726_v60, %v9395_v24  ;;  %v7353_v62 = vld [vmem:[%s11398_s10] ss:$0 sm:$0xff] }
 0xd57   :  { %v1736_v2 = vsel %vm255_vm2, %v9797_v63, 0.0 }
 0xd58   :  { %1737 = vadd.xlane.f32.xlu0 %v1736_v2 }
 0xd5c   :  { %1997 = vadd.xlane.f32.xlu0 %v1996_v4  ;;  %v7354_v4 = vld [vmem:[%s11399_s11] ss:$0 sm:$0xff] }
 0xd60   :  { %2003 = vadd.xlane.f32.xlu0 %v2002_v5 }
 0xdd9   :  { %v1732_v24 = vpop.xlane.xlu1 %1731 }
 0xdda   :  { %v1739_v42 = vmul.f32 0.03125, %v1732_v24 }
 0xddc   :  { %v9812_v7 = vsub.f32 %v9779_v56, %v1739_v42 }
 0xddd   :  { %v2001_v27 = vpop.xlane.xlu1 %2000  ;;  %v1735_v8 = vpop.xlane.xlu0 %1734 }
 0xdde   :  { %v1740_v15 = vmul.f32 0.03125, %v1735_v8  ;;  %v1745_v10 = vmul.f32 %v9812_v7, %v9812_v7  ;;  %v2006_v0 = vmul.f32 0.03125, %v2001_v27 }
 0xde0   :  { %v9817_v11 = vsub.f32 %v9789_v16, %v1740_v15  ;;  %v1748_v12 = vsel %vm248_vm4, %v1745_v10, 0.0  ;;  %v9823_v13 = vsub.f32 %v9786_v21, %v2006_v0 }
 0xde1   :  { %1749 = vadd.xlane.f32.xlu1 %v1748_v12  ;;  %v1738_v46 = vpop.xlane.xlu0 %1737 }
 0xde2   :  { %v1741_v6 = vmul.f32 0.03125, %v1738_v46  ;;  %v1746_v31 = vmul.f32 %v9817_v11, %v9817_v11  ;;  %v2012_v32 = vmul.f32 %v9823_v13, %v9823_v13 }
 0xde4   :  { %v9826_v17 = vsub.f32 %v9797_v63, %v1741_v6  ;;  %v1751_v1 = vsel %vm248_vm4, %v1746_v31, 0.0  ;;  %v2017_v34 = vsel %vm248_vm4, %v2012_v32, 0.0  ;;  %v9168_v6 = vld [vmem:[%s11394_s6 + $0x8] sm:$0xff] }
 0xde5   :  { %1752 = vadd.xlane.f32.xlu0 %v1751_v1  ;;  %v1998_v22 = vpop.xlane.xlu0 %1997 }
 0xde6   :  { %v2005_v23 = vmul.f32 0.03125, %v1998_v22  ;;  %v1747_v25 = vmul.f32 %v9826_v17, %v9826_v17  ;;  %v9169_v22 = vld [vmem:[%s11394_s6] sm:$0xff] }
 0xde8   :  { %v9832_v26 = vsub.f32 %v9805_v3, %v2005_v23  ;;  %v1754_v19 = vsel %vm255_vm2, %v1747_v25, 0.0 }
 0xde9   :  { %1755 = vadd.xlane.f32.xlu1 %v1754_v19  ;;  %v2004_v20 = vpop.xlane.xlu0 %2003  ;;  %v9170_v19 = vld [vmem:[%s11447_s1] ss:$0 sm:$0xff] }
 0xdea   :  { %v2007_v9 = vmul.f32 0.03125, %v2004_v20  ;;  %v2011_v29 = vmul.f32 %v9832_v26, %v9832_v26 }
 0xdec   :  { %v9840_v33 = vsub.f32 %v9776_v53, %v2007_v9  ;;  %v2014_v35 = vsel %vm248_vm4, %v2011_v29, 0.0 }
 0xded   :  { %2018 = vadd.xlane.f32.xlu1 %v2017_v34  ;;  %2015 = vadd.xlane.f32.xlu0 %v2014_v35 }
 0xdee   :  { %v2013_v36 = vmul.f32 %v9840_v33, %v9840_v33 }
 0xdf0   :  { %v2020_v37 = vsel %vm255_vm2, %v2013_v36, 0.0  ;;  %v9925_v36 = vld [vmem:[%s11402_s14 + $0x30] sm:$0xff] }
 0xdf1   :  { %2021 = vadd.xlane.f32.xlu0 %v2020_v37  ;;  %v9932_v37 = vld [vmem:[%s11402_s14 + $0x28] sm:$0xff] }
 0xe6a   :  { %v1750_v43 = vpop.xlane.xlu1 %1749 }
 0xe6b   :  { %v1757_v44 = vmul.f32 0.03125, %v1750_v43  ;;  %v9967_v43 = vld [vmem:[%s11402_s14] sm:$0xff] }
 0xe6d   :  { %v1760_v45 = vadd.f32 1e-05, %v1757_v44  ;;  %v7355_v44 = vld [vmem:[%s11401_s13] ss:$0 sm:$0xff] }
 0xe6e   :  { %v1753_v47 = vpop.xlane.xlu0 %1752 }
 0xe6f   :  { %8952 = vrsqrt.f32 %v1760_v45  ;;  %v1758_v49 = vmul.f32 0.03125, %v1753_v47 }
 0xe71   :  { %v1761_v50 = vadd.f32 1e-05, %v1758_v49 }
 0xe72   :  { %v1756_v51 = vpop.xlane.xlu1 %1755 }
 0xe73   :  { %8954 = vrsqrt.f32 %v1761_v50  ;;  %v1759_v52 = vmul.f32 0.03125, %v1756_v51 }
 0xe75   :  { %v1762_v54 = vadd.f32 1e-05, %v1759_v52 }
 0xe76   :  { %v2019_v55 = vpop.xlane.xlu1 %2018  ;;  %v2016_v57 = vpop.xlane.xlu0 %2015 }
 0xe77   :  { %8956 = vrsqrt.f32 %v1762_v54  ;;  %v2024_v58 = vmul.f32 0.03125, %v2019_v55  ;;  %v2023_v14 = vmul.f32 0.03125, %v2016_v57 }
 0xe79   :  { %v2027_v18 = vadd.f32 1e-05, %v2024_v58  ;;  %v2026_v59 = vadd.f32 1e-05, %v2023_v14 }
 0xe7a   :  { %v2022_v60 = vpop.xlane.xlu0 %2021 }
 0xe7b   :  { %8958 = vrsqrt.f32 %v2027_v18  ;;  %v2025_v28 = vmul.f32 0.03125, %v2022_v60 }
 0xe7c   :  { %v8953_v61 = vpop.eup %8952  ;;  %8960 = vrsqrt.f32 %v2026_v59 }
 0xe7d   :  { %v1766_v2 = vmul.f32 %v8953_v61, %v9812_v7  ;;  %v2028_v30 = vadd.f32 1e-05, %v2025_v28  ;;  %v9166_v7 = vld [vmem:[%s11394_s6 + $0x18] sm:$0xff] }
 0xe7f   :  { %v1775_v5 = vmul.f32 %v7353_v62, %v1766_v2  ;;  %8962 = vrsqrt.f32 %v2028_v30 }
 0xe80   :  { %v8955_v24 = vpop.eup %8954 }
 0xe81   :  { %v1784_v42 = vadd.f32 %v7354_v4, %v1775_v5  ;;  %v1767_v27 = vmul.f32 %v8955_v24, %v9817_v11  ;;  %v9167_v11 = vld [vmem:[%s11394_s6 + $0x10] sm:$0xff] }
 0xe83   :  { %8171 = vmatmul.mubr.msk.f32.vlgmr.msra.gmra.mxu1 %vm248_vm4, %v1784_v42  ;;  %v1776_v8 = vmul.f32 %v7353_v62, %v1767_v27 }
 0xe84   :  { %v8957_v15 = vpop.eup %8956  ;;  %8173 = vmatprep.mubr.msk.f32.mxu1 %vm9228_vm5, %v9227_v48  ;;  %8205 = vmatpush3.msra.mxu1 %v9166_v7 }
 0xe85   :  { %v1785_v10 = vadd.f32 %v7354_v4, %v1776_v8  ;;  %8206 = vmatprep.subr.mxu1 %v9227_v48  ;;  %v1768_v0 = vmul.f32 %v8957_v15, %v9826_v17 }
 0xe86   :  { %8207 = vmatpush3.msra.mxu1 %v9167_v11 }
 0xe87   :  { %8174 = vmatmul.mubr.msk.f32.gmra.mxu1 %vm248_vm4, %v1785_v10  ;;  %v1777_v12 = vmul.f32 %v7353_v62, %v1768_v0  ;;  %8208 = vmatprep.subr.mxu1 %v9227_v48  ;;  %v9172_v62 = vld [vmem:[%s11395_s7] ss:$0 sm:$0xff] }
 0xe88   :  { %v8959_v46 = vpop.eup %8958  ;;  %8176 = vmatprep.mubr.msk.f32.mxu1 %vm9228_vm5, %v9227_v48  ;;  %8209 = vmatpush3.msra.mxu1 %v9168_v6 }
 0xe89   :  { %v8961_v31 = vpop.eup %8960  ;;  %v1786_v17 = vadd.f32 %v7354_v4, %v1777_v12  ;;  %8210 = vmatprep.subr.mxu1 %v9227_v48  ;;  %v2033_v23 = vmul.f32 %v8959_v46, %v9823_v13 }
 0xe8a   :  { %v2032_v1 = vmul.f32 %v8961_v31, %v9832_v26  ;;  %8211 = vmatpush3.msra.mxu1 %v9169_v22  ;;  %v9171_v26 = vld [vmem:[%s11393_s5] ss:$0 sm:$0xff] }
 0xe8b   :  { %8177 = vmatmul.mubr.msk.f32.gmra.mxu1 %vm248_vm4, %v1786_v17  ;;  %8236 = vmatprep.subr.mxu1 %v9227_v48  ;;  %v2036_v9 = vmul.f32 %v9170_v19, %v2033_v23 }
 0xe8c   :  { %v8963_v25 = vpop.eup %8962  ;;  %v2035_v32 = vmul.f32 %v9170_v19, %v2032_v1  ;;  %8212 = vmatprep.mubr.msk.f32.mxu1 %vm9228_vm5, %v9227_v48 }
 0xe8d   :  { %v2034_v13 = vmul.f32 %v8963_v25, %v9840_v33  ;;  %v2039_v29 = vadd.f32 %v9171_v26, %v2036_v9  ;;  %v9918_v33 = vld [vmem:[%s11402_s14 + $0x38] sm:$0xff]  ;;  %v9173_v25 = vld [vmem:[%s11396_s8] sm:$0xff] }
 0xe8e   :  { %v2038_v20 = vadd.f32 %v9171_v26, %v2035_v32  ;;  %8180 = vmatpush3.msra.mxu0 %v9918_v33 }
 0xe8f   :  { %v2037_v34 = vmul.f32 %v9170_v19, %v2034_v13  ;;  %8181 = vmatprep.subr.mxu0 %v9227_v48 }
 0xe90   :  { %8213 = vmatmul.mubr.msk.f32.vlgmr.msra.gmra.mxu1 %vm248_vm4, %v2038_v20  ;;  %8182 = vmatpush3.msra.mxu0 %v9925_v36 }
 0xe91   :  { %8215 = vmatprep.mubr.msk.f32.mxu1 %vm9228_vm5, %v9227_v48  ;;  %v2040_v35 = vadd.f32 %v9171_v26, %v2037_v34  ;;  %8183 = vmatprep.subr.mxu0 %v9227_v48 }
 0xe92   :  { %8184 = vmatpush3.msra.mxu0 %v9932_v37 }
 0xe93   :  { %8185 = vmatprep.subr.mxu0 %v9227_v48 }
 0xe94   :  { %8216 = vmatmul.mubr.msk.f32.gmra.mxu1 %vm248_vm4, %v2039_v29  ;;  %8186 = vmatpush3.msra.mxu0 %v9939_v38 }
 0xe95   :  { %8218 = vmatprep.mubr.msk.f32.mxu1 %vm9228_vm5, %v9227_v48  ;;  %8187 = vmatprep.subr.mxu0 %v9227_v48 }
 0xe96   :  { %8188 = vmatpush3.msra.mxu0 %v9946_v39 }
 0xe97   :  { %8189 = vmatprep.subr.mxu0 %v9227_v48 }
 0xe98   :  { %8219 = vmatmul.mubr.msk.f32.gmra.mxu1 %vm248_vm4, %v2040_v35  ;;  %8190 = vmatpush3.msra.mxu0 %v9953_v40 }
 0xe99   :  { %8242 = vmatprep.mubr.msk.f32.mxu1 %vm9228_vm5, %v9227_v48  ;;  %8191 = vmatprep.subr.mxu0 %v9227_v48 }
 0xe9a   :  { %8192 = vmatpush3.msra.mxu0 %v9960_v41 }
 0xe9b   :  { %8193 = vmatprep.subr.mxu0 %v9227_v48 }
 0xe9c   :  { %8194 = vmatpush3.msra.mxu0 %v9967_v43 }
 0xe9d   :  { %8221 = vmatprep.subr.mxu0 %v9227_v48 }
 0xf43   :  { %v1868_v45 = vpop.f32.mrf.mxu1 }
 0xf44   :  { %v1869_v47 = vadd.f32 %v7355_v44, %v1868_v45 }
 0xf45   :  { %v8172_v49 = vpop.f32.mrf.mxu1 }
 0xf46   :  { %v1886_v50 = vmul.f32 0.70710677, %v1869_v47  ;;  %v1882_v30 = vmul.f32 0.5, %v1869_v47 }
 0xf47   :  { %v1873_v51 = vpop.f32.mrf.mxu1 }
 0xf48   :  { %8964 = verf.f32 %v1886_v50  ;;  %v1874_v52 = vadd.f32 %v7355_v44, %v1873_v51 }
 0xf49   :  { %v8175_v54 = vpop.f32.mrf.mxu1 }
 0xf4a   :  { %v1887_v55 = vmul.f32 0.70710677, %v1874_v52  ;;  %v1883_v15 = vmul.f32 0.5, %v1874_v52 }
 0xf4b   :  { %v1878_v57 = vpop.f32.mrf.mxu1 }
 0xf4c   :  { %8966 = verf.f32 %v1887_v55  ;;  %v1879_v58 = vadd.f32 %v7355_v44, %v1878_v57 }
 0xf4d   :  { %v8178_v14 = vpop.f32.mrf.mxu1 }
 0xf4e   :  { %v1888_v18 = vmul.f32 0.70710677, %v1879_v58  ;;  %v1884_v46 = vmul.f32 0.5, %v1879_v58 }
 0xf50   :  { %8968 = verf.f32 %v1888_v18  ;;  %v2116_v59 = vpop.f32.mrf.mxu1 }
 0xf51   :  { %v9988_v12 = vadd.f32 %v9172_v62, %v2116_v59 }
 0xf52   :  { %v8214_v60 = vpop.f32.mrf.mxu1 }
 0xf53   :  { %v10004_v23 = vmul.f32 0.35355338, %v9988_v12 }
 0xf54   :  { %v2121_v28 = vpop.f32.mrf.mxu1 }
 0xf55   :  { %v8965_v61 = vpop.eup %8964  ;;  %v9977_v2 = vadd.f32 %v9172_v62, %v2121_v28 }
 0xf56   :  { %v1892_v4 = vadd.f32 1.0, %v8965_v61  ;;  %v8217_v5 = vpop.f32.mrf.mxu1 }
 0xf57   :  { %2138 = vrot.lane.b32.xlu0 %v9977_v2, %s11434_s26  ;;  %v10015_v19 = vmul.f32 0.35355338, %v9977_v2 }
 0xf58   :  { %v1895_v24 = vmul.f32 %v1892_v4, %v1882_v30  ;;  %v2126_v42 = vpop.f32.mrf.mxu1 }
 0xf59   :  { %v8967_v27 = vpop.eup %8966  ;;  %v9981_v8 = vadd.f32 %v9172_v62, %v2126_v42 }
 0xf5a   :  { %v1893_v7 = vadd.f32 1.0, %v8967_v27  ;;  %v8220_v10 = vpop.f32.mrf.mxu1  ;;  %8196 = vmatmul.mubr.msk.f32.vlgmr.msra.gmra.mxu0 %vm85_vm0, %v1895_v24 }
 0xf5b   :  { %2140 = vrot.lane.b32.xlu1 %v9981_v8, %s11434_s26  ;;  %8198 = vmatprep.mubr.msk.f32.mxu0 %vm9228_vm5, %v9227_v48  ;;  %v10023_v32 = vmul.f32 0.35355338, %v9981_v8 }
 0xf5c   :  { %v1896_v0 = vmul.f32 %v1893_v7, %v1883_v15 }
 0xf5d   :  { %v8969_v11 = vpop.eup %8968 }
 0xf5e   :  { %v1894_v6 = vadd.f32 1.0, %v8969_v11  ;;  %8199 = vmatmul.mubr.msk.f32.gmra.mxu0 %vm85_vm0, %v1896_v0 }
 0xf5f   :  { %2136 = vrot.lane.b32.xlu1 %v9988_v12, %s11434_s26  ;;  %8201 = vmatprep.mubr.msk.f32.mxu0 %vm9228_vm5, %v9227_v48 }
 0xf60   :  { %v1897_v31 = vmul.f32 %v1894_v6, %v1884_v46 }
 0xf62   :  { %8202 = vmatmul.mubr.msk.f32.gmra.mxu0 %vm85_vm0, %v1897_v31 }
 0xf63   :  { %8227 = vmatprep.mubr.msk.f32.mxu0 %vm9228_vm5, %v9227_v48 }
 0xfc9   :  { %v2139_v1 = vpop.permute.xlu0 %2138 }
 0xfcd   :  { %v2141_v17 = vpop.permute.xlu1 %2140 }
 0xfce   :  { %8222 = vmatpush3.xpose.msk.msra.mxu0 %vm415_vm6, %v2141_v17 }
 0xfcf   :  { %8223 = vmatprep.subr.mxu0 %v9227_v48 }
 0xfd1   :  { %v2137_v22 = vpop.permute.xlu1 %2136 }
 0xfd2   :  { %8224 = vmatpush3.xpose.msk.msra.mxu0 %vm415_vm6, %v2139_v1 }
 0xfd3   :  { %8225 = vmatprep.subr.mxu0 %v9227_v48 }
 0xfd6   :  { %8226 = vmatpush3.xpose.msk.msra.mxu0 %vm415_vm6, %v2137_v22 }
 0xfd7   :  { %8251 = vmatprep.subr.mxu0 %v9227_v48 }
 0xfd9   :  { %8228 = vmatmul.mubr.msk.f32.vlgmr.msra.gmra.mxu0 %vm415_vm6, %v10004_v23 }
 0xfda   :  { %8230 = vmatprep.mubr.msk.f32.mxu0 %vm9228_vm5, %v9227_v48  ;;  %8252 = vmatpush3.msra.mxu0 %v9173_v25 }
 0xfdb   :  { %8277 = vmatprep.subr.mxu0 %v9227_v48 }
 0xfdd   :  { %8231 = vmatmul.mubr.msk.f32.gmra.mxu0 %vm415_vm6, %v10015_v19 }
 0xfde   :  { %8233 = vmatprep.mubr.msk.f32.mxu0 %vm9228_vm5, %v9227_v48 }
 0xfe1   :  { %8234 = vmatmul.mubr.msk.f32.gmra.mxu0 %vm415_vm6, %v10023_v32 }
 0xfe2   :  { %8253 = vmatprep.mubr.msk.f32.mxu0 %vm9228_vm5, %v9227_v48 }
0x101a   :  { %v10029_v26 = vpop.f32.mrf.mxu0 }
0x101c   :  { %v8197_v20 = vpop.f32.mrf.mxu0 }
0x101e   :  { %v10031_v9 = vpop.f32.mrf.mxu0 }
0x1020   :  { %v8200_v13 = vpop.f32.mrf.mxu0 }
0x1022   :  { %v10033_v29 = vpop.f32.mrf.mxu0 }
0x1024   :  { %v8203_v34 = vpop.f32.mrf.mxu0 }
0x1099   :  { %v2223_v35 = vpop.f32.mrf.mxu0 }
0x109a   :  { %v2237_v44 = vsel %vm511_vm7, %v2223_v35, -inf }
0x109b   :  { %2238 = vmax.xlane.f32.xlu1 %v2237_v44  ;;  %v8229_v45 = vpop.f32.mrf.mxu0 }
0x109d   :  { %v2228_v47 = vpop.f32.mrf.mxu0 }
0x109e   :  { %v2240_v49 = vsel %vm511_vm7, %v2228_v47, -inf }
0x109f   :  { %2241 = vmax.xlane.f32.xlu0 %v2240_v49  ;;  %v8232_v50 = vpop.f32.mrf.mxu0 }
0x10a1   :  { %v2233_v51 = vpop.f32.mrf.mxu0 }
0x10a2   :  { %v2243_v52 = vsel %vm518_vm8, %v2233_v51, -inf }
0x10a3   :  { %2244 = vmax.xlane.f32.xlu0 %v2243_v52  ;;  %v8235_v54 = vpop.f32.mrf.mxu0 }
0x10ac   :  { %2272 = vrot.lane.b32.xlu1 %v9977_v2, %s11432_s27 }
0x10b0   :  { %2270 = vrot.lane.b32.xlu1 %v9988_v12, %s11432_s27 }
0x10b4   :  { %2471 = vrot.lane.b32.xlu1 %v9981_v8, %s11430_s4 }
0x10b9   :  { %2274 = vrot.lane.b32.xlu0 %v9981_v8, %s11432_s27 }
0x1124   :  { %v2239_v55 = vpop.xlane.xlu1 %2238 }
0x1125   :  { %v2246_v57 = vsub.f32 %v2223_v35, %v2239_v55  ;;  %v9174_v35 = vld [vmem:[%s11396_s8 + $0x8] sm:$0xff] }
0x1127   :  { %v2249_v58 = vmul.f32 1.442695, %v2246_v57 }
0x1128   :  { %v2242_v14 = vpop.xlane.xlu0 %2241  ;;  %v2273_v28 = vpop.permute.xlu1 %2272 }
0x1129   :  { %8970 = vpow2.f32 %v2249_v58  ;;  %v2247_v18 = vsub.f32 %v2228_v47, %v2242_v14 }
0x112b   :  { %v2251_v59 = vmul.f32 1.442695, %v2247_v18 }
0x112c   :  { %v2245_v60 = vpop.xlane.xlu0 %2244  ;;  %v2271_v62 = vpop.permute.xlu1 %2270 }
0x112d   :  { %8972 = vpow2.f32 %v2251_v59  ;;  %v2248_v42 = vsub.f32 %v2233_v51, %v2245_v60 }
0x112f   :  { %v2253_v27 = vmul.f32 1.442695, %v2248_v42 }
0x1130   :  { %v2275_v61 = vpop.permute.xlu0 %2274  ;;  %v2472_v10 = vpop.permute.xlu1 %2471 }
0x1131   :  { %8237 = vmatpush3.msk.msra.mxu1 %vm201_vm3, %v2275_v61  ;;  %8974 = vpow2.f32 %v2253_v27 }
0x1132   :  { %8238 = vmatprep.subr.mxu1 %v9227_v48 }
0x1133   :  { %8239 = vmatpush3.msra.mxu1 %v2273_v28 }
0x1134   :  { %8240 = vmatprep.subr.mxu1 %v9227_v48 }
0x1135   :  { %8241 = vmatpush3.msra.mxu1 %v2271_v62 }
0x1136   :  { %v8971_v30 = vpop.eup %8970  ;;  %8262 = vmatprep.subr.mxu1 %v9227_v48 }
0x1137   :  { %v2255_v4 = vsel %vm511_vm7, %v8971_v30, 0.0 }
0x1138   :  { %2256 = vadd.xlane.f32.xlu1 %v2255_v4 }
0x113a   :  { %v8973_v5 = vpop.eup %8972 }
0x113b   :  { %v2258_v24 = vsel %vm511_vm7, %v8973_v5, 0.0 }
0x113c   :  { %2259 = vadd.xlane.f32.xlu0 %v2258_v24 }
0x113e   :  { %v8975_v15 = vpop.eup %8974 }
0x113f   :  { %v2261_v7 = vsel %vm518_vm8, %v8975_v15, 0.0 }
0x1149   :  { %2467 = vrot.lane.b32.xlu1 %v9988_v12, %s11430_s4 }
0x1152   :  { %2469 = vrot.lane.b32.xlu0 %v9977_v2, %s11430_s4  ;;  %s11456_s4 = smov 112  }
0x1156   :  { %2461 = vrot.lane.b32.xlu0 %v10004_v23, %s11428_s21 }
0x115a   :  { %2465 = vrot.lane.b32.xlu0 %v10023_v32, %s11428_s21 }
0x116d   :  { %2262 = vadd.xlane.f32.xlu1 %v2261_v7 }
0x117e   :  { %2463 = vrot.lane.b32.xlu1 %v10015_v19, %s11428_s21 }
0x11c1   :  { %v2257_v0 = vpop.xlane.xlu1 %2256 }
0x11c2   :  { %8976 = vrcp.f32 %v2257_v0 }
0x11c5   :  { %v2260_v11 = vpop.xlane.xlu0 %2259  ;;  %v2468_v22 = vpop.permute.xlu1 %2467 }
0x11c6   :  { %8978 = vrcp.f32 %v2260_v11 }
0x11c9   :  { %v2470_v1 = vpop.permute.xlu0 %2469 }
0x11cd   :  { %v2462_v34 = vpop.permute.xlu0 %2461 }
0x11cf   :  { %v8977_v46 = vpop.eup %8976 }
0x11d0   :  { %v2267_v6 = vmul.f32 %v8977_v46, %v8971_v30 }
0x11d1   :  { %v2466_v45 = vpop.permute.xlu0 %2465 }
0x11d2   :  { %8243 = vmatmul.mubr.msk.f32.vlgmr.msra.gmra.mxu1 %vm511_vm7, %v2267_v6 }
0x11d3   :  { %v8979_v31 = vpop.eup %8978  ;;  %8263 = vmatpush3.xpose.msk.msra.mxu1 %vm415_vm6, %v2472_v10  ;;  %8245 = vmatprep.mubr.msk.f32.mxu1 %vm9228_vm5, %v9227_v48 }
0x11d4   :  { %8264 = vmatprep.subr.mxu1 %v9227_v48  ;;  %v2268_v17 = vmul.f32 %v8979_v31, %v8973_v5 }
0x11d6   :  { %8246 = vmatmul.mubr.msk.f32.gmra.mxu1 %vm511_vm7, %v2268_v17 }
0x11d7   :  { %8265 = vmatpush3.xpose.msk.msra.mxu1 %vm415_vm6, %v2470_v1  ;;  %8248 = vmatprep.mubr.msk.f32.mxu1 %vm9228_vm5, %v9227_v48 }
0x11d8   :  { %8266 = vmatprep.subr.mxu1 %v9227_v48 }
0x11db   :  { %8267 = vmatpush3.xpose.msk.msra.mxu1 %vm415_vm6, %v2468_v22 }
0x11dc   :  { %8292 = vmatprep.subr.mxu1 %v9227_v48 }
0x11f6   :  { %v2263_v25 = vpop.xlane.xlu1 %2262 }
0x11f7   :  { %8980 = vrcp.f32 %v2263_v25 }
0x11fa   :  { %v2464_v44 = vpop.permute.xlu1 %2463 }
0x1204   :  { %v8981_v20 = vpop.eup %8980 }
0x1205   :  { %v2269_v13 = vmul.f32 %v8981_v20, %v8975_v15 }
0x1207   :  { %8249 = vmatmul.mubr.msk.f32.gmra.mxu1 %vm511_vm7, %v2269_v13 }
0x1208   :  { %8268 = vmatprep.mubr.msk.f32.mxu1 %vm9228_vm5, %v9227_v48 }
0x120b   :  { %8269 = vmatmul.mubr.msk.f32.vlgmr.msra.gmra.mxu1 %vm415_vm6, %v2462_v34 }
0x120c   :  { %8271 = vmatprep.mubr.msk.f32.mxu1 %vm9228_vm5, %v9227_v48  ;;  %8293 = vmatpush3.msra.mxu1 %v9174_v35 }
0x120d   :  { %8318 = vmatprep.subr.mxu1 %v9227_v48 }
0x120f   :  { %8272 = vmatmul.mubr.msk.f32.gmra.mxu1 %vm415_vm6, %v2464_v44 }
0x1210   :  { %8274 = vmatprep.mubr.msk.f32.mxu1 %vm9228_vm5, %v9227_v48 }
0x1213   :  { %8275 = vmatmul.mubr.msk.f32.gmra.mxu1 %vm415_vm6, %v2466_v45 }
0x1214   :  { %8294 = vmatprep.mubr.msk.f32.mxu1 %vm9228_vm5, %v9227_v48 }
0x1292   :  { %v2355_v47 = vpop.f32.mrf.mxu1 }
0x1293   :  { %8254 = vmatmul.mubr.msk.f32.vlgmr.msra.gmra.mxu0 %vm415_vm6, %v2355_v47 }
0x1294   :  { %v8244_v49 = vpop.f32.mrf.mxu1  ;;  %8256 = vmatprep.mubr.msk.f32.mxu0 %vm9228_vm5, %v9227_v48 }
0x1296   :  { %v2360_v50 = vpop.f32.mrf.mxu1 }
0x1297   :  { %8257 = vmatmul.mubr.msk.f32.gmra.mxu0 %vm415_vm6, %v2360_v50 }
0x1298   :  { %v8247_v51 = vpop.f32.mrf.mxu1  ;;  %8259 = vmatprep.mubr.msk.f32.mxu0 %vm9228_vm5, %v9227_v48 }
0x12c7   :  { %v2365_v52 = vpop.f32.mrf.mxu1 }
0x12c8   :  { %8260 = vmatmul.mubr.msk.f32.gmra.mxu0 %vm415_vm6, %v2365_v52 }
0x12c9   :  { %v8250_v54 = vpop.f32.mrf.mxu1  ;;  %8283 = vmatprep.mubr.msk.f32.mxu0 %vm9228_vm5, %v9227_v48 }
0x12cb   :  { %v2551_v55 = vpop.f32.mrf.mxu1 }
0x12cc   :  { %v2565_v57 = vsel %vm511_vm7, %v2551_v55, -inf }
0x12cd   :  { %2566 = vmax.xlane.f32.xlu1 %v2565_v57  ;;  %v8270_v58 = vpop.f32.mrf.mxu1 }
0x12cf   :  { %v2556_v14 = vpop.f32.mrf.mxu1 }
0x12d0   :  { %v2568_v18 = vsel %vm511_vm7, %v2556_v14, -inf }
0x12d1   :  { %2569 = vmax.xlane.f32.xlu0 %v2568_v18  ;;  %v8273_v59 = vpop.f32.mrf.mxu1 }
0x12d3   :  { %v2561_v60 = vpop.f32.mrf.mxu1 }
0x12d4   :  { %v2571_v28 = vsel %vm518_vm8, %v2561_v60, -inf }
0x12d5   :  { %2572 = vmax.xlane.f32.xlu0 %v2571_v28  ;;  %v8276_v61 = vpop.f32.mrf.mxu1 }
0x12de   :  { %2602 = vrot.lane.b32.xlu1 %v9981_v8, %s11426_s25 }
0x12e2   :  { %2598 = vrot.lane.b32.xlu1 %v9988_v12, %s11426_s25 }
0x12e6   :  { %2799 = vrot.lane.b32.xlu1 %v9981_v8, %s11424_s3 }
0x12ea   :  { %2797 = vrot.lane.b32.xlu1 %v9977_v2, %s11424_s3 }
0x1353   :  { %v10111_v62 = vpop.f32.mrf.mxu0 }
0x1355   :  { %v8255_v30 = vpop.f32.mrf.mxu0 }
0x1356   :  { %v2567_v4 = vpop.xlane.xlu1 %2566 }
0x1357   :  { %v2574_v5 = vsub.f32 %v2551_v55, %v2567_v4  ;;  %v10113_v24 = vpop.f32.mrf.mxu0 }
0x1359   :  { %v2577_v42 = vmul.f32 1.442695, %v2574_v5  ;;  %v8258_v27 = vpop.f32.mrf.mxu0 }
0x135a   :  { %v2603_v15 = vpop.permute.xlu1 %2602  ;;  %v2570_v7 = vpop.xlane.xlu0 %2569 }
0x135b   :  { %8982 = vpow2.f32 %v2577_v42  ;;  %v2575_v10 = vsub.f32 %v2556_v14, %v2570_v7  ;;  %8278 = vmatpush3.msk.msra.mxu0 %vm201_vm3, %v2603_v15 }
0x135c   :  { %8279 = vmatprep.subr.mxu0 %v9227_v48 }
0x135d   :  { %v2579_v0 = vmul.f32 1.442695, %v2575_v10 }
0x135e   :  { %v2573_v17 = vpop.xlane.xlu0 %2572  ;;  %v2599_v35 = vpop.permute.xlu1 %2598 }
0x135f   :  { %8984 = vpow2.f32 %v2579_v0  ;;  %v2576_v1 = vsub.f32 %v2561_v60, %v2573_v17  ;;  %v9175_v60 = vld [vmem:[%s11396_s8 + $0x10] sm:$0xff] }
0x1361   :  { %v2581_v25 = vmul.f32 1.442695, %v2576_v1 }
0x1362   :  { %v2800_v44 = vpop.permute.xlu1 %2799 }
0x1363   :  { %8986 = vpow2.f32 %v2581_v25  ;;  %v9176_v25 = vld [vmem:[%s11397_s9] ss:$0 sm:$0xff] }
0x1366   :  { %v2798_v45 = vpop.permute.xlu1 %2797 }
0x1368   :  { %v8983_v11 = vpop.eup %8982 }
0x1369   :  { %v2583_v46 = vsel %vm511_vm7, %v8983_v11, 0.0 }
0x136a   :  { %2584 = vadd.xlane.f32.xlu0 %v2583_v46 }
0x136c   :  { %v8985_v6 = vpop.eup %8984 }
0x136d   :  { %v2586_v31 = vsel %vm511_vm7, %v8985_v6, 0.0 }
0x136e   :  { %2587 = vadd.xlane.f32.xlu1 %v2586_v31 }
0x1370   :  { %v8987_v13 = vpop.eup %8986 }
0x1371   :  { %v2589_v34 = vsel %vm518_vm8, %v8987_v13, 0.0 }
0x137f   :  { %2789 = vrot.lane.b32.xlu1 %v10004_v23, %s11422_s30 }
0x1380   :  { %2600 = vrot.lane.b32.xlu0 %v9977_v2, %s11426_s25  ;;  %s11452_s25 = smov 88  }
0x1383   :  { %2793 = vrot.lane.b32.xlu1 %v10023_v32, %s11422_s30 }
0x1388   :  { %v10125_v22 = vpop.f32.mrf.mxu0 }
0x138a   :  { %v8261_v20 = vpop.f32.mrf.mxu0 }
0x138b   :  { %v2458_v20 = vadd.f32 %v9176_v25, %v10111_v62 }
0x139f   :  { %2590 = vadd.xlane.f32.xlu0 %v2589_v34 }
0x13b5   :  { %2795 = vrot.lane.b32.xlu0 %v9988_v12, %s11424_s3 }
0x13b9   :  { %2791 = vrot.lane.b32.xlu0 %v10015_v19, %s11422_s30  ;;  %s11453_s30 = smov 120  }
0x13f3   :  { %v2585_v47 = vpop.xlane.xlu0 %2584 }
0x13f4   :  { %8988 = vrcp.f32 %v2585_v47 }
0x13f7   :  { %v2588_v49 = vpop.xlane.xlu1 %2587  ;;  %v2601_v50 = vpop.permute.xlu0 %2600 }
0x13f8   :  { %8990 = vrcp.f32 %v2588_v49  ;;  %8280 = vmatpush3.msra.mxu0 %v2601_v50 }
0x13f9   :  { %8281 = vmatprep.subr.mxu0 %v9227_v48 }
0x13fa   :  { %8282 = vmatpush3.msra.mxu0 %v2599_v35 }
0x13fb   :  { %8303 = vmatprep.subr.mxu0 %v9227_v48  ;;  %v2790_v59 = vpop.permute.xlu1 %2789 }
0x13ff   :  { %v2794_v61 = vpop.permute.xlu1 %2793 }
0x1401   :  { %v8989_v51 = vpop.eup %8988 }
0x1402   :  { %v2595_v52 = vmul.f32 %v8989_v51, %v8983_v11 }
0x1404   :  { %8284 = vmatmul.mubr.msk.f32.vlgmr.msra.gmra.mxu0 %vm511_vm7, %v2595_v52 }
0x1405   :  { %v8991_v54 = vpop.eup %8990  ;;  %8304 = vmatpush3.xpose.msk.msra.mxu0 %vm415_vm6, %v2800_v44  ;;  %8286 = vmatprep.mubr.msk.f32.mxu0 %vm9228_vm5, %v9227_v48  ;;  %v2459_v44 = vadd.f32 %v9176_v25, %v10113_v24 }
0x1406   :  { %8305 = vmatprep.subr.mxu0 %v9227_v48  ;;  %v2596_v55 = vmul.f32 %v8991_v54, %v8985_v6 }
0x1408   :  { %8287 = vmatmul.mubr.msk.f32.gmra.mxu0 %vm511_vm7, %v2596_v55 }
0x1409   :  { %8306 = vmatpush3.xpose.msk.msra.mxu0 %vm415_vm6, %v2798_v45  ;;  %8289 = vmatprep.mubr.msk.f32.mxu0 %vm9228_vm5, %v9227_v48 }
0x140a   :  { %8307 = vmatprep.subr.mxu0 %v9227_v48 }
0x1428   :  { %v2591_v57 = vpop.xlane.xlu0 %2590 }
0x1429   :  { %8992 = vrcp.f32 %v2591_v57 }
0x142c   :  { %v2796_v58 = vpop.permute.xlu0 %2795 }
0x142d   :  { %8308 = vmatpush3.xpose.msk.msra.mxu0 %vm415_vm6, %v2796_v58 }
0x142e   :  { %8333 = vmatprep.subr.mxu0 %v9227_v48 }
0x1430   :  { %v2792_v28 = vpop.permute.xlu0 %2791 }
0x1436   :  { %v8993_v14 = vpop.eup %8992 }
0x1437   :  { %v2597_v18 = vmul.f32 %v8993_v14, %v8987_v13 }
0x1439   :  { %8290 = vmatmul.mubr.msk.f32.gmra.mxu0 %vm511_vm7, %v2597_v18 }
0x143a   :  { %8309 = vmatprep.mubr.msk.f32.mxu0 %vm9228_vm5, %v9227_v48 }
0x143d   :  { %8310 = vmatmul.mubr.msk.f32.vlgmr.msra.gmra.mxu0 %vm415_vm6, %v2790_v59 }
0x143e   :  { %8312 = vmatprep.mubr.msk.f32.mxu0 %vm9228_vm5, %v9227_v48  ;;  %8334 = vmatpush3.msra.mxu0 %v9175_v60 }
0x143f   :  { %8359 = vmatprep.subr.mxu0 %v9227_v48 }
0x1441   :  { %8313 = vmatmul.mubr.msk.f32.gmra.mxu0 %vm415_vm6, %v2792_v28 }
0x1442   :  { %8315 = vmatprep.mubr.msk.f32.mxu0 %vm9228_vm5, %v9227_v48 }
0x1445   :  { %8316 = vmatmul.mubr.msk.f32.gmra.mxu0 %vm415_vm6, %v2794_v61 }
0x1446   :  { %8335 = vmatprep.mubr.msk.f32.mxu0 %vm9228_vm5, %v9227_v48 }
0x14c4   :  { %v2683_v30 = vpop.f32.mrf.mxu0 }
0x14c5   :  { %8295 = vmatmul.mubr.msk.f32.vlgmr.msra.gmra.mxu1 %vm415_vm6, %v2683_v30 }
0x14c6   :  { %v8285_v4 = vpop.f32.mrf.mxu0  ;;  %8297 = vmatprep.mubr.msk.f32.mxu1 %vm9228_vm5, %v9227_v48 }
0x14c8   :  { %v2688_v5 = vpop.f32.mrf.mxu0 }
0x14c9   :  { %8298 = vmatmul.mubr.msk.f32.gmra.mxu1 %vm415_vm6, %v2688_v5 }
0x14ca   :  { %v8288_v42 = vpop.f32.mrf.mxu0  ;;  %8300 = vmatprep.mubr.msk.f32.mxu1 %vm9228_vm5, %v9227_v48 }
0x14cb   :  { %v2460_v42 = vadd.f32 %v9176_v25, %v10125_v22 }
0x14f9   :  { %v2693_v27 = vpop.f32.mrf.mxu0 }
0x14fa   :  { %8301 = vmatmul.mubr.msk.f32.gmra.mxu1 %vm415_vm6, %v2693_v27 }
0x14fb   :  { %v8291_v15 = vpop.f32.mrf.mxu0  ;;  %8324 = vmatprep.mubr.msk.f32.mxu1 %vm9228_vm5, %v9227_v48 }
0x14fd   :  { %v2879_v7 = vpop.f32.mrf.mxu0 }
0x14fe   :  { %v2893_v10 = vsel %vm511_vm7, %v2879_v7, -inf }
0x14ff   :  { %2894 = vmax.xlane.f32.xlu0 %v2893_v10  ;;  %v8311_v0 = vpop.f32.mrf.mxu0 }
0x1501   :  { %v2884_v11 = vpop.f32.mrf.mxu0 }
0x1502   :  { %v2896_v46 = vsel %vm511_vm7, %v2884_v11, -inf }
0x1503   :  { %2897 = vmax.xlane.f32.xlu1 %v2896_v46  ;;  %v8314_v6 = vpop.f32.mrf.mxu0 }
0x1505   :  { %v2889_v31 = vpop.f32.mrf.mxu0 }
0x1506   :  { %v2899_v17 = vsel %vm518_vm8, %v2889_v31, -inf }
0x1507   :  { %2900 = vmax.xlane.f32.xlu0 %v2899_v17  ;;  %v8317_v1 = vpop.f32.mrf.mxu0 }
0x1514   :  { %2928 = vrot.lane.b32.xlu1 %v9977_v2, %s11448_s22 }
0x1518   :  { %2926 = vrot.lane.b32.xlu1 %v9988_v12, %s11448_s22 }
0x151c   :  { %3127 = vrot.lane.b32.xlu1 %v9981_v8, %s11449_s28 }
0x151d   :  { %2930 = vrot.lane.b32.xlu0 %v9981_v8, %s11448_s22 }
0x1520   :  { %3123 = vrot.lane.b32.xlu1 %v9988_v12, %s11449_s28 }
0x1585   :  { %v2772_v13 = vpop.f32.mrf.mxu1 }
0x1586   :  { %v10188_v34 = vadd.f32 %v2772_v13, %v2458_v20  ;;  %v9177_v20 = vld [vmem:[%s11396_s8 + $0x18] sm:$0xff] }
0x1587   :  { %v8296_v35 = vpop.f32.mrf.mxu1 }
0x1588   :  { %v2895_v45 = vpop.xlane.xlu0 %2894 }
0x1589   :  { %v2902_v47 = vsub.f32 %v2879_v7, %v2895_v45  ;;  %v2777_v49 = vpop.f32.mrf.mxu1 }
0x158a   :  { %v10191_v50 = vadd.f32 %v2777_v49, %v2459_v44 }
0x158b   :  { %v2905_v51 = vmul.f32 1.442695, %v2902_v47  ;;  %v8299_v52 = vpop.f32.mrf.mxu1 }
0x158c   :  { %v2898_v54 = vpop.xlane.xlu1 %2897 }
0x158d   :  { %8994 = vpow2.f32 %v2905_v51  ;;  %v2903_v55 = vsub.f32 %v2884_v11, %v2898_v54 }
0x158f   :  { %v2907_v57 = vmul.f32 1.442695, %v2903_v55 }
0x1590   :  { %v2901_v58 = vpop.xlane.xlu0 %2900  ;;  %v2929_v14 = vpop.permute.xlu1 %2928 }
0x1591   :  { %8996 = vpow2.f32 %v2907_v57  ;;  %v2904_v62 = vsub.f32 %v2889_v31, %v2901_v58 }
0x1593   :  { %v2909_v18 = vmul.f32 1.442695, %v2904_v62 }
0x1594   :  { %v2931_v59 = vpop.permute.xlu0 %2930  ;;  %v2927_v24 = vpop.permute.xlu1 %2926 }
0x1595   :  { %8998 = vpow2.f32 %v2909_v18  ;;  %8319 = vmatpush3.msk.msra.mxu1 %vm201_vm3, %v2931_v59 }
0x1596   :  { %8320 = vmatprep.subr.mxu1 %v9227_v48 }
0x1597   :  { %8321 = vmatpush3.msra.mxu1 %v2929_v14 }
0x1598   :  { %8322 = vmatprep.subr.mxu1 %v9227_v48  ;;  %v3128_v10 = vpop.permute.xlu1 %3127 }
0x1599   :  { %8323 = vmatpush3.msra.mxu1 %v2927_v24 }
0x159a   :  { %v8995_v60 = vpop.eup %8994  ;;  %8344 = vmatprep.subr.mxu1 %v9227_v48 }
0x159b   :  { %v2911_v28 = vsel %vm511_vm7, %v8995_v60, 0.0 }
0x159c   :  { %2912 = vadd.xlane.f32.xlu0 %v2911_v28  ;;  %v3124_v11 = vpop.permute.xlu1 %3123 }
0x159e   :  { %v8997_v61 = vpop.eup %8996 }
0x159f   :  { %v2914_v30 = vsel %vm511_vm7, %v8997_v61, 0.0 }
0x15a0   :  { %2915 = vadd.xlane.f32.xlu0 %v2914_v30 }
0x15a2   :  { %v8999_v4 = vpop.eup %8998 }
0x15a3   :  { %v2917_v5 = vsel %vm518_vm8, %v8999_v4, 0.0 }
0x15a4   :  { %2918 = vadd.xlane.f32.xlu1 %v2917_v5 }
0x15b5   :  { %3119 = vrot.lane.b32.xlu1 %v10015_v19, %s11450_s24 }
0x15b6   :  { %3125 = vrot.lane.b32.xlu0 %v9977_v2, %s11449_s28 }
0x15ba   :  { %3117 = vrot.lane.b32.xlu0 %v10004_v23, %s11450_s24  ;;  %v2782_v27 = vpop.f32.mrf.mxu1 }
0x15bb   :  { %v10207_v15 = vadd.f32 %v2782_v27, %v2460_v42 }
0x15bc   :  { %v8302_v7 = vpop.f32.mrf.mxu1 }
0x15be   :  { %3121 = vrot.lane.b32.xlu0 %v10023_v32, %s11450_s24 }
0x1625   :  { %v2913_v0 = vpop.xlane.xlu0 %2912 }
0x1626   :  { %9000 = vrcp.f32 %v2913_v0 }
0x1629   :  { %v2916_v19 = vpop.xlane.xlu0 %2915 }
0x162a   :  { %9002 = vrcp.f32 %v2916_v19 }
0x162d   :  { %v2919_v46 = vpop.xlane.xlu1 %2918  ;;  %v3126_v31 = vpop.permute.xlu0 %3125 }
0x162e   :  { %9004 = vrcp.f32 %v2919_v46 }
0x1631   :  { %v3118_v25 = vpop.permute.xlu0 %3117  ;;  %v3120_v13 = vpop.permute.xlu1 %3119 }
0x1633   :  { %v9001_v6 = vpop.eup %9000 }
0x1634   :  { %v2923_v22 = vmul.f32 %v9001_v6, %v8995_v60 }
0x1635   :  { %v3122_v35 = vpop.permute.xlu0 %3121 }
0x1636   :  { %8325 = vmatmul.mubr.msk.f32.vlgmr.msra.gmra.mxu1 %vm511_vm7, %v2923_v22 }
0x1637   :  { %v9003_v23 = vpop.eup %9002  ;;  %8345 = vmatpush3.xpose.msk.msra.mxu1 %vm415_vm6, %v3128_v10  ;;  %8327 = vmatprep.mubr.msk.f32.mxu1 %vm9228_vm5, %v9227_v48 }
0x1638   :  { %8346 = vmatprep.subr.mxu1 %v9227_v48  ;;  %v2924_v32 = vmul.f32 %v9003_v23, %v8997_v61 }
0x163a   :  { %8328 = vmatmul.mubr.msk.f32.gmra.mxu1 %vm511_vm7, %v2924_v32 }
0x163b   :  { %v9005_v17 = vpop.eup %9004  ;;  %8347 = vmatpush3.xpose.msk.msra.mxu1 %vm415_vm6, %v3126_v31  ;;  %8330 = vmatprep.mubr.msk.f32.mxu1 %vm9228_vm5, %v9227_v48 }
0x163c   :  { %8348 = vmatprep.subr.mxu1 %v9227_v48  ;;  %v2925_v1 = vmul.f32 %v9005_v17, %v8999_v4 }
0x163e   :  { %8331 = vmatmul.mubr.msk.f32.gmra.mxu1 %vm511_vm7, %v2925_v1 }
0x163f   :  { %8349 = vmatpush3.xpose.msk.msra.mxu1 %vm415_vm6, %v3124_v11  ;;  %8350 = vmatprep.mubr.msk.f32.mxu1 %vm9228_vm5, %v9227_v48 }
0x1640   :  { %8374 = vmatprep.subr.mxu1 %v9227_v48 }
0x1642   :  { %8351 = vmatmul.mubr.msk.f32.vlgmr.msra.gmra.mxu1 %vm415_vm6, %v3118_v25 }
0x1643   :  { %8353 = vmatprep.mubr.msk.f32.mxu1 %vm9228_vm5, %v9227_v48  ;;  %8375 = vmatpush3.msra.mxu1 %v9177_v20 }
0x1644   :  { %8402 = vmatprep.subr.mxu1 %v9227_v48 }
0x1646   :  { %8354 = vmatmul.mubr.msk.f32.gmra.mxu1 %vm415_vm6, %v3120_v13 }
0x1647   :  { %8356 = vmatprep.mubr.msk.f32.mxu1 %vm9228_vm5, %v9227_v48 }
0x164a   :  { %8357 = vmatmul.mubr.msk.f32.gmra.mxu1 %vm415_vm6, %v3122_v35 }
0x164b   :  { %8376 = vmatprep.mubr.msk.f32.mxu1 %vm9228_vm5, %v9227_v48 }
0x16f6   :  { %v3011_v44 = vpop.f32.mrf.mxu1 }
0x16f7   :  { %8336 = vmatmul.mubr.msk.f32.vlgmr.msra.gmra.mxu0 %vm415_vm6, %v3011_v44 }
0x16f8   :  { %v8326_v45 = vpop.f32.mrf.mxu1  ;;  %8338 = vmatprep.mubr.msk.f32.mxu0 %vm9228_vm5, %v9227_v48 }
0x16fa   :  { %v3016_v47 = vpop.f32.mrf.mxu1 }
0x16fb   :  { %8339 = vmatmul.mubr.msk.f32.gmra.mxu0 %vm415_vm6, %v3016_v47 }
0x16fc   :  { %v8329_v49 = vpop.f32.mrf.mxu1  ;;  %8341 = vmatprep.mubr.msk.f32.mxu0 %vm9228_vm5, %v9227_v48 }
0x16fe   :  { %v3021_v51 = vpop.f32.mrf.mxu1 }
0x16ff   :  { %8342 = vmatmul.mubr.msk.f32.gmra.mxu0 %vm415_vm6, %v3021_v51  ;;  %v9179_v51 = vld [vmem:[%s11400_s12 + $0x10] sm:$0xff] }
0x1700   :  { %v8332_v52 = vpop.f32.mrf.mxu1  ;;  %8365 = vmatprep.mubr.msk.f32.mxu0 %vm9228_vm5, %v9227_v48 }
0x1702   :  { %v3207_v54 = vpop.f32.mrf.mxu1 }
0x1703   :  { %v3221_v55 = vsel %vm511_vm7, %v3207_v54, -inf }
0x1704   :  { %3222 = vmax.xlane.f32.xlu1 %v3221_v55  ;;  %v8352_v57 = vpop.f32.mrf.mxu1 }
0x1705   :  { %v9181_v57 = vld [vmem:[%s11400_s12] sm:$0xff] }
0x1706   :  { %v3212_v58 = vpop.f32.mrf.mxu1 }
0x1707   :  { %v3224_v62 = vsel %vm511_vm7, %v3212_v58, -inf }
0x1708   :  { %3225 = vmax.xlane.f32.xlu0 %v3224_v62  ;;  %v8355_v14 = vpop.f32.mrf.mxu1 }
0x170a   :  { %v3217_v18 = vpop.f32.mrf.mxu1 }
0x170b   :  { %v3227_v59 = vsel %vm518_vm8, %v3217_v18, -inf }
0x170c   :  { %3228 = vmax.xlane.f32.xlu0 %v3227_v59  ;;  %v8358_v24 = vpop.f32.mrf.mxu1 }
0x1715   :  { %3258 = vrot.lane.b32.xlu1 %v9981_v8, %s11451_s2 }
0x178d   :  { %v3223_v60 = vpop.xlane.xlu1 %3222 }
0x178e   :  { %v3230_v28 = vsub.f32 %v3207_v54, %v3223_v60  ;;  %v9180_v54 = vld [vmem:[%s11400_s12 + $0x8] sm:$0xff] }
0x1790   :  { %v3233_v61 = vmul.f32 1.442695, %v3230_v28 }
0x1791   :  { %v3259_v30 = vpop.permute.xlu1 %3258  ;;  %v3226_v4 = vpop.xlane.xlu0 %3225 }
0x1792   :  { %9006 = vpow2.f32 %v3233_v61  ;;  %v3231_v5 = vsub.f32 %v3212_v58, %v3226_v4  ;;  %8360 = vmatpush3.msk.msra.mxu0 %vm201_vm3, %v3259_v30 }
0x1793   :  { %8361 = vmatprep.subr.mxu0 %v9227_v48 }
0x1794   :  { %v3235_v42 = vmul.f32 1.442695, %v3231_v5 }
0x1795   :  { %v3229_v27 = vpop.xlane.xlu0 %3228 }
0x1796   :  { %9008 = vpow2.f32 %v3235_v42  ;;  %v3232_v7 = vsub.f32 %v3217_v18, %v3229_v27 }
0x1798   :  { %v3237_v10 = vmul.f32 1.442695, %v3232_v7 }
0x179a   :  { %9010 = vpow2.f32 %v3237_v10 }
0x179f   :  { %v9007_v0 = vpop.eup %9006 }
0x17a0   :  { %v3239_v8 = vsel %vm511_vm7, %v9007_v0, 0.0 }
0x17a1   :  { %3240 = vadd.xlane.f32.xlu0 %v3239_v8 }
0x17a3   :  { %v9009_v11 = vpop.eup %9008 }
0x17a4   :  { %v3242_v19 = vsel %vm511_vm7, %v9009_v11, 0.0 }
0x17a5   :  { %3243 = vadd.xlane.f32.xlu1 %v3242_v19 }
0x17a7   :  { %v9011_v46 = vpop.eup %9010 }
0x17a8   :  { %v3245_v6 = vsel %vm518_vm8, %v9011_v46, 0.0 }
0x17a9   :  { %3246 = vadd.xlane.f32.xlu0 %v3245_v6 }
0x17b6   :  { %3254 = vrot.lane.b32.xlu1 %v9988_v12, %s11451_s2 }
0x17b7   :  { %v3100_v22 = vpop.f32.mrf.mxu0 }
0x17b8   :  { %v10261_v23 = vadd.f32 %v3100_v22, %v10188_v34 }
0x17b9   :  { %v8337_v32 = vpop.f32.mrf.mxu0 }
0x17bb   :  { %v3105_v31 = vpop.f32.mrf.mxu0 }
0x17bc   :  { %v10264_v17 = vadd.f32 %v3105_v31, %v10191_v50 }
0x17bd   :  { %v8340_v1 = vpop.f32.mrf.mxu0 }
0x17bf   :  { %v3110_v25 = vpop.f32.mrf.mxu0  ;;  %3256 = vrot.lane.b32.xlu0 %v9977_v2, %s11451_s2 }
0x17c0   :  { %v10269_v20 = vadd.f32 %v3110_v25, %v10207_v15  ;;  %v9178_v15 = vld [vmem:[%s11400_s12 + $0x18] sm:$0xff] }
0x17c1   :  { %v8343_v13 = vpop.f32.mrf.mxu0 }
0x182a   :  { %v3241_v35 = vpop.xlane.xlu0 %3240 }
0x182b   :  { %9012 = vrcp.f32 %v3241_v35 }
0x182e   :  { %v3244_v12 = vpop.xlane.xlu1 %3243 }
0x182f   :  { %9014 = vrcp.f32 %v3244_v12 }
0x1832   :  { %v3247_v34 = vpop.xlane.xlu0 %3246  ;;  %v3255_v50 = vpop.permute.xlu1 %3254 }
0x1833   :  { %9016 = vrcp.f32 %v3247_v34 }
0x1836   :  { %v3257_v44 = vpop.permute.xlu0 %3256 }
0x1837   :  { %8362 = vmatpush3.msra.mxu0 %v3257_v44 }
0x1838   :  { %v9013_v45 = vpop.eup %9012  ;;  %8363 = vmatprep.subr.mxu0 %v9227_v48 }
0x1839   :  { %v3251_v47 = vmul.f32 %v9013_v45, %v9007_v0  ;;  %8364 = vmatpush3.msra.mxu0 %v3255_v50 }
0x183a   :  { %8385 = vmatprep.subr.mxu0 %v9227_v48 }
0x183b   :  { %8366 = vmatmul.mubr.msk.f32.vlgmr.msra.gmra.mxu0 %vm511_vm7, %v3251_v47 }
0x183c   :  { %v9015_v2 = vpop.eup %9014  ;;  %8368 = vmatprep.mubr.msk.f32.mxu0 %vm9228_vm5, %v9227_v48  ;;  %8386 = vmatpush3.msra.mxu0 %v9178_v15 }
0x183d   :  { %v3252_v49 = vmul.f32 %v9015_v2, %v9009_v11  ;;  %8387 = vmatprep.subr.mxu0 %v9227_v48 }
0x183e   :  { %8388 = vmatpush3.msra.mxu0 %v9179_v51 }
0x183f   :  { %8369 = vmatmul.mubr.msk.f32.gmra.mxu0 %vm511_vm7, %v3252_v49  ;;  %8389 = vmatprep.subr.mxu0 %v9227_v48 }
0x1840   :  { %v9017_v52 = vpop.eup %9016  ;;  %8371 = vmatprep.mubr.msk.f32.mxu0 %vm9228_vm5, %v9227_v48  ;;  %8390 = vmatpush3.msra.mxu0 %v9180_v54 }
0x1841   :  { %v3253_v55 = vmul.f32 %v9017_v52, %v9011_v46  ;;  %8391 = vmatprep.subr.mxu0 %v9227_v48 }
0x1842   :  { %8392 = vmatpush3.msra.mxu0 %v9181_v57 }
0x1843   :  { %8372 = vmatmul.mubr.msk.f32.gmra.mxu0 %vm511_vm7, %v3253_v55  ;;  %8427 = vmatprep.subr.mxu0 %v9227_v48 }
0x1844   :  { %8393 = vmatprep.mubr.msk.f32.mxu0 %vm9228_vm5, %v9227_v48 }
0x18fb   :  { %v3339_v58 = vpop.f32.mrf.mxu0 }
0x18fc   :  { %8377 = vmatmul.mubr.msk.f32.vlgmr.msra.gmra.mxu1 %vm415_vm6, %v3339_v58 }
0x18fd   :  { %v8367_v62 = vpop.f32.mrf.mxu0  ;;  %8379 = vmatprep.mubr.msk.f32.mxu1 %vm9228_vm5, %v9227_v48  ;;  %8403 = vmatpush3.msra.mxu1 %v9918_v33 }
0x18fe   :  { %8404 = vmatprep.subr.mxu1 %v9227_v48 }
0x18ff   :  { %v3344_v14 = vpop.f32.mrf.mxu0  ;;  %8405 = vmatpush3.msra.mxu1 %v9925_v36  ;;  %v7359_v36 = vld [vmem:[%s11403_s15] ss:$0 sm:$0xff] }
0x1900   :  { %8380 = vmatmul.mubr.msk.f32.gmra.mxu1 %vm415_vm6, %v3344_v14  ;;  %8406 = vmatprep.subr.mxu1 %v9227_v48  ;;  %v1985_v4 = vadd.f32 %v7359_v36, %v10031_v9 }
0x1901   :  { %v8370_v18 = vpop.f32.mrf.mxu0  ;;  %8382 = vmatprep.mubr.msk.f32.mxu1 %vm9228_vm5, %v9227_v48  ;;  %8407 = vmatpush3.msra.mxu1 %v9932_v37 }
0x1902   :  { %8408 = vmatprep.subr.mxu1 %v9227_v48  ;;  %v10354_v9 = vadd.f32 %v1985_v4, %v9789_v16 }
0x1903   :  { %v3349_v59 = vpop.f32.mrf.mxu0  ;;  %8409 = vmatpush3.msra.mxu1 %v9939_v38  ;;  %v1980_v38 = vadd.f32 %v7359_v36, %v10029_v26 }
0x1904   :  { %8383 = vmatmul.mubr.msk.f32.gmra.mxu1 %vm415_vm6, %v3349_v59  ;;  %8410 = vmatprep.subr.mxu1 %v9227_v48  ;;  %v3732_v10 = vsel %vm248_vm4, %v10354_v9, 0.0 }
0x1905   :  { %v8373_v33 = vpop.f32.mrf.mxu0  ;;  %8411 = vmatpush3.msra.mxu1 %v9946_v39  ;;  %8418 = vmatprep.mubr.msk.f32.mxu1 %vm9228_vm5, %v9227_v48  ;;  %v10332_v60 = vadd.f32 %v1980_v38, %v9779_v56 }
0x1906   :  { %8412 = vmatprep.subr.mxu1 %v9227_v48 }
0x1907   :  { %8413 = vmatpush3.msra.mxu1 %v9953_v40 }
0x1908   :  { %8414 = vmatprep.subr.mxu1 %v9227_v48 }
0x1909   :  { %8415 = vmatpush3.msra.mxu1 %v9960_v41 }
0x190a   :  { %8416 = vmatprep.subr.mxu1 %v9227_v48 }
0x190b   :  { %8417 = vmatpush3.msra.mxu1 %v9967_v43  ;;  %v1990_v43 = vadd.f32 %v7359_v36, %v10033_v29  ;;  %v3729_v29 = vsel %vm248_vm4, %v10332_v60, 0.0 }
0x190c   :  { %8444 = vmatprep.subr.mxu1 %v9227_v48 }
0x190d   :  { %v10343_v5 = vadd.f32 %v1990_v43, %v9797_v63 }
0x190f   :  { %v3735_v63 = vsel %vm255_vm2, %v10343_v5, 0.0 }
0x19bc   :  { %v3428_v37 = vpop.f32.mrf.mxu1 }
0x19bd   :  { %v3442_v39 = vadd.f32 %v3428_v37, %v10261_v23 }
0x19be   :  { %v8378_v40 = vpop.f32.mrf.mxu1 }
0x19bf   :  { %v10329_v24 = vadd.f32 %v3442_v39, %v9805_v3 }
0x19c0   :  { %v3433_v41 = vpop.f32.mrf.mxu1 }
0x19c1   :  { %v3443_v28 = vadd.f32 %v3433_v41, %v10264_v17  ;;  %v3448_v61 = vsel %vm248_vm4, %v10329_v24, 0.0 }
0x19c2   :  { %3449 = vadd.xlane.f32.xlu1 %v3448_v61  ;;  %v8381_v30 = vpop.f32.mrf.mxu1 }
0x19c3   :  { %v10339_v26 = vadd.f32 %v3443_v28, %v9786_v21 }
0x19c4   :  { %v3438_v3 = vpop.f32.mrf.mxu1 }
0x19c5   :  { %v3444_v56 = vadd.f32 %v3438_v3, %v10269_v20  ;;  %v3451_v42 = vsel %vm248_vm4, %v10339_v26, 0.0 }
0x19c6   :  { %3730 = vadd.xlane.f32.xlu1 %v3729_v29  ;;  %3452 = vadd.xlane.f32.xlu0 %v3451_v42  ;;  %v8384_v27 = vpop.f32.mrf.mxu1 }
0x19c7   :  { %v10351_v21 = vadd.f32 %v3444_v56, %v9776_v53  ;;  %v9182_v56 = vld [vmem:[%s11398_s10] ss:$0 sm:$0xff] }
0x19c8   :  { %v9183_v27 = vld [vmem:[%s11399_s11] ss:$0 sm:$0xff] }
0x19c9   :  { %v3454_v7 = vsel %vm255_vm2, %v10351_v21, 0.0 }
0x19ca   :  { %3736 = vadd.xlane.f32.xlu1 %v3735_v63  ;;  %3455 = vadd.xlane.f32.xlu0 %v3454_v7 }
0x19ce   :  { %3733 = vadd.xlane.f32.xlu0 %v3732_v10  ;;  %v7429_v10 = vld [vmem:[%s11394_s6 + $0x38] sm:$0xff] }
0x1a4b   :  { %v3450_v0 = vpop.xlane.xlu1 %3449 }
0x1a4c   :  { %v3457_v8 = vmul.f32 0.03125, %v3450_v0 }
0x1a4e   :  { %v3460_v53 = vsub.f32 %v10329_v24, %v3457_v8  ;;  %v7428_v8 = vld [vmem:[%s11394_s6 + $0x30] sm:$0xff] }
0x1a4f   :  { %v3731_v11 = vpop.xlane.xlu1 %3730  ;;  %v3453_v19 = vpop.xlane.xlu0 %3452 }
0x1a50   :  { %v3738_v16 = vmul.f32 0.03125, %v3731_v11  ;;  %v3458_v46 = vmul.f32 0.03125, %v3453_v19  ;;  %v3463_v6 = vmul.f32 %v3460_v53, %v3460_v53 }
0x1a52   :  { %v10364_v22 = vsub.f32 %v10332_v60, %v3738_v16  ;;  %v3461_v23 = vsub.f32 %v10339_v26, %v3458_v46  ;;  %v3466_v32 = vsel %vm248_vm4, %v3463_v6, 0.0  ;;  %v7427_v16 = vld [vmem:[%s11394_s6 + $0x28] sm:$0xff] }
0x1a53   :  { %v3737_v31 = vpop.xlane.xlu1 %3736  ;;  %3467 = vadd.xlane.f32.xlu0 %v3466_v32  ;;  %v3456_v17 = vpop.xlane.xlu0 %3455  ;;  %v7426_v32 = vld [vmem:[%s11394_s6 + $0x20] sm:$0xff] }
0x1a54   :  { %v3740_v1 = vmul.f32 0.03125, %v3737_v31  ;;  %v3459_v25 = vmul.f32 0.03125, %v3456_v17  ;;  %v3464_v20 = vmul.f32 %v3461_v23, %v3461_v23  ;;  %v3744_v34 = vmul.f32 %v10364_v22, %v10364_v22 }
0x1a56   :  { %v10369_v13 = vsub.f32 %v10343_v5, %v3740_v1  ;;  %v10372_v35 = vsub.f32 %v10351_v21, %v3459_v25  ;;  %v3469_v12 = vsel %vm248_vm4, %v3464_v20, 0.0  ;;  %v3747_v2 = vsel %vm248_vm4, %v3744_v34, 0.0 }
0x1a57   :  { %3470 = vadd.xlane.f32.xlu1 %v3469_v12  ;;  %v3734_v44 = vpop.xlane.xlu0 %3733 }
0x1a58   :  { %v3739_v45 = vmul.f32 0.03125, %v3734_v44  ;;  %v3465_v50 = vmul.f32 %v10372_v35, %v10372_v35  ;;  %v3746_v49 = vmul.f32 %v10369_v13, %v10369_v13 }
0x1a5a   :  { %v10380_v47 = vsub.f32 %v10354_v9, %v3739_v45  ;;  %v3472_v15 = vsel %vm255_vm2, %v3465_v50, 0.0  ;;  %v3753_v52 = vsel %vm255_vm2, %v3746_v49, 0.0 }
0x1a5b   :  { %3748 = vadd.xlane.f32.xlu1 %v3747_v2  ;;  %3473 = vadd.xlane.f32.xlu0 %v3472_v15 }
0x1a5c   :  { %v3745_v51 = vmul.f32 %v10380_v47, %v10380_v47 }
0x1a5e   :  { %v3750_v54 = vsel %vm248_vm4, %v3745_v51, 0.0 }
0x1a5f   :  { %3754 = vadd.xlane.f32.xlu1 %v3753_v52  ;;  %3751 = vadd.xlane.f32.xlu0 %v3750_v54 }
0x1adc   :  { %v3468_v55 = vpop.xlane.xlu0 %3467 }
0x1add   :  { %v3475_v57 = vmul.f32 0.03125, %v3468_v55 }
0x1adf   :  { %v3478_v58 = vadd.f32 1e-05, %v3475_v57 }
0x1ae0   :  { %v3471_v62 = vpop.xlane.xlu1 %3470 }
0x1ae1   :  { %9018 = vrsqrt.f32 %v3478_v58  ;;  %v3476_v14 = vmul.f32 0.03125, %v3471_v62 }
0x1ae3   :  { %v3479_v18 = vadd.f32 1e-05, %v3476_v14 }
0x1ae4   :  { %v3749_v59 = vpop.xlane.xlu1 %3748  ;;  %v3474_v33 = vpop.xlane.xlu0 %3473 }
0x1ae5   :  { %9020 = vrsqrt.f32 %v3479_v18  ;;  %v3756_v36 = vmul.f32 0.03125, %v3749_v59  ;;  %v3477_v37 = vmul.f32 0.03125, %v3474_v33 }
0x1ae7   :  { %v3759_v38 = vadd.f32 1e-05, %v3756_v36  ;;  %v3480_v39 = vadd.f32 1e-05, %v3477_v37  ;;  %v7454_v36 = vld [vmem:[%s11395_s7 + $0x1] ss:$0 sm:$0xff] }
0x1ae8   :  { %v3755_v40 = vpop.xlane.xlu1 %3754  ;;  %v3752_v41 = vpop.xlane.xlu0 %3751 }
0x1ae9   :  { %9022 = vrsqrt.f32 %v3759_v38  ;;  %v3758_v43 = vmul.f32 0.03125, %v3755_v40  ;;  %v3757_v28 = vmul.f32 0.03125, %v3752_v41 }
0x1aea   :  { %9024 = vrsqrt.f32 %v3480_v39 }
0x1aeb   :  { %v3760_v61 = vadd.f32 1e-05, %v3757_v28  ;;  %v3761_v30 = vadd.f32 1e-05, %v3758_v43 }
0x1aed   :  { %9026 = vrsqrt.f32 %v3760_v61 }
0x1aee   :  { %v9019_v4 = vpop.eup %9018  ;;  %9028 = vrsqrt.f32 %v3761_v30 }
0x1aef   :  { %v3484_v3 = vmul.f32 %v9019_v4, %v3460_v53 }
0x1af1   :  { %v3487_v29 = vmul.f32 %v9182_v56, %v3484_v3 }
0x1af2   :  { %v9021_v42 = vpop.eup %9020 }
0x1af3   :  { %v3490_v63 = vadd.f32 %v9183_v27, %v3487_v29  ;;  %v3485_v7 = vmul.f32 %v9021_v42, %v3461_v23  ;;  %v7452_v23 = vld [vmem:[%s11447_s1 + $0x1] ss:$0 sm:$0xff] }
0x1af5   :  { %8394 = vmatmul.mubr.msk.f32.vlgmr.msra.gmra.mxu0 %vm248_vm4, %v3490_v63  ;;  %v3488_v0 = vmul.f32 %v9182_v56, %v3485_v7 }
0x1af6   :  { %v9023_v53 = vpop.eup %9022  ;;  %8396 = vmatprep.mubr.msk.f32.mxu0 %vm9228_vm5, %v9227_v48  ;;  %8428 = vmatpush3.msra.mxu0 %v7429_v10 }
0x1af7   :  { %v9025_v11 = vpop.eup %9024  ;;  %v3491_v19 = vadd.f32 %v9183_v27, %v3488_v0  ;;  %8429 = vmatprep.subr.mxu0 %v9227_v48  ;;  %v3765_v46 = vmul.f32 %v9023_v53, %v10364_v22 }
0x1af8   :  { %8430 = vmatpush3.msra.mxu0 %v7428_v8  ;;  %v3486_v6 = vmul.f32 %v9025_v11, %v10372_v35  ;;  %v7453_v35 = vld [vmem:[%s11393_s5 + $0x1] ss:$0 sm:$0xff] }
0x1af9   :  { %8397 = vmatmul.mubr.msk.f32.gmra.mxu0 %vm248_vm4, %v3491_v19  ;;  %8431 = vmatprep.subr.mxu0 %v9227_v48  ;;  %v3774_v17 = vmul.f32 %v7452_v23, %v3765_v46 }
0x1afa   :  { %8399 = vmatprep.mubr.msk.f32.mxu0 %vm9228_vm5, %v9227_v48  ;;  %v3489_v31 = vmul.f32 %v9182_v56, %v3486_v6  ;;  %8432 = vmatpush3.msra.mxu0 %v7427_v16  ;;  %v9027_v22 = vpop.eup %9026 }
0x1afb   :  { %8433 = vmatprep.subr.mxu0 %v9227_v48  ;;  %v3766_v25 = vmul.f32 %v9027_v22, %v10380_v47  ;;  %v9029_v20 = vpop.eup %9028  ;;  %v3783_v12 = vadd.f32 %v7453_v35, %v3774_v17 }
0x1afc   :  { %v3492_v1 = vadd.f32 %v9183_v27, %v3489_v31  ;;  %8434 = vmatpush3.msra.mxu0 %v7426_v32  ;;  %v3767_v44 = vmul.f32 %v9029_v20, %v10369_v13  ;;  %v9184_v13 = vld [vmem:[%s11401_s13] ss:$0 sm:$0xff] }
0x1afd   :  { %8459 = vmatprep.subr.mxu0 %v9227_v48  ;;  %v3775_v34 = vmul.f32 %v7452_v23, %v3766_v25 }
0x1afe   :  { %8400 = vmatmul.mubr.msk.f32.gmra.mxu0 %vm248_vm4, %v3492_v1  ;;  %v3776_v50 = vmul.f32 %v7452_v23, %v3767_v44 }
0x1aff   :  { %8435 = vmatprep.mubr.msk.f32.mxu0 %vm9228_vm5, %v9227_v48  ;;  %v3784_v45 = vadd.f32 %v7453_v35, %v3775_v34 }
0x1b00   :  { %v3785_v47 = vadd.f32 %v7453_v35, %v3776_v50 }
0x1b02   :  { %8436 = vmatmul.mubr.msk.f32.vlgmr.msra.gmra.mxu0 %vm248_vm4, %v3783_v12 }
0x1b03   :  { %8438 = vmatprep.mubr.msk.f32.mxu0 %vm9228_vm5, %v9227_v48 }
0x1b06   :  { %8439 = vmatmul.mubr.msk.f32.gmra.mxu0 %vm248_vm4, %v3784_v45 }
0x1b07   :  { %8441 = vmatprep.mubr.msk.f32.mxu0 %vm9228_vm5, %v9227_v48 }
0x1b0a   :  { %8442 = vmatmul.mubr.msk.f32.gmra.mxu0 %vm248_vm4, %v3785_v47 }
0x1b0b   :  { %8465 = vmatprep.mubr.msk.f32.mxu0 %vm9228_vm5, %v9227_v48 }
0x1bb5   :  { %v3568_v2 = vpop.f32.mrf.mxu0 }
0x1bb6   :  { %v3569_v15 = vadd.f32 %v9184_v13, %v3568_v2 }
0x1bb7   :  { %v8395_v49 = vpop.f32.mrf.mxu0 }
0x1bb8   :  { %v3585_v51 = vmul.f32 0.70710677, %v3569_v15  ;;  %v3582_v40 = vmul.f32 0.5, %v3569_v15 }
0x1bb9   :  { %v3573_v52 = vpop.f32.mrf.mxu0 }
0x1bba   :  { %9030 = verf.f32 %v3585_v51  ;;  %v3574_v54 = vadd.f32 %v9184_v13, %v3573_v52 }
0x1bbb   :  { %v8398_v55 = vpop.f32.mrf.mxu0 }
0x1bbc   :  { %v3586_v57 = vmul.f32 0.70710677, %v3574_v54  ;;  %v3583_v56 = vmul.f32 0.5, %v3574_v54 }
0x1bbe   :  { %9032 = verf.f32 %v3586_v57  ;;  %v3578_v58 = vpop.f32.mrf.mxu0 }
0x1bbf   :  { %v3579_v62 = vadd.f32 %v9184_v13, %v3578_v58 }
0x1bc0   :  { %v8401_v14 = vpop.f32.mrf.mxu0 }
0x1bc1   :  { %v3587_v18 = vmul.f32 0.70710677, %v3579_v62  ;;  %v3584_v7 = vmul.f32 0.5, %v3579_v62 }
0x1bc2   :  { %v3867_v59 = vpop.f32.mrf.mxu0 }
0x1bc3   :  { %9034 = verf.f32 %v3587_v18  ;;  %v10450_v4 = vadd.f32 %v7454_v36, %v3867_v59 }
0x1bc4   :  { %v8437_v33 = vpop.f32.mrf.mxu0 }
0x1bc5   :  { %v10473_v19 = vmul.f32 0.35355338, %v10450_v4 }
0x1bc6   :  { %v3872_v37 = vpop.f32.mrf.mxu0 }
0x1bc7   :  { %v9031_v38 = vpop.eup %9030  ;;  %v10446_v39 = vadd.f32 %v7454_v36, %v3872_v37 }
0x1bc8   :  { %v3591_v41 = vadd.f32 1.0, %v9031_v38  ;;  %v8440_v43 = vpop.f32.mrf.mxu0 }
0x1bc9   :  { %3889 = vrot.lane.b32.xlu1 %v10446_v39, %s11434_s26  ;;  %v10481_v16 = vmul.f32 0.35355338, %v10446_v39 }
0x1bca   :  { %v3594_v28 = vmul.f32 %v3591_v41, %v3582_v40  ;;  %v3877_v61 = vpop.f32.mrf.mxu0 }
0x1bcb   :  { %v9033_v30 = vpop.eup %9032  ;;  %v10452_v3 = vadd.f32 %v7454_v36, %v3877_v61 }
0x1bcc   :  { %v3592_v29 = vadd.f32 1.0, %v9033_v30  ;;  %v8443_v42 = vpop.f32.mrf.mxu0  ;;  %8419 = vmatmul.mubr.msk.f32.vlgmr.msra.gmra.mxu1 %vm85_vm0, %v3594_v28 }
0x1bcd   :  { %3887 = vrot.lane.b32.xlu1 %v10450_v4, %s11434_s26  ;;  %3891 = vrot.lane.b32.xlu0 %v10452_v3, %s11434_s26  ;;  %v10488_v46 = vmul.f32 0.35355338, %v10452_v3 }
0x1bce   :  { %v3595_v27 = vmul.f32 %v3592_v29, %v3583_v56  ;;  %8421 = vmatprep.mubr.msk.f32.mxu1 %vm9228_vm5, %v9227_v48 }
0x1bd0   :  { %v9035_v63 = vpop.eup %9034  ;;  %8422 = vmatmul.mubr.msk.f32.gmra.mxu1 %vm85_vm0, %v3595_v27 }
0x1bd1   :  { %v3593_v10 = vadd.f32 1.0, %v9035_v63  ;;  %8424 = vmatprep.mubr.msk.f32.mxu1 %vm9228_vm5, %v9227_v48 }
0x1bd3   :  { %v3596_v0 = vmul.f32 %v3593_v10, %v3584_v7 }
0x1bd5   :  { %8425 = vmatmul.mubr.msk.f32.gmra.mxu1 %vm85_vm0, %v3596_v0 }
0x1bd6   :  { %8450 = vmatprep.mubr.msk.f32.mxu1 %vm9228_vm5, %v9227_v48 }
0x1c3b   :  { %v3890_v53 = vpop.permute.xlu1 %3889 }
0x1c3f   :  { %v3892_v8 = vpop.permute.xlu0 %3891  ;;  %v3888_v11 = vpop.permute.xlu1 %3887 }
0x1c40   :  { %8445 = vmatpush3.xpose.msk.msra.mxu1 %vm415_vm6, %v3892_v8  ;;  %v7431_v8 = vld [vmem:[%s11396_s8 + $0x20] sm:$0xff] }
0x1c41   :  { %8446 = vmatprep.subr.mxu1 %v9227_v48 }
0x1c44   :  { %8447 = vmatpush3.xpose.msk.msra.mxu1 %vm415_vm6, %v3890_v53 }
0x1c45   :  { %8448 = vmatprep.subr.mxu1 %v9227_v48 }
0x1c48   :  { %8449 = vmatpush3.xpose.msk.msra.mxu1 %vm415_vm6, %v3888_v11 }
0x1c49   :  { %8474 = vmatprep.subr.mxu1 %v9227_v48 }
0x1c4b   :  { %8451 = vmatmul.mubr.msk.f32.vlgmr.msra.gmra.mxu1 %vm415_vm6, %v10473_v19 }
0x1c4c   :  { %8453 = vmatprep.mubr.msk.f32.mxu1 %vm9228_vm5, %v9227_v48  ;;  %8475 = vmatpush3.msra.mxu1 %v7431_v8 }
0x1c4d   :  { %8500 = vmatprep.subr.mxu1 %v9227_v48 }
0x1c4f   :  { %8454 = vmatmul.mubr.msk.f32.gmra.mxu1 %vm415_vm6, %v10481_v16 }
0x1c50   :  { %8456 = vmatprep.mubr.msk.f32.mxu1 %vm9228_vm5, %v9227_v48 }
0x1c53   :  { %8457 = vmatmul.mubr.msk.f32.gmra.mxu1 %vm415_vm6, %v10488_v46 }
0x1c54   :  { %8476 = vmatprep.mubr.msk.f32.mxu1 %vm9228_vm5, %v9227_v48 }
0x1c8c   :  { %v10494_v6 = vpop.f32.mrf.mxu1 }
0x1c8e   :  { %v8420_v23 = vpop.f32.mrf.mxu1 }
0x1c90   :  { %v10496_v32 = vpop.f32.mrf.mxu1 }
0x1c92   :  { %v8423_v31 = vpop.f32.mrf.mxu1 }
0x1c95   :  { %v10498_v22 = vpop.f32.mrf.mxu1 }
0x1c97   :  { %v8426_v17 = vpop.f32.mrf.mxu1 }
0x1d0b   :  { %v3974_v1 = vpop.f32.mrf.mxu1 }
0x1d0c   :  { %v3988_v25 = vsel %vm511_vm7, %v3974_v1, -inf }
0x1d0d   :  { %3989 = vmax.xlane.f32.xlu1 %v3988_v25  ;;  %v8452_v20 = vpop.f32.mrf.mxu1 }
0x1d0f   :  { %v3979_v35 = vpop.f32.mrf.mxu1 }
0x1d10   :  { %v3991_v12 = vsel %vm511_vm7, %v3979_v35, -inf }
0x1d11   :  { %3992 = vmax.xlane.f32.xlu0 %v3991_v12  ;;  %v8455_v34 = vpop.f32.mrf.mxu1 }
0x1d13   :  { %v3984_v44 = vpop.f32.mrf.mxu1 }
0x1d14   :  { %v3994_v45 = vsel %vm518_vm8, %v3984_v44, -inf }
0x1d15   :  { %3995 = vmax.xlane.f32.xlu0 %v3994_v45  ;;  %v8458_v50 = vpop.f32.mrf.mxu1 }
0x1d1e   :  { %4025 = vrot.lane.b32.xlu1 %v10452_v3, %s11432_s27 }
0x1d22   :  { %4021 = vrot.lane.b32.xlu1 %v10450_v4, %s11432_s27 }
0x1d26   :  { %4228 = vrot.lane.b32.xlu1 %v10452_v3, %s11452_s25 }
0x1d2a   :  { %4226 = vrot.lane.b32.xlu1 %v10446_v39, %s11452_s25 }
0x1d96   :  { %v3990_v47 = vpop.xlane.xlu1 %3989 }
0x1d97   :  { %v3997_v2 = vsub.f32 %v3974_v1, %v3990_v47 }
0x1d99   :  { %v4000_v13 = vmul.f32 1.442695, %v3997_v2 }
0x1d9a   :  { %v4026_v15 = vpop.permute.xlu1 %4025  ;;  %v3993_v49 = vpop.xlane.xlu0 %3992 }
0x1d9b   :  { %9036 = vpow2.f32 %v4000_v13  ;;  %v3998_v51 = vsub.f32 %v3979_v35, %v3993_v49  ;;  %8460 = vmatpush3.msk.msra.mxu0 %vm201_vm3, %v4026_v15 }
0x1d9c   :  { %8461 = vmatprep.subr.mxu0 %v9227_v48 }
0x1d9d   :  { %v4002_v52 = vmul.f32 1.442695, %v3998_v51 }
0x1d9e   :  { %v3996_v62 = vpop.xlane.xlu0 %3995  ;;  %v4022_v36 = vpop.permute.xlu1 %4021 }
0x1d9f   :  { %9038 = vpow2.f32 %v4002_v52  ;;  %v3999_v14 = vsub.f32 %v3984_v44, %v3996_v62 }
0x1da1   :  { %v4004_v18 = vmul.f32 1.442695, %v3999_v14 }
0x1da2   :  { %v4229_v37 = vpop.permute.xlu1 %4228 }
0x1da3   :  { %9040 = vpow2.f32 %v4004_v18 }
0x1da6   :  { %v4227_v38 = vpop.permute.xlu1 %4226 }
0x1da8   :  { %v9037_v54 = vpop.eup %9036 }
0x1da9   :  { %v4006_v55 = vsel %vm511_vm7, %v9037_v54, 0.0 }
0x1daa   :  { %4007 = vadd.xlane.f32.xlu0 %v4006_v55 }
0x1dac   :  { %v9039_v57 = vpop.eup %9038 }
0x1dad   :  { %v4009_v58 = vsel %vm511_vm7, %v9039_v57, 0.0 }
0x1dae   :  { %4010 = vadd.xlane.f32.xlu1 %v4009_v58 }
0x1db0   :  { %v9041_v59 = vpop.eup %9040 }
0x1db1   :  { %v4012_v33 = vsel %vm518_vm8, %v9041_v59, 0.0 }
0x1dbf   :  { %4218 = vrot.lane.b32.xlu1 %v10473_v19, %s11453_s30 }
0x1dc0   :  { %4023 = vrot.lane.b32.xlu0 %v10446_v39, %s11432_s27 }
0x1dc3   :  { %4222 = vrot.lane.b32.xlu1 %v10488_v46, %s11453_s30 }
0x1ddf   :  { %4013 = vadd.xlane.f32.xlu0 %v4012_v33 }
0x1df5   :  { %4224 = vrot.lane.b32.xlu0 %v10450_v4, %s11452_s25 }
0x1df9   :  { %4220 = vrot.lane.b32.xlu0 %v10481_v16, %s11453_s30 }
0x1e33   :  { %v4008_v40 = vpop.xlane.xlu0 %4007 }
0x1e34   :  { %9042 = vrcp.f32 %v4008_v40 }
0x1e37   :  { %v4011_v41 = vpop.xlane.xlu1 %4010  ;;  %v4024_v43 = vpop.permute.xlu0 %4023 }
0x1e38   :  { %9044 = vrcp.f32 %v4011_v41  ;;  %8462 = vmatpush3.msra.mxu0 %v4024_v43 }
0x1e39   :  { %8463 = vmatprep.subr.mxu0 %v9227_v48 }
0x1e3a   :  { %8464 = vmatpush3.msra.mxu0 %v4022_v36 }
0x1e3b   :  { %8485 = vmatprep.subr.mxu0 %v9227_v48  ;;  %v4219_v7 = vpop.permute.xlu1 %4218 }
0x1e3f   :  { %v4223_v0 = vpop.permute.xlu1 %4222 }
0x1e41   :  { %v9043_v28 = vpop.eup %9042 }
0x1e42   :  { %v4018_v61 = vmul.f32 %v9043_v28, %v9037_v54 }
0x1e44   :  { %8466 = vmatmul.mubr.msk.f32.vlgmr.msra.gmra.mxu0 %vm511_vm7, %v4018_v61 }
0x1e45   :  { %v9045_v30 = vpop.eup %9044  ;;  %8486 = vmatpush3.xpose.msk.msra.mxu0 %vm415_vm6, %v4229_v37  ;;  %8468 = vmatprep.mubr.msk.f32.mxu0 %vm9228_vm5, %v9227_v48 }
0x1e46   :  { %8487 = vmatprep.subr.mxu0 %v9227_v48  ;;  %v4019_v56 = vmul.f32 %v9045_v30, %v9039_v57 }
0x1e48   :  { %8469 = vmatmul.mubr.msk.f32.gmra.mxu0 %vm511_vm7, %v4019_v56 }
0x1e49   :  { %8488 = vmatpush3.xpose.msk.msra.mxu0 %vm415_vm6, %v4227_v38  ;;  %8471 = vmatprep.mubr.msk.f32.mxu0 %vm9228_vm5, %v9227_v48 }
0x1e4a   :  { %8489 = vmatprep.subr.mxu0 %v9227_v48 }
0x1e68   :  { %v4014_v29 = vpop.xlane.xlu0 %4013 }
0x1e69   :  { %9046 = vrcp.f32 %v4014_v29 }
0x1e6c   :  { %v4225_v42 = vpop.permute.xlu0 %4224 }
0x1e6d   :  { %8490 = vmatpush3.xpose.msk.msra.mxu0 %vm415_vm6, %v4225_v42 }
0x1e6e   :  { %8515 = vmatprep.subr.mxu0 %v9227_v48 }
0x1e70   :  { %v4221_v10 = vpop.permute.xlu0 %4220 }
0x1e76   :  { %v9047_v27 = vpop.eup %9046 }
0x1e77   :  { %v4020_v63 = vmul.f32 %v9047_v27, %v9041_v59 }
0x1e79   :  { %8472 = vmatmul.mubr.msk.f32.gmra.mxu0 %vm511_vm7, %v4020_v63 }
0x1e7a   :  { %8491 = vmatprep.mubr.msk.f32.mxu0 %vm9228_vm5, %v9227_v48 }
0x1e7d   :  { %8492 = vmatmul.mubr.msk.f32.vlgmr.msra.gmra.mxu0 %vm415_vm6, %v4219_v7 }
0x1e7e   :  { %8494 = vmatprep.mubr.msk.f32.mxu0 %vm9228_vm5, %v9227_v48 }
0x1e81   :  { %8495 = vmatmul.mubr.msk.f32.gmra.mxu0 %vm415_vm6, %v4221_v10 }
0x1e82   :  { %8497 = vmatprep.mubr.msk.f32.mxu0 %vm9228_vm5, %v9227_v48 }
0x1e85   :  { %8498 = vmatmul.mubr.msk.f32.gmra.mxu0 %vm415_vm6, %v4223_v0 }
0x1e86   :  { %8517 = vmatprep.mubr.msk.f32.mxu0 %vm9228_vm5, %v9227_v48 }
0x1f04   :  { %v4106_v53 = vpop.f32.mrf.mxu0 }
0x1f05   :  { %8477 = vmatmul.mubr.msk.f32.vlgmr.msra.gmra.mxu1 %vm415_vm6, %v4106_v53 }
0x1f06   :  { %v8467_v11 = vpop.f32.mrf.mxu0  ;;  %8479 = vmatprep.mubr.msk.f32.mxu1 %vm9228_vm5, %v9227_v48 }
0x1f08   :  { %v4111_v23 = vpop.f32.mrf.mxu0 }
0x1f09   :  { %8480 = vmatmul.mubr.msk.f32.gmra.mxu1 %vm415_vm6, %v4111_v23 }
0x1f0a   :  { %v8470_v31 = vpop.f32.mrf.mxu0  ;;  %8482 = vmatprep.mubr.msk.f32.mxu1 %vm9228_vm5, %v9227_v48 }
0x1f39   :  { %v4116_v17 = vpop.f32.mrf.mxu0 }
0x1f3a   :  { %8483 = vmatmul.mubr.msk.f32.gmra.mxu1 %vm415_vm6, %v4116_v17 }
0x1f3b   :  { %v8473_v1 = vpop.f32.mrf.mxu0  ;;  %8506 = vmatprep.mubr.msk.f32.mxu1 %vm9228_vm5, %v9227_v48 }
0x1f3d   :  { %v4308_v25 = vpop.f32.mrf.mxu0 }
0x1f3e   :  { %v4322_v20 = vsel %vm511_vm7, %v4308_v25, -inf }
0x1f3f   :  { %4323 = vmax.xlane.f32.xlu0 %v4322_v20  ;;  %v8493_v35 = vpop.f32.mrf.mxu0 }
0x1f41   :  { %v4313_v12 = vpop.f32.mrf.mxu0 }
0x1f42   :  { %v4325_v34 = vsel %vm511_vm7, %v4313_v12, -inf }
0x1f43   :  { %4326 = vmax.xlane.f32.xlu1 %v4325_v34  ;;  %v8496_v44 = vpop.f32.mrf.mxu0 }
0x1f45   :  { %v4318_v45 = vpop.f32.mrf.mxu0 }
0x1f46   :  { %v4328_v50 = vsel %vm518_vm8, %v4318_v45, -inf }
0x1f47   :  { %4329 = vmax.xlane.f32.xlu0 %v4328_v50  ;;  %v8499_v47 = vpop.f32.mrf.mxu0 }
0x1f54   :  { %4357 = vrot.lane.b32.xlu1 %v10446_v39, %s11454_s0 }
0x1f58   :  { %4355 = vrot.lane.b32.xlu1 %v10450_v4, %s11454_s0 }
0x1f5c   :  { %4556 = vrot.lane.b32.xlu1 %v10452_v3, %s11455_s23 }
0x1f5d   :  { %4359 = vrot.lane.b32.xlu0 %v10452_v3, %s11454_s0 }
0x1f60   :  { %4552 = vrot.lane.b32.xlu1 %v10450_v4, %s11455_s23 }
0x1fc5   :  { %v10578_v2 = vpop.f32.mrf.mxu1 }
0x1fc7   :  { %v8478_v13 = vpop.f32.mrf.mxu1 }
0x1fc8   :  { %v4324_v15 = vpop.xlane.xlu0 %4323 }
0x1fc9   :  { %v4331_v49 = vsub.f32 %v4308_v25, %v4324_v15  ;;  %v10580_v51 = vpop.f32.mrf.mxu1  ;;  %v7432_v25 = vld [vmem:[%s11396_s8 + $0x28] sm:$0xff] }
0x1fca   :  { %8516 = vmatpush3.msra.mxu0 %v7432_v25 }
0x1fcb   :  { %v4334_v52 = vmul.f32 1.442695, %v4331_v49  ;;  %v8481_v54 = vpop.f32.mrf.mxu1  ;;  %8541 = vmatprep.subr.mxu0 %v9227_v48 }
0x1fcc   :  { %v4327_v55 = vpop.xlane.xlu1 %4326 }
0x1fcd   :  { %9048 = vpow2.f32 %v4334_v52  ;;  %v4332_v57 = vsub.f32 %v4313_v12, %v4327_v55 }
0x1fcf   :  { %v4336_v58 = vmul.f32 1.442695, %v4332_v57 }
0x1fd0   :  { %v4330_v62 = vpop.xlane.xlu0 %4329  ;;  %v4358_v18 = vpop.permute.xlu1 %4357 }
0x1fd1   :  { %9050 = vpow2.f32 %v4336_v58  ;;  %v4333_v14 = vsub.f32 %v4318_v45, %v4330_v62 }
0x1fd3   :  { %v4338_v59 = vmul.f32 1.442695, %v4333_v14 }
0x1fd4   :  { %v4360_v33 = vpop.permute.xlu0 %4359  ;;  %v4356_v36 = vpop.permute.xlu1 %4355 }
0x1fd5   :  { %9052 = vpow2.f32 %v4338_v59  ;;  %8501 = vmatpush3.msk.msra.mxu1 %vm201_vm3, %v4360_v33 }
0x1fd6   :  { %8502 = vmatprep.subr.mxu1 %v9227_v48 }
0x1fd7   :  { %8503 = vmatpush3.msra.mxu1 %v4358_v18 }
0x1fd8   :  { %8504 = vmatprep.subr.mxu1 %v9227_v48  ;;  %v4557_v56 = vpop.permute.xlu1 %4556 }
0x1fd9   :  { %8505 = vmatpush3.msra.mxu1 %v4356_v36 }
0x1fda   :  { %v9049_v37 = vpop.eup %9048  ;;  %8526 = vmatprep.subr.mxu1 %v9227_v48 }
0x1fdb   :  { %v4340_v38 = vsel %vm511_vm7, %v9049_v37, 0.0 }
0x1fdc   :  { %4341 = vadd.xlane.f32.xlu0 %v4340_v38  ;;  %v4553_v42 = vpop.permute.xlu1 %4552 }
0x1fde   :  { %v9051_v40 = vpop.eup %9050 }
0x1fdf   :  { %v4343_v41 = vsel %vm511_vm7, %v9051_v40, 0.0 }
0x1fe0   :  { %4344 = vadd.xlane.f32.xlu0 %v4343_v41 }
0x1fe2   :  { %v9053_v43 = vpop.eup %9052 }
0x1fe3   :  { %v4346_v28 = vsel %vm518_vm8, %v9053_v43, 0.0 }
0x1fe4   :  { %4347 = vadd.xlane.f32.xlu1 %v4346_v28 }
0x1ff5   :  { %4548 = vrot.lane.b32.xlu1 %v10481_v16, %s11456_s4 }
0x1ff6   :  { %4554 = vrot.lane.b32.xlu0 %v10446_v39, %s11455_s23 }
0x1ffa   :  { %4546 = vrot.lane.b32.xlu0 %v10473_v19, %s11456_s4  ;;  %v10595_v61 = vpop.f32.mrf.mxu1 }
0x1ffc   :  { %v8484_v30 = vpop.f32.mrf.mxu1 }
0x1ffe   :  { %4550 = vrot.lane.b32.xlu0 %v10488_v46, %s11456_s4 }
0x2065   :  { %v4342_v29 = vpop.xlane.xlu0 %4341 }
0x2066   :  { %9054 = vrcp.f32 %v4342_v29 }
0x2069   :  { %v4345_v27 = vpop.xlane.xlu0 %4344 }
0x206a   :  { %9056 = vrcp.f32 %v4345_v27 }
0x206d   :  { %v4348_v63 = vpop.xlane.xlu1 %4347  ;;  %v4555_v53 = vpop.permute.xlu0 %4554 }
0x206e   :  { %9058 = vrcp.f32 %v4348_v63 }
0x2071   :  { %v4547_v31 = vpop.permute.xlu0 %4546  ;;  %v4549_v17 = vpop.permute.xlu1 %4548 }
0x2073   :  { %v9055_v7 = vpop.eup %9054 }
0x2074   :  { %v4352_v10 = vmul.f32 %v9055_v7, %v9049_v37 }
0x2075   :  { %v4551_v1 = vpop.permute.xlu0 %4550 }
0x2076   :  { %8507 = vmatmul.mubr.msk.f32.vlgmr.msra.gmra.mxu1 %vm511_vm7, %v4352_v10 }
0x2077   :  { %v9057_v0 = vpop.eup %9056  ;;  %8527 = vmatpush3.xpose.msk.msra.mxu1 %vm415_vm6, %v4557_v56  ;;  %8509 = vmatprep.mubr.msk.f32.mxu1 %vm9228_vm5, %v9227_v48 }
0x2078   :  { %8528 = vmatprep.subr.mxu1 %v9227_v48  ;;  %v4353_v8 = vmul.f32 %v9057_v0, %v9051_v40 }
0x207a   :  { %8510 = vmatmul.mubr.msk.f32.gmra.mxu1 %vm511_vm7, %v4353_v8 }
0x207b   :  { %v9059_v11 = vpop.eup %9058  ;;  %8529 = vmatpush3.xpose.msk.msra.mxu1 %vm415_vm6, %v4555_v53  ;;  %8512 = vmatprep.mubr.msk.f32.mxu1 %vm9228_vm5, %v9227_v48 }
0x207c   :  { %8530 = vmatprep.subr.mxu1 %v9227_v48  ;;  %v4354_v23 = vmul.f32 %v9059_v11, %v9053_v43  ;;  %v7471_v43 = vld [vmem:[%s11397_s9 + $0x1] ss:$0 sm:$0xff] }
0x207d   :  { %v4215_v28 = vadd.f32 %v7471_v43, %v10578_v2 }
0x207e   :  { %8513 = vmatmul.mubr.msk.f32.gmra.mxu1 %vm511_vm7, %v4354_v23 }
0x207f   :  { %8531 = vmatpush3.xpose.msk.msra.mxu1 %vm415_vm6, %v4553_v42  ;;  %8532 = vmatprep.mubr.msk.f32.mxu1 %vm9228_vm5, %v9227_v48  ;;  %v4216_v42 = vadd.f32 %v7471_v43, %v10580_v51 }
0x2080   :  { %8556 = vmatprep.subr.mxu1 %v9227_v48 }
0x2082   :  { %8533 = vmatmul.mubr.msk.f32.vlgmr.msra.gmra.mxu1 %vm415_vm6, %v4547_v31 }
0x2083   :  { %8535 = vmatprep.mubr.msk.f32.mxu1 %vm9228_vm5, %v9227_v48 }
0x2086   :  { %8536 = vmatmul.mubr.msk.f32.gmra.mxu1 %vm415_vm6, %v4549_v17 }
0x2087   :  { %8538 = vmatprep.mubr.msk.f32.mxu1 %vm9228_vm5, %v9227_v48 }
0x208a   :  { %8539 = vmatmul.mubr.msk.f32.gmra.mxu1 %vm415_vm6, %v4551_v1 }
0x208b   :  { %8558 = vmatprep.mubr.msk.f32.mxu1 %vm9228_vm5, %v9227_v48 }
0x2136   :  { %v4440_v20 = vpop.f32.mrf.mxu1 }
0x2137   :  { %8518 = vmatmul.mubr.msk.f32.vlgmr.msra.gmra.mxu0 %vm415_vm6, %v4440_v20 }
0x2138   :  { %v8508_v35 = vpop.f32.mrf.mxu1  ;;  %8520 = vmatprep.mubr.msk.f32.mxu0 %vm9228_vm5, %v9227_v48 }
0x213a   :  { %v4445_v12 = vpop.f32.mrf.mxu1 }
0x213b   :  { %8521 = vmatmul.mubr.msk.f32.gmra.mxu0 %vm415_vm6, %v4445_v12 }
0x213c   :  { %v8511_v34 = vpop.f32.mrf.mxu1  ;;  %8523 = vmatprep.mubr.msk.f32.mxu0 %vm9228_vm5, %v9227_v48 }
0x213e   :  { %v4450_v44 = vpop.f32.mrf.mxu1 }
0x213f   :  { %8524 = vmatmul.mubr.msk.f32.gmra.mxu0 %vm415_vm6, %v4450_v44 }
0x2140   :  { %v8514_v45 = vpop.f32.mrf.mxu1  ;;  %8547 = vmatprep.mubr.msk.f32.mxu0 %vm9228_vm5, %v9227_v48 }
0x2142   :  { %v4636_v50 = vpop.f32.mrf.mxu1 }
0x2143   :  { %v4650_v47 = vsel %vm511_vm7, %v4636_v50, -inf }
0x2144   :  { %4651 = vmax.xlane.f32.xlu1 %v4650_v47  ;;  %v8534_v13 = vpop.f32.mrf.mxu1 }
0x2146   :  { %v4641_v15 = vpop.f32.mrf.mxu1 }
0x2147   :  { %v4653_v49 = vsel %vm511_vm7, %v4641_v15, -inf }
0x2148   :  { %4654 = vmax.xlane.f32.xlu0 %v4653_v49  ;;  %v8537_v52 = vpop.f32.mrf.mxu1  ;;  %v7433_v49 = vld [vmem:[%s11396_s8 + $0x30] sm:$0xff] }
0x2149   :  { %8557 = vmatpush3.msra.mxu1 %v7433_v49 }
0x214a   :  { %v4646_v54 = vpop.f32.mrf.mxu1  ;;  %8582 = vmatprep.subr.mxu1 %v9227_v48 }
0x214b   :  { %v4656_v55 = vsel %vm518_vm8, %v4646_v54, -inf }
0x214c   :  { %4657 = vmax.xlane.f32.xlu0 %v4656_v55  ;;  %v8540_v57 = vpop.f32.mrf.mxu1 }
0x2155   :  { %4687 = vrot.lane.b32.xlu1 %v10452_v3, %s11448_s22 }
0x2159   :  { %4683 = vrot.lane.b32.xlu1 %v10450_v4, %s11448_s22 }
0x215d   :  { %4884 = vrot.lane.b32.xlu1 %v10452_v3, %s11449_s28 }
0x2161   :  { %4882 = vrot.lane.b32.xlu1 %v10446_v39, %s11449_s28 }
0x21cd   :  { %v4652_v58 = vpop.xlane.xlu1 %4651 }
0x21ce   :  { %v4659_v62 = vsub.f32 %v4636_v50, %v4652_v58 }
0x21d0   :  { %v4662_v14 = vmul.f32 1.442695, %v4659_v62 }
0x21d1   :  { %v4688_v18 = vpop.permute.xlu1 %4687  ;;  %v4655_v59 = vpop.xlane.xlu0 %4654 }
0x21d2   :  { %9060 = vpow2.f32 %v4662_v14  ;;  %v4660_v33 = vsub.f32 %v4641_v15, %v4655_v59  ;;  %8542 = vmatpush3.msk.msra.mxu0 %vm201_vm3, %v4688_v18 }
0x21d3   :  { %8543 = vmatprep.subr.mxu0 %v9227_v48 }
0x21d4   :  { %v4664_v36 = vmul.f32 1.442695, %v4660_v33 }
0x21d5   :  { %v4658_v27 = vpop.xlane.xlu0 %4657 }
0x21d6   :  { %9062 = vpow2.f32 %v4664_v36  ;;  %v4661_v2 = vsub.f32 %v4646_v54, %v4658_v27 }
0x21d8   :  { %v4666_v53 = vmul.f32 1.442695, %v4661_v2 }
0x21da   :  { %9064 = vpow2.f32 %v4666_v53 }
0x21df   :  { %v9061_v37 = vpop.eup %9060 }
0x21e0   :  { %v4668_v38 = vsel %vm511_vm7, %v9061_v37, 0.0 }
0x21e1   :  { %4669 = vadd.xlane.f32.xlu0 %v4668_v38 }
0x21e3   :  { %v9063_v40 = vpop.eup %9062 }
0x21e4   :  { %v4671_v41 = vsel %vm511_vm7, %v9063_v40, 0.0 }
0x21e5   :  { %4672 = vadd.xlane.f32.xlu1 %v4671_v41 }
0x21e7   :  { %v9065_v23 = vpop.eup %9064 }
0x21e8   :  { %v4674_v51 = vsel %vm518_vm8, %v9065_v23, 0.0 }
0x21f6   :  { %4874 = vrot.lane.b32.xlu1 %v10473_v19, %s11450_s24  ;;  %v4217_v19 = vadd.f32 %v7471_v43, %v10595_v61 }
0x21f7   :  { %v4529_v30 = vpop.f32.mrf.mxu0  ;;  %4685 = vrot.lane.b32.xlu0 %v10446_v39, %s11448_s22 }
0x21f8   :  { %v10659_v56 = vadd.f32 %v4529_v30, %v4215_v28 }
0x21f9   :  { %v8519_v29 = vpop.f32.mrf.mxu0 }
0x21fa   :  { %4878 = vrot.lane.b32.xlu1 %v10488_v46, %s11450_s24  ;;  %v4684_v46 = vpop.permute.xlu1 %4683 }
0x21fb   :  { %v4534_v63 = vpop.f32.mrf.mxu0 }
0x21fc   :  { %v10664_v7 = vadd.f32 %v4534_v63, %v4216_v42 }
0x21fd   :  { %v8522_v10 = vpop.f32.mrf.mxu0 }
0x21fe   :  { %v4885_v31 = vpop.permute.xlu1 %4884 }
0x21ff   :  { %v4539_v0 = vpop.f32.mrf.mxu0 }
0x2200   :  { %v10667_v8 = vadd.f32 %v4539_v0, %v4217_v19 }
0x2201   :  { %v8525_v11 = vpop.f32.mrf.mxu0 }
0x2202   :  { %v4883_v17 = vpop.permute.xlu1 %4882 }
0x2216   :  { %4675 = vadd.xlane.f32.xlu0 %v4674_v51 }
0x222c   :  { %4880 = vrot.lane.b32.xlu0 %v10450_v4, %s11449_s28 }
0x2230   :  { %4876 = vrot.lane.b32.xlu0 %v10481_v16, %s11450_s24 }
0x226a   :  { %v4670_v61 = vpop.xlane.xlu0 %4669 }
0x226b   :  { %9066 = vrcp.f32 %v4670_v61 }
0x226e   :  { %v4673_v1 = vpop.xlane.xlu1 %4672  ;;  %v4686_v25 = vpop.permute.xlu0 %4685 }
0x226f   :  { %9068 = vrcp.f32 %v4673_v1  ;;  %8544 = vmatpush3.msra.mxu0 %v4686_v25 }
0x2270   :  { %8545 = vmatprep.subr.mxu0 %v9227_v48 }
0x2271   :  { %8546 = vmatpush3.msra.mxu0 %v4684_v46 }
0x2272   :  { %8567 = vmatprep.subr.mxu0 %v9227_v48  ;;  %v4875_v47 = vpop.permute.xlu1 %4874 }
0x2276   :  { %v4879_v15 = vpop.permute.xlu1 %4878 }
0x2278   :  { %v9067_v20 = vpop.eup %9066 }
0x2279   :  { %v4680_v35 = vmul.f32 %v9067_v20, %v9061_v37  ;;  %v7434_v20 = vld [vmem:[%s11396_s8 + $0x38] sm:$0xff] }
0x227b   :  { %8548 = vmatmul.mubr.msk.f32.vlgmr.msra.gmra.mxu0 %vm511_vm7, %v4680_v35 }
0x227c   :  { %v9069_v12 = vpop.eup %9068  ;;  %8568 = vmatpush3.xpose.msk.msra.mxu0 %vm415_vm6, %v4885_v31  ;;  %8550 = vmatprep.mubr.msk.f32.mxu0 %vm9228_vm5, %v9227_v48 }
0x227d   :  { %8569 = vmatprep.subr.mxu0 %v9227_v48  ;;  %v4681_v16 = vmul.f32 %v9069_v12, %v9063_v40 }
0x227f   :  { %8551 = vmatmul.mubr.msk.f32.gmra.mxu0 %vm511_vm7, %v4681_v16 }
0x2280   :  { %8570 = vmatpush3.xpose.msk.msra.mxu0 %vm415_vm6, %v4883_v17  ;;  %8553 = vmatprep.mubr.msk.f32.mxu0 %vm9228_vm5, %v9227_v48 }
0x2281   :  { %8571 = vmatprep.subr.mxu0 %v9227_v48 }
0x229f   :  { %v4676_v34 = vpop.xlane.xlu0 %4675 }
0x22a0   :  { %9070 = vrcp.f32 %v4676_v34 }
0x22a3   :  { %v4881_v44 = vpop.permute.xlu0 %4880 }
0x22a4   :  { %8572 = vmatpush3.xpose.msk.msra.mxu0 %vm415_vm6, %v4881_v44 }
0x22a5   :  { %8597 = vmatprep.subr.mxu0 %v9227_v48 }
0x22a7   :  { %v4877_v13 = vpop.permute.xlu0 %4876 }
0x22ad   :  { %v9071_v45 = vpop.eup %9070 }
0x22ae   :  { %v4682_v50 = vmul.f32 %v9071_v45, %v9065_v23 }
0x22b0   :  { %8554 = vmatmul.mubr.msk.f32.gmra.mxu0 %vm511_vm7, %v4682_v50 }
0x22b1   :  { %8573 = vmatprep.mubr.msk.f32.mxu0 %vm9228_vm5, %v9227_v48 }
0x22b4   :  { %8574 = vmatmul.mubr.msk.f32.vlgmr.msra.gmra.mxu0 %vm415_vm6, %v4875_v47 }
0x22b5   :  { %8576 = vmatprep.mubr.msk.f32.mxu0 %vm9228_vm5, %v9227_v48  ;;  %8598 = vmatpush3.msra.mxu0 %v7434_v20 }
0x22b6   :  { %8625 = vmatprep.subr.mxu0 %v9227_v48 }
0x22b8   :  { %8577 = vmatmul.mubr.msk.f32.gmra.mxu0 %vm415_vm6, %v4877_v13 }
0x22b9   :  { %8579 = vmatprep.mubr.msk.f32.mxu0 %vm9228_vm5, %v9227_v48 }
0x22bc   :  { %8580 = vmatmul.mubr.msk.f32.gmra.mxu0 %vm415_vm6, %v4879_v15 }
0x22bd   :  { %8599 = vmatprep.mubr.msk.f32.mxu0 %vm9228_vm5, %v9227_v48 }
0x233b   :  { %v4768_v52 = vpop.f32.mrf.mxu0 }
0x233c   :  { %8559 = vmatmul.mubr.msk.f32.vlgmr.msra.gmra.mxu1 %vm415_vm6, %v4768_v52 }
0x233d   :  { %v8549_v54 = vpop.f32.mrf.mxu0  ;;  %8561 = vmatprep.mubr.msk.f32.mxu1 %vm9228_vm5, %v9227_v48 }
0x233f   :  { %v4773_v55 = vpop.f32.mrf.mxu0 }
0x2340   :  { %8562 = vmatmul.mubr.msk.f32.gmra.mxu1 %vm415_vm6, %v4773_v55 }
0x2341   :  { %v8552_v57 = vpop.f32.mrf.mxu0  ;;  %8564 = vmatprep.mubr.msk.f32.mxu1 %vm9228_vm5, %v9227_v48 }
0x2370   :  { %v4778_v58 = vpop.f32.mrf.mxu0 }
0x2371   :  { %8565 = vmatmul.mubr.msk.f32.gmra.mxu1 %vm415_vm6, %v4778_v58 }
0x2372   :  { %v8555_v62 = vpop.f32.mrf.mxu0  ;;  %8588 = vmatprep.mubr.msk.f32.mxu1 %vm9228_vm5, %v9227_v48 }
0x2373   :  { %v9185_v62 = vld [vmem:[%s11403_s15] ss:$0 sm:$0xff] }
0x2374   :  { %v4964_v14 = vpop.f32.mrf.mxu0 }
0x2375   :  { %v4978_v18 = vsel %vm511_vm7, %v4964_v14, -inf }
0x2376   :  { %4979 = vmax.xlane.f32.xlu0 %v4978_v18  ;;  %v8575_v59 = vpop.f32.mrf.mxu0 }
0x2378   :  { %v4969_v33 = vpop.f32.mrf.mxu0 }
0x2379   :  { %v4981_v36 = vsel %vm511_vm7, %v4969_v33, -inf }
0x237a   :  { %4982 = vmax.xlane.f32.xlu1 %v4981_v36  ;;  %v8578_v37 = vpop.f32.mrf.mxu0 }
0x237c   :  { %v4974_v38 = vpop.f32.mrf.mxu0 }
0x237d   :  { %v4984_v40 = vsel %vm518_vm8, %v4974_v38, -inf }
0x237e   :  { %4985 = vmax.xlane.f32.xlu0 %v4984_v40  ;;  %v8581_v41 = vpop.f32.mrf.mxu0 }
0x238b   :  { %5013 = vrot.lane.b32.xlu1 %v10446_v39, %s11451_s2 }
0x23fc   :  { %v4857_v43 = vpop.f32.mrf.mxu1 }
0x23fd   :  { %v10719_v28 = vadd.f32 %v4857_v43, %v10659_v56 }
0x23fe   :  { %v8560_v30 = vpop.f32.mrf.mxu1 }
0x23ff   :  { %v4980_v29 = vpop.xlane.xlu0 %4979 }
0x2400   :  { %v4987_v42 = vsub.f32 %v4964_v14, %v4980_v29  ;;  %v4862_v27 = vpop.f32.mrf.mxu1  ;;  %v3678_v14 = vadd.f32 %v9185_v62, %v10496_v32 }
0x2401   :  { %v10722_v63 = vadd.f32 %v4862_v27, %v10664_v7 }
0x2402   :  { %v4990_v2 = vmul.f32 1.442695, %v4987_v42  ;;  %v8563_v10 = vpop.f32.mrf.mxu1  ;;  %v10767_v37 = vadd.f32 %v3678_v14, %v10339_v26 }
0x2403   :  { %v4983_v19 = vpop.xlane.xlu1 %4982 }
0x2404   :  { %9072 = vpow2.f32 %v4990_v2  ;;  %v4988_v0 = vsub.f32 %v4969_v33, %v4983_v19 }
0x2406   :  { %v4992_v53 = vmul.f32 1.442695, %v4988_v0 }
0x2407   :  { %v4986_v11 = vpop.xlane.xlu0 %4985  ;;  %v5014_v12 = vpop.permute.xlu1 %5013 }
0x2408   :  { %9074 = vpow2.f32 %v4992_v53  ;;  %v4989_v39 = vsub.f32 %v4974_v38, %v4986_v11 }
0x240a   :  { %v4994_v23 = vmul.f32 1.442695, %v4989_v39 }
0x240c   :  { %9076 = vpow2.f32 %v4994_v23 }
0x2411   :  { %v9073_v56 = vpop.eup %9072 }
0x2412   :  { %v4996_v51 = vsel %vm511_vm7, %v9073_v56, 0.0 }
0x2413   :  { %4997 = vadd.xlane.f32.xlu0 %v4996_v51 }
0x2415   :  { %v9075_v46 = vpop.eup %9074 }
0x2416   :  { %v4999_v31 = vsel %vm511_vm7, %v9075_v46, 0.0 }
0x2417   :  { %5000 = vadd.xlane.f32.xlu0 %v4999_v31 }
0x2419   :  { %v9077_v7 = vpop.eup %9076 }
0x241a   :  { %v5002_v17 = vsel %vm518_vm8, %v9077_v7, 0.0 }
0x241b   :  { %5003 = vadd.xlane.f32.xlu1 %v5002_v17 }
0x242c   :  { %5011 = vrot.lane.b32.xlu1 %v10450_v4, %s11451_s2 }
0x242d   :  { %5015 = vrot.lane.b32.xlu0 %v10452_v3, %s11451_s2 }
0x2431   :  { %v4867_v61 = vpop.f32.mrf.mxu1 }
0x2432   :  { %v4873_v1 = vadd.f32 %v4867_v61, %v10667_v8 }
0x2433   :  { %v8566_v25 = vpop.f32.mrf.mxu1 }
0x249c   :  { %v4998_v35 = vpop.xlane.xlu0 %4997 }
0x249d   :  { %9078 = vrcp.f32 %v4998_v35 }
0x24a0   :  { %v5001_v16 = vpop.xlane.xlu0 %5000 }
0x24a1   :  { %9080 = vrcp.f32 %v5001_v16 }
0x24a4   :  { %v5004_v4 = vpop.xlane.xlu1 %5003  ;;  %v5016_v34 = vpop.permute.xlu0 %5015 }
0x24a5   :  { %9082 = vrcp.f32 %v5004_v4  ;;  %8583 = vmatpush3.msk.msra.mxu1 %vm201_vm3, %v5016_v34 }
0x24a6   :  { %8584 = vmatprep.subr.mxu1 %v9227_v48 }
0x24a7   :  { %8585 = vmatpush3.msra.mxu1 %v5014_v12 }
0x24a8   :  { %v5012_v3 = vpop.permute.xlu1 %5011  ;;  %8586 = vmatprep.subr.mxu1 %v9227_v48 }
0x24a9   :  { %8587 = vmatpush3.msra.mxu1 %v5012_v3 }
0x24aa   :  { %v9079_v8 = vpop.eup %9078  ;;  %8608 = vmatprep.subr.mxu1 %v9227_v48 }
0x24ab   :  { %v5008_v44 = vmul.f32 %v9079_v8, %v9073_v56 }
0x24ad   :  { %8589 = vmatmul.mubr.msk.f32.vlgmr.msra.gmra.mxu1 %vm511_vm7, %v5008_v44 }
0x24ae   :  { %v9081_v45 = vpop.eup %9080  ;;  %8591 = vmatprep.mubr.msk.f32.mxu1 %vm9228_vm5, %v9227_v48 }
0x24af   :  { %v5009_v50 = vmul.f32 %v9081_v45, %v9075_v46 }
0x24b1   :  { %8592 = vmatmul.mubr.msk.f32.gmra.mxu1 %vm511_vm7, %v5009_v50 }
0x24b2   :  { %v9083_v47 = vpop.eup %9082  ;;  %8594 = vmatprep.mubr.msk.f32.mxu1 %vm9228_vm5, %v9227_v48 }
0x24b3   :  { %v5010_v13 = vmul.f32 %v9083_v47, %v9077_v7  ;;  %v7441_v47 = vld [vmem:[%s11400_s12 + $0x38] sm:$0xff] }
0x24b4   :  { %8609 = vmatpush3.msra.mxu1 %v7441_v47  ;;  %v10930_v47 = vld [vmem:[%s11402_s14 + $0x50] sm:$0xff] }
0x24b5   :  { %8595 = vmatmul.mubr.msk.f32.gmra.mxu1 %vm511_vm7, %v5010_v13  ;;  %8610 = vmatprep.subr.mxu1 %v9227_v48  ;;  %v7440_v13 = vld [vmem:[%s11400_s12 + $0x30] sm:$0xff] }
0x24b6   :  { %8616 = vmatprep.mubr.msk.f32.mxu1 %vm9228_vm5, %v9227_v48  ;;  %8611 = vmatpush3.msra.mxu1 %v7440_v13  ;;  %v10937_v13 = vld [vmem:[%s11402_s14 + $0x48] sm:$0xff] }
0x24b7   :  { %8612 = vmatprep.subr.mxu1 %v9227_v48 }
0x256d   :  { %v5096_v15 = vpop.f32.mrf.mxu1 }
0x256e   :  { %8600 = vmatmul.mubr.msk.f32.vlgmr.msra.gmra.mxu0 %vm415_vm6, %v5096_v15  ;;  %v7439_v15 = vld [vmem:[%s11400_s12 + $0x28] sm:$0xff] }
0x256f   :  { %v8590_v49 = vpop.f32.mrf.mxu1  ;;  %8602 = vmatprep.mubr.msk.f32.mxu0 %vm9228_vm5, %v9227_v48  ;;  %8613 = vmatpush3.msra.mxu1 %v7439_v15  ;;  %v10944_v15 = vld [vmem:[%s11402_s14 + $0x40] sm:$0xff] }
0x2570   :  { %8614 = vmatprep.subr.mxu1 %v9227_v48  ;;  %v7438_v49 = vld [vmem:[%s11400_s12 + $0x20] sm:$0xff] }
0x2571   :  { %v5101_v52 = vpop.f32.mrf.mxu1  ;;  %8615 = vmatpush3.msra.mxu1 %v7438_v49  ;;  %v7513_v49 = vld [vmem:[%s11401_s13 + $0x1] ss:$0 sm:$0xff] }
0x2572   :  { %8603 = vmatmul.mubr.msk.f32.gmra.mxu0 %vm415_vm6, %v5101_v52  ;;  %8650 = vmatprep.subr.mxu1 %v9227_v48 }
0x2573   :  { %v8593_v54 = vpop.f32.mrf.mxu1  ;;  %8605 = vmatprep.mubr.msk.f32.mxu0 %vm9228_vm5, %v9227_v48 }
0x2575   :  { %v5106_v55 = vpop.f32.mrf.mxu1 }
0x2576   :  { %8606 = vmatmul.mubr.msk.f32.gmra.mxu0 %vm415_vm6, %v5106_v55 }
0x2577   :  { %v8596_v57 = vpop.f32.mrf.mxu1  ;;  %8641 = vmatprep.mubr.msk.f32.mxu0 %vm9228_vm5, %v9227_v48 }
0x262e   :  { %v5185_v58 = vpop.f32.mrf.mxu0 }
0x262f   :  { %v5199_v18 = vadd.f32 %v5185_v58, %v10719_v28  ;;  %v3673_v28 = vadd.f32 %v9185_v62, %v10494_v6 }
0x2630   :  { %v8601_v59 = vpop.f32.mrf.mxu0 }
0x2631   :  { %v10764_v33 = vadd.f32 %v5199_v18, %v10332_v60  ;;  %v5469_v60 = vsel %vm248_vm4, %v10767_v37, 0.0  ;;  %v10779_v27 = vadd.f32 %v3673_v28, %v10329_v24 }
0x2632   :  { %v5190_v36 = vpop.f32.mrf.mxu0 }
0x2633   :  { %v5200_v38 = vadd.f32 %v5190_v36, %v10722_v63  ;;  %v5205_v40 = vsel %vm248_vm4, %v10764_v33, 0.0  ;;  %v3683_v63 = vadd.f32 %v9185_v62, %v10498_v22  ;;  %v5466_v2 = vsel %vm248_vm4, %v10779_v27, 0.0 }
0x2634   :  { %5206 = vadd.xlane.f32.xlu1 %v5205_v40  ;;  %v8604_v41 = vpop.f32.mrf.mxu0 }
0x2635   :  { %v5203_v43 = vadd.f32 %v5200_v38, %v10354_v9  ;;  %v10784_v6 = vadd.f32 %v3683_v63, %v10351_v21  ;;  %v7512_v63 = vld [vmem:[%s11399_s11 + $0x1] ss:$0 sm:$0xff] }
0x2636   :  { %v5195_v32 = vpop.f32.mrf.mxu0 }
0x2637   :  { %v5201_v30 = vadd.f32 %v5195_v32, %v4873_v1  ;;  %v5208_v29 = vsel %vm248_vm4, %v5203_v43, 0.0  ;;  %v5472_v10 = vsel %vm255_vm2, %v10784_v6, 0.0 }
0x2638   :  { %5470 = vadd.xlane.f32.xlu1 %v5469_v60  ;;  %5209 = vadd.xlane.f32.xlu0 %v5208_v29  ;;  %v8607_v26 = vpop.f32.mrf.mxu0  ;;  %v7511_v29 = vld [vmem:[%s11398_s10 + $0x1] ss:$0 sm:$0xff] }
0x2639   :  { %v5204_v42 = vadd.f32 %v5201_v30, %v10343_v5 }
0x263b   :  { %v5211_v9 = vsel %vm255_vm2, %v5204_v42, 0.0 }
0x263c   :  { %5212 = vadd.xlane.f32.xlu0 %v5211_v9 }
0x2640   :  { %5467 = vadd.xlane.f32.xlu0 %v5466_v2 }
0x2644   :  { %5473 = vadd.xlane.f32.xlu0 %v5472_v10 }
0x26bd   :  { %v5207_v5 = vpop.xlane.xlu1 %5206 }
0x26be   :  { %v5214_v19 = vmul.f32 0.03125, %v5207_v5 }
0x26c0   :  { %v10791_v24 = vsub.f32 %v10764_v33, %v5214_v19 }
0x26c1   :  { %v5471_v22 = vpop.xlane.xlu1 %5470  ;;  %v5210_v0 = vpop.xlane.xlu0 %5209 }
0x26c2   :  { %v5215_v53 = vmul.f32 0.03125, %v5210_v0  ;;  %v5220_v21 = vmul.f32 %v10791_v24, %v10791_v24  ;;  %v5476_v11 = vmul.f32 0.03125, %v5471_v22 }
0x26c4   :  { %v10795_v39 = vsub.f32 %v5203_v43, %v5215_v53  ;;  %v5223_v23 = vsel %vm248_vm4, %v5220_v21, 0.0  ;;  %v10801_v31 = vsub.f32 %v10767_v37, %v5476_v11  ;;  %v9187_v21 = vld [vmem:[%s11394_s6 + $0x30] sm:$0xff] }
0x26c5   :  { %5224 = vadd.xlane.f32.xlu1 %v5223_v23  ;;  %v5213_v56 = vpop.xlane.xlu0 %5212  ;;  %v9188_v23 = vld [vmem:[%s11394_s6 + $0x28] sm:$0xff] }
0x26c6   :  { %v5216_v51 = vmul.f32 0.03125, %v5213_v56  ;;  %v5221_v46 = vmul.f32 %v10795_v39, %v10795_v39  ;;  %v5482_v12 = vmul.f32 %v10801_v31, %v10801_v31 }
0x26c8   :  { %v10803_v7 = vsub.f32 %v5204_v42, %v5216_v51  ;;  %v5226_v17 = vsel %vm248_vm4, %v5221_v46, 0.0  ;;  %v5487_v8 = vsel %vm248_vm4, %v5482_v12, 0.0 }
0x26c9   :  { %5227 = vadd.xlane.f32.xlu0 %v5226_v17  ;;  %v5468_v61 = vpop.xlane.xlu0 %5467  ;;  %v9189_v17 = vld [vmem:[%s11394_s6 + $0x20] sm:$0xff] }
0x26ca   :  { %v5475_v1 = vmul.f32 0.03125, %v5468_v61  ;;  %v5222_v25 = vmul.f32 %v10803_v7, %v10803_v7 }
0x26cc   :  { %v10809_v20 = vsub.f32 %v10779_v27, %v5475_v1  ;;  %v5229_v35 = vsel %vm255_vm2, %v5222_v25, 0.0  ;;  %v9190_v1 = vld [vmem:[%s11447_s1 + $0x1] ss:$0 sm:$0xff] }
0x26cd   :  { %5230 = vadd.xlane.f32.xlu1 %v5229_v35  ;;  %v5474_v16 = vpop.xlane.xlu0 %5473 }
0x26ce   :  { %v5477_v4 = vmul.f32 0.03125, %v5474_v16  ;;  %v5481_v34 = vmul.f32 %v10809_v20, %v10809_v20 }
0x26d0   :  { %v10817_v3 = vsub.f32 %v10784_v6, %v5477_v4  ;;  %v5484_v44 = vsel %vm248_vm4, %v5481_v34, 0.0 }
0x26d1   :  { %5488 = vadd.xlane.f32.xlu1 %v5487_v8  ;;  %5485 = vadd.xlane.f32.xlu0 %v5484_v44  ;;  %v10902_v8 = vld [vmem:[%s11402_s14 + $0x70] sm:$0xff]  ;;  %v10909_v44 = vld [vmem:[%s11402_s14 + $0x68] sm:$0xff] }
0x26d2   :  { %v5483_v45 = vmul.f32 %v10817_v3, %v10817_v3 }
0x26d4   :  { %v5490_v50 = vsel %vm255_vm2, %v5483_v45, 0.0  ;;  %v10916_v45 = vld [vmem:[%s11402_s14 + $0x60] sm:$0xff] }
0x26d5   :  { %5491 = vadd.xlane.f32.xlu0 %v5490_v50  ;;  %v10923_v50 = vld [vmem:[%s11402_s14 + $0x58] sm:$0xff] }
0x274e   :  { %v5225_v52 = vpop.xlane.xlu1 %5224 }
0x274f   :  { %v5232_v54 = vmul.f32 0.03125, %v5225_v52 }
0x2751   :  { %v5235_v55 = vadd.f32 1e-05, %v5232_v54 }
0x2752   :  { %v5228_v57 = vpop.xlane.xlu0 %5227 }
0x2753   :  { %9084 = vrsqrt.f32 %v5235_v55  ;;  %v5233_v58 = vmul.f32 0.03125, %v5228_v57 }
0x2755   :  { %v5236_v62 = vadd.f32 1e-05, %v5233_v58 }
0x2756   :  { %v5231_v14 = vpop.xlane.xlu1 %5230 }
0x2757   :  { %9086 = vrsqrt.f32 %v5236_v62  ;;  %v5234_v18 = vmul.f32 0.03125, %v5231_v14 }
0x2759   :  { %v5237_v59 = vadd.f32 1e-05, %v5234_v18 }
0x275a   :  { %v5489_v36 = vpop.xlane.xlu1 %5488  ;;  %v5486_v38 = vpop.xlane.xlu0 %5485 }
0x275b   :  { %9088 = vrsqrt.f32 %v5237_v59  ;;  %v5494_v40 = vmul.f32 0.03125, %v5489_v36  ;;  %v5493_v41 = vmul.f32 0.03125, %v5486_v38 }
0x275d   :  { %v5497_v43 = vadd.f32 1e-05, %v5494_v40  ;;  %v5496_v32 = vadd.f32 1e-05, %v5493_v41 }
0x275e   :  { %v5492_v28 = vpop.xlane.xlu0 %5491 }
0x275f   :  { %9090 = vrsqrt.f32 %v5497_v43  ;;  %v5495_v30 = vmul.f32 0.03125, %v5492_v28 }
0x2760   :  { %v9085_v60 = vpop.eup %9084  ;;  %9092 = vrsqrt.f32 %v5496_v32 }
0x2761   :  { %v5241_v26 = vmul.f32 %v9085_v60, %v10791_v24  ;;  %v5498_v42 = vadd.f32 1e-05, %v5495_v30  ;;  %v9186_v24 = vld [vmem:[%s11394_s6 + $0x38] sm:$0xff]  ;;  %v9192_v30 = vld [vmem:[%s11395_s7 + $0x1] ss:$0 sm:$0xff]  ;;  %s11458_s6 = smov 64  }
0x2763   :  { %v5250_v9 = vmul.f32 %v7511_v29, %v5241_v26  ;;  %9094 = vrsqrt.f32 %v5498_v42 }
0x2764   :  { %v9087_v2 = vpop.eup %9086 }
0x2765   :  { %v5259_v10 = vadd.f32 %v7512_v63, %v5250_v9  ;;  %v5242_v5 = vmul.f32 %v9087_v2, %v10795_v39 }
0x2767   :  { %8617 = vmatmul.mubr.msk.f32.vlgmr.msra.gmra.mxu1 %vm248_vm4, %v5259_v10  ;;  %v5251_v19 = vmul.f32 %v7511_v29, %v5242_v5 }
0x2768   :  { %v9089_v22 = vpop.eup %9088  ;;  %8619 = vmatprep.mubr.msk.f32.mxu1 %vm9228_vm5, %v9227_v48  ;;  %8651 = vmatpush3.msra.mxu1 %v9186_v24 }
0x2769   :  { %v5243_v0 = vmul.f32 %v9089_v22, %v10803_v7  ;;  %v5260_v53 = vadd.f32 %v7512_v63, %v5251_v19  ;;  %8652 = vmatprep.subr.mxu1 %v9227_v48 }
0x276a   :  { %8653 = vmatpush3.msra.mxu1 %v9187_v21 }
0x276b   :  { %8620 = vmatmul.mubr.msk.f32.gmra.mxu1 %vm248_vm4, %v5260_v53  ;;  %v5252_v11 = vmul.f32 %v7511_v29, %v5243_v0  ;;  %8654 = vmatprep.subr.mxu1 %v9227_v48 }
0x276c   :  { %v9091_v39 = vpop.eup %9090  ;;  %8622 = vmatprep.mubr.msk.f32.mxu1 %vm9228_vm5, %v9227_v48  ;;  %8655 = vmatpush3.msra.mxu1 %v9188_v23 }
0x276d   :  { %v9093_v56 = vpop.eup %9092  ;;  %v5261_v51 = vadd.f32 %v7512_v63, %v5252_v11  ;;  %8656 = vmatprep.subr.mxu1 %v9227_v48  ;;  %v5503_v46 = vmul.f32 %v9091_v39, %v10801_v31  ;;  %v9191_v31 = vld [vmem:[%s11393_s5 + $0x1] ss:$0 sm:$0xff] }
0x276e   :  { %v5502_v7 = vmul.f32 %v9093_v56, %v10809_v20  ;;  %8657 = vmatpush3.msra.mxu1 %v9189_v17 }
0x276f   :  { %8623 = vmatmul.mubr.msk.f32.gmra.mxu1 %vm248_vm4, %v5261_v51  ;;  %8682 = vmatprep.subr.mxu1 %v9227_v48  ;;  %v5506_v12 = vmul.f32 %v9190_v1, %v5503_v46 }
0x2770   :  { %v9095_v61 = vpop.eup %9094  ;;  %v5505_v25 = vmul.f32 %v9190_v1, %v5502_v7  ;;  %8658 = vmatprep.mubr.msk.f32.mxu1 %vm9228_vm5, %v9227_v48  ;;  %v9193_v7 = vld [vmem:[%s11396_s8 + $0x20] sm:$0xff] }
0x2771   :  { %v5504_v35 = vmul.f32 %v9095_v61, %v10817_v3  ;;  %v5509_v16 = vadd.f32 %v9191_v31, %v5506_v12  ;;  %v10895_v3 = vld [vmem:[%s11402_s14 + $0x78] sm:$0xff] }
0x2772   :  { %v5508_v20 = vadd.f32 %v9191_v31, %v5505_v25  ;;  %8626 = vmatpush3.msra.mxu0 %v10895_v3 }
0x2773   :  { %v5507_v4 = vmul.f32 %v9190_v1, %v5504_v35  ;;  %8627 = vmatprep.subr.mxu0 %v9227_v48 }
0x2774   :  { %8659 = vmatmul.mubr.msk.f32.vlgmr.msra.gmra.mxu1 %vm248_vm4, %v5508_v20  ;;  %8628 = vmatpush3.msra.mxu0 %v10902_v8 }
0x2775   :  { %8661 = vmatprep.mubr.msk.f32.mxu1 %vm9228_vm5, %v9227_v48  ;;  %v5510_v34 = vadd.f32 %v9191_v31, %v5507_v4  ;;  %8629 = vmatprep.subr.mxu0 %v9227_v48 }
0x2776   :  { %8630 = vmatpush3.msra.mxu0 %v10909_v44 }
0x2777   :  { %8631 = vmatprep.subr.mxu0 %v9227_v48 }
0x2778   :  { %8662 = vmatmul.mubr.msk.f32.gmra.mxu1 %vm248_vm4, %v5509_v16  ;;  %8632 = vmatpush3.msra.mxu0 %v10916_v45 }
0x2779   :  { %8664 = vmatprep.mubr.msk.f32.mxu1 %vm9228_vm5, %v9227_v48  ;;  %8633 = vmatprep.subr.mxu0 %v9227_v48 }
0x277a   :  { %8634 = vmatpush3.msra.mxu0 %v10923_v50 }
0x277b   :  { %8635 = vmatprep.subr.mxu0 %v9227_v48 }
0x277c   :  { %8665 = vmatmul.mubr.msk.f32.gmra.mxu1 %vm248_vm4, %v5510_v34  ;;  %8636 = vmatpush3.msra.mxu0 %v10930_v47 }
0x277d   :  { %8688 = vmatprep.mubr.msk.f32.mxu1 %vm9228_vm5, %v9227_v48  ;;  %8637 = vmatprep.subr.mxu0 %v9227_v48 }
0x277e   :  { %8638 = vmatpush3.msra.mxu0 %v10937_v13 }
0x277f   :  { %8639 = vmatprep.subr.mxu0 %v9227_v48 }
0x2780   :  { %8640 = vmatpush3.msra.mxu0 %v10944_v15 }
0x2781   :  { %8667 = vmatprep.subr.mxu0 %v9227_v48 }
0x2827   :  { %v5343_v52 = vpop.f32.mrf.mxu1 }
0x2828   :  { %v5344_v54 = vadd.f32 %v7513_v49, %v5343_v52 }
0x2829   :  { %v8618_v55 = vpop.f32.mrf.mxu1 }
0x282a   :  { %v5360_v57 = vmul.f32 0.70710677, %v5344_v54  ;;  %v5357_v29 = vmul.f32 0.5, %v5344_v54 }
0x282b   :  { %v5348_v58 = vpop.f32.mrf.mxu1 }
0x282c   :  { %9096 = verf.f32 %v5360_v57  ;;  %v5349_v62 = vadd.f32 %v7513_v49, %v5348_v58 }
0x282d   :  { %v8621_v14 = vpop.f32.mrf.mxu1 }
0x282e   :  { %v5361_v18 = vmul.f32 0.70710677, %v5349_v62  ;;  %v5358_v5 = vmul.f32 0.5, %v5349_v62 }
0x282f   :  { %v5353_v59 = vpop.f32.mrf.mxu1 }
0x2830   :  { %9098 = verf.f32 %v5361_v18  ;;  %v5354_v36 = vadd.f32 %v7513_v49, %v5353_v59 }
0x2831   :  { %v8624_v38 = vpop.f32.mrf.mxu1 }
0x2832   :  { %v5362_v40 = vmul.f32 0.70710677, %v5354_v36  ;;  %v5359_v21 = vmul.f32 0.5, %v5354_v36 }
0x2834   :  { %9100 = verf.f32 %v5362_v40  ;;  %v5586_v41 = vpop.f32.mrf.mxu1 }
0x2835   :  { %v10965_v53 = vadd.f32 %v9192_v30, %v5586_v41 }
0x2836   :  { %v8660_v43 = vpop.f32.mrf.mxu1 }
0x2837   :  { %v10981_v46 = vmul.f32 0.35355338, %v10965_v53 }
0x2838   :  { %v5591_v32 = vpop.f32.mrf.mxu1 }
0x2839   :  { %v9097_v28 = vpop.eup %9096  ;;  %v10954_v60 = vadd.f32 %v9192_v30, %v5591_v32 }
0x283a   :  { %v5366_v26 = vadd.f32 1.0, %v9097_v28  ;;  %v8663_v42 = vpop.f32.mrf.mxu1 }
0x283b   :  { %5608 = vrot.lane.b32.xlu0 %v10954_v60, %s11457_s20  ;;  %v10992_v17 = vmul.f32 0.35355338, %v10954_v60 }
0x283c   :  { %v5369_v63 = vmul.f32 %v5366_v26, %v5357_v29  ;;  %v5596_v9 = vpop.f32.mrf.mxu1 }
0x283d   :  { %v9099_v2 = vpop.eup %9098  ;;  %v10958_v10 = vadd.f32 %v9192_v30, %v5596_v9 }
0x283e   :  { %v5367_v19 = vadd.f32 1.0, %v9099_v2  ;;  %v8666_v22 = vpop.f32.mrf.mxu1  ;;  %8642 = vmatmul.mubr.msk.f32.vlgmr.msra.gmra.mxu0 %vm85_vm0, %v5369_v63 }
0x283f   :  { %5610 = vrot.lane.b32.xlu1 %v10958_v10, %s11457_s20  ;;  %8644 = vmatprep.mubr.msk.f32.mxu0 %vm9228_vm5, %v9227_v48  ;;  %v11000_v61 = vmul.f32 0.35355338, %v10958_v10 }
0x2840   :  { %v5370_v24 = vmul.f32 %v5367_v19, %v5358_v5 }
0x2841   :  { %v9101_v0 = vpop.eup %9100 }
0x2842   :  { %v5368_v11 = vadd.f32 1.0, %v9101_v0  ;;  %8645 = vmatmul.mubr.msk.f32.gmra.mxu0 %vm85_vm0, %v5370_v24 }
0x2843   :  { %5606 = vrot.lane.b32.xlu1 %v10965_v53, %s11457_s20  ;;  %8647 = vmatprep.mubr.msk.f32.mxu0 %vm9228_vm5, %v9227_v48 }
0x2844   :  { %v5371_v39 = vmul.f32 %v5368_v11, %v5359_v21 }
0x2846   :  { %8648 = vmatmul.mubr.msk.f32.gmra.mxu0 %vm85_vm0, %v5371_v39 }
0x2847   :  { %8673 = vmatprep.mubr.msk.f32.mxu0 %vm9228_vm5, %v9227_v48 }
0x28ad   :  { %v5609_v56 = vpop.permute.xlu0 %5608 }
0x28b1   :  { %v5611_v23 = vpop.permute.xlu1 %5610 }
0x28b2   :  { %8668 = vmatpush3.xpose.msk.msra.mxu0 %vm415_vm6, %v5611_v23 }
0x28b3   :  { %8669 = vmatprep.subr.mxu0 %v9227_v48 }
0x28b5   :  { %v5607_v51 = vpop.permute.xlu1 %5606 }
0x28b6   :  { %8670 = vmatpush3.xpose.msk.msra.mxu0 %vm415_vm6, %v5609_v56 }
0x28b7   :  { %8671 = vmatprep.subr.mxu0 %v9227_v48 }
0x28ba   :  { %8672 = vmatpush3.xpose.msk.msra.mxu0 %vm415_vm6, %v5607_v51 }
0x28bb   :  { %8697 = vmatprep.subr.mxu0 %v9227_v48 }
0x28bd   :  { %8674 = vmatmul.mubr.msk.f32.vlgmr.msra.gmra.mxu0 %vm415_vm6, %v10981_v46 }
0x28be   :  { %8676 = vmatprep.mubr.msk.f32.mxu0 %vm9228_vm5, %v9227_v48  ;;  %8698 = vmatpush3.msra.mxu0 %v9193_v7 }
0x28bf   :  { %8723 = vmatprep.subr.mxu0 %v9227_v48 }
0x28c1   :  { %8677 = vmatmul.mubr.msk.f32.gmra.mxu0 %vm415_vm6, %v10992_v17 }
0x28c2   :  { %8679 = vmatprep.mubr.msk.f32.mxu0 %vm9228_vm5, %v9227_v48 }
0x28c5   :  { %8680 = vmatmul.mubr.msk.f32.gmra.mxu0 %vm415_vm6, %v11000_v61 }
0x28c6   :  { %8699 = vmatprep.mubr.msk.f32.mxu0 %vm9228_vm5, %v9227_v48 }
0x28fe   :  { %v11006_v1 = vpop.f32.mrf.mxu0 }
0x2900   :  { %v8643_v25 = vpop.f32.mrf.mxu0 }
0x2902   :  { %v5458_v31 = vpop.f32.mrf.mxu0 }
0x2903   :  { %v9194_v31 = vld [vmem:[%s11396_s8 + $0x28] sm:$0xff] }
0x2904   :  { %v8646_v20 = vpop.f32.mrf.mxu0 }
0x2906   :  { %v5462_v35 = vpop.f32.mrf.mxu0 }
0x2908   :  { %v8649_v12 = vpop.f32.mrf.mxu0 }
0x297d   :  { %v5693_v16 = vpop.f32.mrf.mxu0 }
0x297e   :  { %v5707_v4 = vsel %vm511_vm7, %v5693_v16, -inf }
0x297f   :  { %5708 = vmax.xlane.f32.xlu1 %v5707_v4  ;;  %v8675_v34 = vpop.f32.mrf.mxu0 }
0x2981   :  { %v5698_v49 = vpop.f32.mrf.mxu0 }
0x2982   :  { %v5710_v52 = vsel %vm511_vm7, %v5698_v49, -inf }
0x2983   :  { %5711 = vmax.xlane.f32.xlu0 %v5710_v52  ;;  %v8678_v54 = vpop.f32.mrf.mxu0 }
0x2985   :  { %v5703_v55 = vpop.f32.mrf.mxu0 }
0x2986   :  { %v5713_v57 = vsel %vm518_vm8, %v5703_v55, -inf }
0x2987   :  { %5714 = vmax.xlane.f32.xlu0 %v5713_v57  ;;  %v8681_v58 = vpop.f32.mrf.mxu0 }
0x2990   :  { %5742 = vrot.lane.b32.xlu1 %v10954_v60, %s11458_s6 }
0x2994   :  { %5740 = vrot.lane.b32.xlu1 %v10965_v53, %s11458_s6 }
0x2998   :  { %5941 = vrot.lane.b32.xlu1 %v10958_v10, %s11452_s25 }
0x299d   :  { %5744 = vrot.lane.b32.xlu0 %v10958_v10, %s11458_s6 }
0x2a08   :  { %v5709_v62 = vpop.xlane.xlu1 %5708 }
0x2a09   :  { %v5716_v14 = vsub.f32 %v5693_v16, %v5709_v62 }
0x2a0b   :  { %v5719_v18 = vmul.f32 1.442695, %v5716_v14 }
0x2a0c   :  { %v5712_v59 = vpop.xlane.xlu0 %5711  ;;  %v5743_v41 = vpop.permute.xlu1 %5742 }
0x2a0d   :  { %9102 = vpow2.f32 %v5719_v18  ;;  %v5717_v36 = vsub.f32 %v5698_v49, %v5712_v59 }
0x2a0f   :  { %v5721_v38 = vmul.f32 1.442695, %v5717_v36 }
0x2a10   :  { %v5715_v40 = vpop.xlane.xlu0 %5714  ;;  %v5741_v32 = vpop.permute.xlu1 %5740 }
0x2a11   :  { %9104 = vpow2.f32 %v5721_v38  ;;  %v5718_v42 = vsub.f32 %v5703_v55, %v5715_v40 }
0x2a13   :  { %v5723_v63 = vmul.f32 1.442695, %v5718_v42 }
0x2a14   :  { %v5745_v43 = vpop.permute.xlu0 %5744  ;;  %v5942_v5 = vpop.permute.xlu1 %5941 }
0x2a15   :  { %8683 = vmatpush3.msk.msra.mxu1 %vm201_vm3, %v5745_v43  ;;  %9106 = vpow2.f32 %v5723_v63 }
0x2a16   :  { %8684 = vmatprep.subr.mxu1 %v9227_v48 }
0x2a17   :  { %8685 = vmatpush3.msra.mxu1 %v5743_v41 }
0x2a18   :  { %8686 = vmatprep.subr.mxu1 %v9227_v48 }
0x2a19   :  { %8687 = vmatpush3.msra.mxu1 %v5741_v32 }
0x2a1a   :  { %v9103_v28 = vpop.eup %9102  ;;  %8708 = vmatprep.subr.mxu1 %v9227_v48 }
0x2a1b   :  { %v5725_v30 = vsel %vm511_vm7, %v9103_v28, 0.0 }
0x2a1c   :  { %5726 = vadd.xlane.f32.xlu1 %v5725_v30 }
0x2a1e   :  { %v9105_v29 = vpop.eup %9104 }
0x2a1f   :  { %v5728_v26 = vsel %vm511_vm7, %v9105_v29, 0.0 }
0x2a20   :  { %5729 = vadd.xlane.f32.xlu0 %v5728_v26 }
0x2a22   :  { %v9107_v9 = vpop.eup %9106 }
0x2a23   :  { %v5731_v2 = vsel %vm518_vm8, %v9107_v9, 0.0 }
0x2a2d   :  { %5937 = vrot.lane.b32.xlu1 %v10965_v53, %s11452_s25 }
0x2a36   :  { %5939 = vrot.lane.b32.xlu0 %v10954_v60, %s11452_s25 }
0x2a3a   :  { %5931 = vrot.lane.b32.xlu0 %v10981_v46, %s11453_s30 }
0x2a3e   :  { %5935 = vrot.lane.b32.xlu0 %v11000_v61, %s11453_s30 }
0x2a51   :  { %5732 = vadd.xlane.f32.xlu1 %v5731_v2 }
0x2a62   :  { %5933 = vrot.lane.b32.xlu1 %v10992_v17, %s11453_s30 }
0x2aa5   :  { %v5727_v19 = vpop.xlane.xlu1 %5726 }
0x2aa6   :  { %9108 = vrcp.f32 %v5727_v19 }
0x2aa9   :  { %v5730_v22 = vpop.xlane.xlu0 %5729  ;;  %v5938_v23 = vpop.permute.xlu1 %5937 }
0x2aaa   :  { %9110 = vrcp.f32 %v5730_v22 }
0x2aad   :  { %v5940_v39 = vpop.permute.xlu0 %5939 }
0x2ab1   :  { %v5932_v25 = vpop.permute.xlu0 %5931 }
0x2ab3   :  { %v9109_v24 = vpop.eup %9108 }
0x2ab4   :  { %v5737_v0 = vmul.f32 %v9109_v24, %v9103_v28 }
0x2ab5   :  { %v5936_v35 = vpop.permute.xlu0 %5935 }
0x2ab6   :  { %8689 = vmatmul.mubr.msk.f32.vlgmr.msra.gmra.mxu1 %vm511_vm7, %v5737_v0 }
0x2ab7   :  { %v9111_v21 = vpop.eup %9110  ;;  %8709 = vmatpush3.xpose.msk.msra.mxu1 %vm415_vm6, %v5942_v5  ;;  %8691 = vmatprep.mubr.msk.f32.mxu1 %vm9228_vm5, %v9227_v48 }
0x2ab8   :  { %8710 = vmatprep.subr.mxu1 %v9227_v48  ;;  %v5738_v11 = vmul.f32 %v9111_v21, %v9105_v29 }
0x2aba   :  { %8692 = vmatmul.mubr.msk.f32.gmra.mxu1 %vm511_vm7, %v5738_v11 }
0x2abb   :  { %8711 = vmatpush3.xpose.msk.msra.mxu1 %vm415_vm6, %v5940_v39  ;;  %8694 = vmatprep.mubr.msk.f32.mxu1 %vm9228_vm5, %v9227_v48 }
0x2abc   :  { %8712 = vmatprep.subr.mxu1 %v9227_v48 }
0x2abf   :  { %8713 = vmatpush3.xpose.msk.msra.mxu1 %vm415_vm6, %v5938_v23 }
0x2ac0   :  { %8738 = vmatprep.subr.mxu1 %v9227_v48 }
0x2ada   :  { %v5733_v56 = vpop.xlane.xlu1 %5732 }
0x2adb   :  { %9112 = vrcp.f32 %v5733_v56 }
0x2ade   :  { %v5934_v20 = vpop.permute.xlu1 %5933 }
0x2ae8   :  { %v9113_v51 = vpop.eup %9112 }
0x2ae9   :  { %v5739_v7 = vmul.f32 %v9113_v51, %v9107_v9 }
0x2aeb   :  { %8695 = vmatmul.mubr.msk.f32.gmra.mxu1 %vm511_vm7, %v5739_v7 }
0x2aec   :  { %8714 = vmatprep.mubr.msk.f32.mxu1 %vm9228_vm5, %v9227_v48 }
0x2aef   :  { %8715 = vmatmul.mubr.msk.f32.vlgmr.msra.gmra.mxu1 %vm415_vm6, %v5932_v25 }
0x2af0   :  { %8717 = vmatprep.mubr.msk.f32.mxu1 %vm9228_vm5, %v9227_v48  ;;  %8739 = vmatpush3.msra.mxu1 %v9194_v31 }
0x2af1   :  { %8764 = vmatprep.subr.mxu1 %v9227_v48 }
0x2af3   :  { %8718 = vmatmul.mubr.msk.f32.gmra.mxu1 %vm415_vm6, %v5934_v20 }
0x2af4   :  { %8720 = vmatprep.mubr.msk.f32.mxu1 %vm9228_vm5, %v9227_v48 }
0x2af7   :  { %8721 = vmatmul.mubr.msk.f32.gmra.mxu1 %vm415_vm6, %v5936_v35 }
0x2af8   :  { %8740 = vmatprep.mubr.msk.f32.mxu1 %vm9228_vm5, %v9227_v48 }
0x2b76   :  { %v5825_v12 = vpop.f32.mrf.mxu1 }
0x2b77   :  { %8700 = vmatmul.mubr.msk.f32.vlgmr.msra.gmra.mxu0 %vm415_vm6, %v5825_v12 }
0x2b78   :  { %v8690_v16 = vpop.f32.mrf.mxu1  ;;  %8702 = vmatprep.mubr.msk.f32.mxu0 %vm9228_vm5, %v9227_v48 }
0x2b7a   :  { %v5830_v4 = vpop.f32.mrf.mxu1 }
0x2b7b   :  { %8703 = vmatmul.mubr.msk.f32.gmra.mxu0 %vm415_vm6, %v5830_v4 }
0x2b7c   :  { %v8693_v34 = vpop.f32.mrf.mxu1  ;;  %8705 = vmatprep.mubr.msk.f32.mxu0 %vm9228_vm5, %v9227_v48 }
0x2bab   :  { %v5835_v49 = vpop.f32.mrf.mxu1 }
0x2bac   :  { %8706 = vmatmul.mubr.msk.f32.gmra.mxu0 %vm415_vm6, %v5835_v49 }
0x2bad   :  { %v8696_v52 = vpop.f32.mrf.mxu1  ;;  %8729 = vmatprep.mubr.msk.f32.mxu0 %vm9228_vm5, %v9227_v48 }
0x2baf   :  { %v6021_v54 = vpop.f32.mrf.mxu1 }
0x2bb0   :  { %v6035_v55 = vsel %vm511_vm7, %v6021_v54, -inf }
0x2bb1   :  { %6036 = vmax.xlane.f32.xlu1 %v6035_v55  ;;  %v8716_v57 = vpop.f32.mrf.mxu1 }
0x2bb2   :  { %v9195_v57 = vld [vmem:[%s11396_s8 + $0x30] sm:$0xff] }
0x2bb3   :  { %v6026_v58 = vpop.f32.mrf.mxu1 }
0x2bb4   :  { %v6038_v62 = vsel %vm511_vm7, %v6026_v58, -inf }
0x2bb5   :  { %6039 = vmax.xlane.f32.xlu0 %v6038_v62  ;;  %v8719_v14 = vpop.f32.mrf.mxu1 }
0x2bb7   :  { %v6031_v18 = vpop.f32.mrf.mxu1 }
0x2bb8   :  { %v6041_v59 = vsel %vm518_vm8, %v6031_v18, -inf }
0x2bb9   :  { %6042 = vmax.xlane.f32.xlu0 %v6041_v59  ;;  %v8722_v36 = vpop.f32.mrf.mxu1 }
0x2bc2   :  { %6072 = vrot.lane.b32.xlu1 %v10958_v10, %s11454_s0 }
0x2bc6   :  { %6068 = vrot.lane.b32.xlu1 %v10965_v53, %s11454_s0 }
0x2bca   :  { %6269 = vrot.lane.b32.xlu1 %v10958_v10, %s11455_s23 }
0x2bce   :  { %6267 = vrot.lane.b32.xlu1 %v10954_v60, %s11455_s23 }
0x2c37   :  { %v11084_v38 = vpop.f32.mrf.mxu0 }
0x2c39   :  { %v8701_v40 = vpop.f32.mrf.mxu0 }
0x2c3a   :  { %v6037_v41 = vpop.xlane.xlu1 %6036 }
0x2c3b   :  { %v6044_v43 = vsub.f32 %v6021_v54, %v6037_v41  ;;  %v11086_v32 = vpop.f32.mrf.mxu0 }
0x2c3d   :  { %v6047_v28 = vmul.f32 1.442695, %v6044_v43  ;;  %v8704_v30 = vpop.f32.mrf.mxu0 }
0x2c3e   :  { %v6073_v29 = vpop.permute.xlu1 %6072  ;;  %v6040_v26 = vpop.xlane.xlu0 %6039 }
0x2c3f   :  { %9114 = vpow2.f32 %v6047_v28  ;;  %v6045_v42 = vsub.f32 %v6026_v58, %v6040_v26  ;;  %8724 = vmatpush3.msk.msra.mxu0 %vm201_vm3, %v6073_v29 }
0x2c40   :  { %8725 = vmatprep.subr.mxu0 %v9227_v48 }
0x2c41   :  { %v6049_v63 = vmul.f32 1.442695, %v6045_v42 }
0x2c42   :  { %v6043_v22 = vpop.xlane.xlu0 %6042  ;;  %v6069_v56 = vpop.permute.xlu1 %6068 }
0x2c43   :  { %9116 = vpow2.f32 %v6049_v63  ;;  %v6046_v24 = vsub.f32 %v6031_v18, %v6043_v22 }
0x2c45   :  { %v6051_v21 = vmul.f32 1.442695, %v6046_v24 }
0x2c46   :  { %v6270_v51 = vpop.permute.xlu1 %6269 }
0x2c47   :  { %9118 = vpow2.f32 %v6051_v21 }
0x2c4a   :  { %v6268_v7 = vpop.permute.xlu1 %6267 }
0x2c4c   :  { %v9115_v9 = vpop.eup %9114 }
0x2c4d   :  { %v6053_v2 = vsel %vm511_vm7, %v9115_v9, 0.0 }
0x2c4e   :  { %6054 = vadd.xlane.f32.xlu0 %v6053_v2 }
0x2c50   :  { %v9117_v5 = vpop.eup %9116 }
0x2c51   :  { %v6056_v19 = vsel %vm511_vm7, %v9117_v5, 0.0 }
0x2c52   :  { %6057 = vadd.xlane.f32.xlu1 %v6056_v19 }
0x2c54   :  { %v9119_v39 = vpop.eup %9118 }
0x2c55   :  { %v6059_v23 = vsel %vm518_vm8, %v9119_v39, 0.0 }
0x2c63   :  { %6259 = vrot.lane.b32.xlu1 %v10981_v46, %s11456_s4 }
0x2c64   :  { %6070 = vrot.lane.b32.xlu0 %v10954_v60, %s11454_s0 }
0x2c67   :  { %6263 = vrot.lane.b32.xlu1 %v11000_v61, %s11456_s4 }
0x2c6c   :  { %v11098_v0 = vpop.f32.mrf.mxu0 }
0x2c6e   :  { %v8707_v11 = vpop.f32.mrf.mxu0 }
0x2c83   :  { %6060 = vadd.xlane.f32.xlu0 %v6059_v23 }
0x2c99   :  { %6265 = vrot.lane.b32.xlu0 %v10965_v53, %s11455_s23 }
0x2c9d   :  { %6261 = vrot.lane.b32.xlu0 %v10992_v17, %s11456_s4 }
0x2cd7   :  { %v6055_v25 = vpop.xlane.xlu0 %6054 }
0x2cd8   :  { %9120 = vrcp.f32 %v6055_v25 }
0x2cdb   :  { %v6058_v31 = vpop.xlane.xlu1 %6057  ;;  %v6071_v20 = vpop.permute.xlu0 %6070 }
0x2cdc   :  { %9122 = vrcp.f32 %v6058_v31  ;;  %8726 = vmatpush3.msra.mxu0 %v6071_v20 }
0x2cdd   :  { %8727 = vmatprep.subr.mxu0 %v9227_v48 }
0x2cde   :  { %8728 = vmatpush3.msra.mxu0 %v6069_v56 }
0x2cdf   :  { %8749 = vmatprep.subr.mxu0 %v9227_v48  ;;  %v6260_v55 = vpop.permute.xlu1 %6259 }
0x2ce3   :  { %v6264_v62 = vpop.permute.xlu1 %6263 }
0x2ce5   :  { %v9121_v35 = vpop.eup %9120 }
0x2ce6   :  { %v6065_v12 = vmul.f32 %v9121_v35, %v9115_v9 }
0x2ce8   :  { %8730 = vmatmul.mubr.msk.f32.vlgmr.msra.gmra.mxu0 %vm511_vm7, %v6065_v12 }
0x2ce9   :  { %v9123_v16 = vpop.eup %9122  ;;  %8750 = vmatpush3.xpose.msk.msra.mxu0 %vm415_vm6, %v6270_v51  ;;  %8732 = vmatprep.mubr.msk.f32.mxu0 %vm9228_vm5, %v9227_v48 }
0x2cea   :  { %8751 = vmatprep.subr.mxu0 %v9227_v48  ;;  %v6066_v4 = vmul.f32 %v9123_v16, %v9117_v5  ;;  %v9196_v5 = vld [vmem:[%s11397_s9 + $0x1] ss:$0 sm:$0xff] }
0x2ceb   :  { %v5928_v19 = vadd.f32 %v9196_v5, %v11084_v38  ;;  %v5929_v11 = vadd.f32 %v9196_v5, %v11086_v32 }
0x2cec   :  { %8733 = vmatmul.mubr.msk.f32.gmra.mxu0 %vm511_vm7, %v6066_v4 }
0x2ced   :  { %8752 = vmatpush3.xpose.msk.msra.mxu0 %vm415_vm6, %v6268_v7  ;;  %8735 = vmatprep.mubr.msk.f32.mxu0 %vm9228_vm5, %v9227_v48 }
0x2cee   :  { %8753 = vmatprep.subr.mxu0 %v9227_v48 }
0x2d0c   :  { %v6061_v34 = vpop.xlane.xlu0 %6060 }
0x2d0d   :  { %9124 = vrcp.f32 %v6061_v34 }
0x2d10   :  { %v6266_v49 = vpop.permute.xlu0 %6265 }
0x2d11   :  { %8754 = vmatpush3.xpose.msk.msra.mxu0 %vm415_vm6, %v6266_v49 }
0x2d12   :  { %8779 = vmatprep.subr.mxu0 %v9227_v48 }
0x2d14   :  { %v6262_v58 = vpop.permute.xlu0 %6261 }
0x2d1a   :  { %v9125_v52 = vpop.eup %9124 }
0x2d1b   :  { %v6067_v54 = vmul.f32 %v9125_v52, %v9119_v39 }
0x2d1d   :  { %8736 = vmatmul.mubr.msk.f32.gmra.mxu0 %vm511_vm7, %v6067_v54 }
0x2d1e   :  { %8755 = vmatprep.mubr.msk.f32.mxu0 %vm9228_vm5, %v9227_v48 }
0x2d21   :  { %8756 = vmatmul.mubr.msk.f32.vlgmr.msra.gmra.mxu0 %vm415_vm6, %v6260_v55 }
0x2d22   :  { %8758 = vmatprep.mubr.msk.f32.mxu0 %vm9228_vm5, %v9227_v48  ;;  %8780 = vmatpush3.msra.mxu0 %v9195_v57 }
0x2d23   :  { %8805 = vmatprep.subr.mxu0 %v9227_v48 }
0x2d25   :  { %8759 = vmatmul.mubr.msk.f32.gmra.mxu0 %vm415_vm6, %v6262_v58 }
0x2d26   :  { %8761 = vmatprep.mubr.msk.f32.mxu0 %vm9228_vm5, %v9227_v48 }
0x2d29   :  { %8762 = vmatmul.mubr.msk.f32.gmra.mxu0 %vm415_vm6, %v6264_v62  ;;  %v5930_v62 = vadd.f32 %v9196_v5, %v11098_v0 }
0x2d2a   :  { %8781 = vmatprep.mubr.msk.f32.mxu0 %vm9228_vm5, %v9227_v48 }
0x2da8   :  { %v6153_v14 = vpop.f32.mrf.mxu0 }
0x2da9   :  { %8741 = vmatmul.mubr.msk.f32.vlgmr.msra.gmra.mxu1 %vm415_vm6, %v6153_v14 }
0x2daa   :  { %v8731_v18 = vpop.f32.mrf.mxu0  ;;  %8743 = vmatprep.mubr.msk.f32.mxu1 %vm9228_vm5, %v9227_v48 }
0x2dac   :  { %v6158_v59 = vpop.f32.mrf.mxu0 }
0x2dad   :  { %8744 = vmatmul.mubr.msk.f32.gmra.mxu1 %vm415_vm6, %v6158_v59 }
0x2dae   :  { %v8734_v36 = vpop.f32.mrf.mxu0  ;;  %8746 = vmatprep.mubr.msk.f32.mxu1 %vm9228_vm5, %v9227_v48 }
0x2ddd   :  { %v6163_v40 = vpop.f32.mrf.mxu0 }
0x2dde   :  { %8747 = vmatmul.mubr.msk.f32.gmra.mxu1 %vm415_vm6, %v6163_v40 }
0x2ddf   :  { %v8737_v41 = vpop.f32.mrf.mxu0  ;;  %8770 = vmatprep.mubr.msk.f32.mxu1 %vm9228_vm5, %v9227_v48 }
0x2de1   :  { %v6349_v43 = vpop.f32.mrf.mxu0 }
0x2de2   :  { %v6363_v28 = vsel %vm511_vm7, %v6349_v43, -inf }
0x2de3   :  { %6364 = vmax.xlane.f32.xlu0 %v6363_v28  ;;  %v8757_v30 = vpop.f32.mrf.mxu0 }
0x2de5   :  { %v6354_v29 = vpop.f32.mrf.mxu0 }
0x2de6   :  { %v6366_v26 = vsel %vm511_vm7, %v6354_v29, -inf }
0x2de7   :  { %6367 = vmax.xlane.f32.xlu1 %v6366_v26  ;;  %v8760_v42 = vpop.f32.mrf.mxu0 }
0x2de9   :  { %v6359_v63 = vpop.f32.mrf.mxu0 }
0x2dea   :  { %v6369_v9 = vsel %vm518_vm8, %v6359_v63, -inf }
0x2deb   :  { %6370 = vmax.xlane.f32.xlu0 %v6369_v9  ;;  %v8763_v2 = vpop.f32.mrf.mxu0  ;;  %v9197_v9 = vld [vmem:[%s11396_s8 + $0x38] sm:$0xff] }
0x2df8   :  { %6398 = vrot.lane.b32.xlu1 %v10954_v60, %s11448_s22 }
0x2dfc   :  { %6396 = vrot.lane.b32.xlu1 %v10965_v53, %s11448_s22 }
0x2e00   :  { %6597 = vrot.lane.b32.xlu1 %v10958_v10, %s11449_s28 }
0x2e01   :  { %6400 = vrot.lane.b32.xlu0 %v10958_v10, %s11448_s22 }
0x2e69   :  { %v6242_v22 = vpop.f32.mrf.mxu1 }
0x2e6a   :  { %v11159_v24 = vadd.f32 %v6242_v22, %v5928_v19 }
0x2e6b   :  { %v8742_v21 = vpop.f32.mrf.mxu1 }
0x2e6c   :  { %v6365_v39 = vpop.xlane.xlu0 %6364 }
0x2e6d   :  { %v6372_v23 = vsub.f32 %v6349_v43, %v6365_v39  ;;  %v6247_v56 = vpop.f32.mrf.mxu1 }
0x2e6e   :  { %v11162_v51 = vadd.f32 %v6247_v56, %v5929_v11 }
0x2e6f   :  { %v6375_v7 = vmul.f32 1.442695, %v6372_v23  ;;  %v8745_v25 = vpop.f32.mrf.mxu1 }
0x2e70   :  { %v6368_v31 = vpop.xlane.xlu1 %6367 }
0x2e71   :  { %9126 = vpow2.f32 %v6375_v7  ;;  %v6373_v20 = vsub.f32 %v6354_v29, %v6368_v31 }
0x2e73   :  { %v6377_v35 = vmul.f32 1.442695, %v6373_v20 }
0x2e74   :  { %v6371_v12 = vpop.xlane.xlu0 %6370  ;;  %v6399_v16 = vpop.permute.xlu1 %6398 }
0x2e75   :  { %9128 = vpow2.f32 %v6377_v35  ;;  %v6374_v38 = vsub.f32 %v6359_v63, %v6371_v12 }
0x2e77   :  { %v6379_v4 = vmul.f32 1.442695, %v6374_v38 }
0x2e78   :  { %v6401_v34 = vpop.permute.xlu0 %6400  ;;  %v6397_v32 = vpop.permute.xlu1 %6396 }
0x2e79   :  { %9130 = vpow2.f32 %v6379_v4  ;;  %8765 = vmatpush3.msk.msra.mxu1 %vm201_vm3, %v6401_v34 }
0x2e7a   :  { %8766 = vmatprep.subr.mxu1 %v9227_v48 }
0x2e7b   :  { %8767 = vmatpush3.msra.mxu1 %v6399_v16 }
0x2e7c   :  { %8768 = vmatprep.subr.mxu1 %v9227_v48  ;;  %v6598_v40 = vpop.permute.xlu1 %6597 }
0x2e7d   :  { %8769 = vmatpush3.msra.mxu1 %v6397_v32 }
0x2e7e   :  { %v9127_v49 = vpop.eup %9126  ;;  %8790 = vmatprep.subr.mxu1 %v9227_v48 }
0x2e7f   :  { %v6381_v52 = vsel %vm511_vm7, %v9127_v49, 0.0 }
0x2e80   :  { %6382 = vadd.xlane.f32.xlu0 %v6381_v52 }
0x2e82   :  { %v9129_v54 = vpop.eup %9128 }
0x2e83   :  { %v6384_v55 = vsel %vm511_vm7, %v9129_v54, 0.0 }
0x2e84   :  { %6385 = vadd.xlane.f32.xlu0 %v6384_v55 }
0x2e86   :  { %v9131_v57 = vpop.eup %9130 }
0x2e87   :  { %v6387_v58 = vsel %vm518_vm8, %v9131_v57, 0.0 }
0x2e88   :  { %6388 = vadd.xlane.f32.xlu1 %v6387_v58  ;;  %v9198_v58 = vld [vmem:[%s11400_s12 + $0x38] sm:$0xff] }
0x2e99   :  { %6593 = vrot.lane.b32.xlu1 %v10965_v53, %s11449_s28 }
0x2e9a   :  { %6595 = vrot.lane.b32.xlu0 %v10954_v60, %s11449_s28  ;;  %s11459_s28 = sld [smem:[#allocation10_spill]] }
0x2e9e   :  { %6587 = vrot.lane.b32.xlu0 %v10981_v46, %s11450_s24  ;;  %v6252_v14 = vpop.f32.mrf.mxu1 }
0x2e9f   :  { %v11178_v18 = vadd.f32 %v6252_v14, %v5930_v62  ;;  %v9199_v62 = vld [vmem:[%s11400_s12 + $0x30] sm:$0xff]  ;;  %v9200_v14 = vld [vmem:[%s11400_s12 + $0x28] sm:$0xff] }
0x2ea0   :  { %v8748_v59 = vpop.f32.mrf.mxu1 }
0x2ea2   :  { %6728 = vrot.lane.b32.xlu0 %v10958_v10, %s11451_s2 }
0x2f09   :  { %v6383_v36 = vpop.xlane.xlu0 %6382 }
0x2f0a   :  { %9132 = vrcp.f32 %v6383_v36 }
0x2f0d   :  { %v6386_v41 = vpop.xlane.xlu0 %6385 }
0x2f0e   :  { %9134 = vrcp.f32 %v6386_v41 }
0x2f11   :  { %v6389_v43 = vpop.xlane.xlu1 %6388  ;;  %v6596_v46 = vpop.permute.xlu0 %6595 }
0x2f12   :  { %9136 = vrcp.f32 %v6389_v43 }
0x2f15   :  { %v6594_v42 = vpop.permute.xlu1 %6593  ;;  %v6588_v63 = vpop.permute.xlu0 %6587 }
0x2f17   :  { %v9133_v28 = vpop.eup %9132 }
0x2f18   :  { %v6393_v30 = vmul.f32 %v9133_v28, %v9127_v49 }
0x2f19   :  { %v6729_v5 = vpop.permute.xlu0 %6728 }
0x2f1a   :  { %8771 = vmatmul.mubr.msk.f32.vlgmr.msra.gmra.mxu1 %vm511_vm7, %v6393_v30 }
0x2f1b   :  { %v9135_v0 = vpop.eup %9134  ;;  %8791 = vmatpush3.xpose.msk.msra.mxu1 %vm415_vm6, %v6598_v40  ;;  %8773 = vmatprep.mubr.msk.f32.mxu1 %vm9228_vm5, %v9227_v48 }
0x2f1c   :  { %8792 = vmatprep.subr.mxu1 %v9227_v48  ;;  %v6394_v10 = vmul.f32 %v9135_v0, %v9129_v54 }
0x2f1e   :  { %8774 = vmatmul.mubr.msk.f32.gmra.mxu1 %vm511_vm7, %v6394_v10 }
0x2f1f   :  { %v9137_v29 = vpop.eup %9136  ;;  %8793 = vmatpush3.xpose.msk.msra.mxu1 %vm415_vm6, %v6596_v46  ;;  %8776 = vmatprep.mubr.msk.f32.mxu1 %vm9228_vm5, %v9227_v48 }
0x2f20   :  { %8794 = vmatprep.subr.mxu1 %v9227_v48  ;;  %v6395_v26 = vmul.f32 %v9137_v29, %v9131_v57 }
0x2f22   :  { %8777 = vmatmul.mubr.msk.f32.gmra.mxu1 %vm511_vm7, %v6395_v26 }
0x2f23   :  { %8795 = vmatpush3.xpose.msk.msra.mxu1 %vm415_vm6, %v6594_v42  ;;  %8796 = vmatprep.mubr.msk.f32.mxu1 %vm9228_vm5, %v9227_v48 }
0x2f24   :  { %8820 = vmatprep.subr.mxu1 %v9227_v48 }
0x2f26   :  { %8797 = vmatmul.mubr.msk.f32.vlgmr.msra.gmra.mxu1 %vm415_vm6, %v6588_v63 }
0x2f27   :  { %8799 = vmatprep.mubr.msk.f32.mxu1 %vm9228_vm5, %v9227_v48  ;;  %8821 = vmatpush3.msra.mxu1 %v9197_v9 }
0x2f28   :  { %8848 = vmatprep.subr.mxu1 %v9227_v48 }
0x2fda   :  { %v6481_v2 = vpop.f32.mrf.mxu1 }
0x2fdb   :  { %8782 = vmatmul.mubr.msk.f32.vlgmr.msra.gmra.mxu0 %vm415_vm6, %v6481_v2 }
0x2fdc   :  { %8806 = vmatpush3.msk.msra.mxu0 %vm201_vm3, %v6729_v5  ;;  %v8772_v19 = vpop.f32.mrf.mxu1  ;;  %8784 = vmatprep.mubr.msk.f32.mxu0 %vm9228_vm5, %v9227_v48 }
0x2fdd   :  { %8807 = vmatprep.subr.mxu0 %v9227_v48 }
0x2fde   :  { %v6486_v22 = vpop.f32.mrf.mxu1 }
0x2fdf   :  { %8785 = vmatmul.mubr.msk.f32.gmra.mxu0 %vm415_vm6, %v6486_v22 }
0x2fe0   :  { %v8775_v21 = vpop.f32.mrf.mxu1  ;;  %8787 = vmatprep.mubr.msk.f32.mxu0 %vm9228_vm5, %v9227_v48 }
0x2fe2   :  { %v6491_v11 = vpop.f32.mrf.mxu1 }
0x2fe3   :  { %8788 = vmatmul.mubr.msk.f32.gmra.mxu0 %vm415_vm6, %v6491_v11 }
0x2fe4   :  { %v8778_v39 = vpop.f32.mrf.mxu1  ;;  %8811 = vmatprep.mubr.msk.f32.mxu0 %vm9228_vm5, %v9227_v48 }
0x2fe6   :  { %v6677_v23 = vpop.f32.mrf.mxu1 }
0x2fe7   :  { %v6691_v56 = vsel %vm511_vm7, %v6677_v23, -inf }
0x2fe8   :  { %6692 = vmax.xlane.f32.xlu1 %v6691_v56  ;;  %v8798_v7 = vpop.f32.mrf.mxu1 }
0x2ff9   :  { %6726 = vrot.lane.b32.xlu1 %v10954_v60, %s11451_s2 }
0x2ffd   :  { %6724 = vrot.lane.b32.xlu1 %v10965_v53, %s11451_s2 }
0x3001   :  { %6591 = vrot.lane.b32.xlu1 %v11000_v61, %s11450_s24 }
0x3071   :  { %v6693_v25 = vpop.xlane.xlu1 %6692 }
0x3072   :  { %v6700_v31 = vsub.f32 %v6677_v23, %v6693_v25 }
0x3074   :  { %v6703_v20 = vmul.f32 1.442695, %v6700_v31 }
0x3075   :  { %v6727_v35 = vpop.permute.xlu1 %6726 }
0x3076   :  { %9138 = vpow2.f32 %v6703_v20  ;;  %8808 = vmatpush3.msra.mxu0 %v6727_v35 }
0x3077   :  { %8809 = vmatprep.subr.mxu0 %v9227_v48 }
0x3079   :  { %v6725_v12 = vpop.permute.xlu1 %6724 }
0x307a   :  { %8810 = vmatpush3.msra.mxu0 %v6725_v12 }
0x307b   :  { %8831 = vmatprep.subr.mxu0 %v9227_v48 }
0x3083   :  { %v9139_v38 = vpop.eup %9138 }
0x3084   :  { %v6709_v60 = vsel %vm511_vm7, %v9139_v38, 0.0 }
0x3085   :  { %6710 = vadd.xlane.f32.xlu0 %v6709_v60 }
0x309b   :  { %v6570_v53 = vpop.f32.mrf.mxu0  ;;  %6589 = vrot.lane.b32.xlu0 %v10992_v17, %s11450_s24  ;;  %v6592_v17 = vpop.permute.xlu1 %6591  ;;  %s9240_s24 = smov [#allocation2]  }
0x309c   :  { %v11228_v61 = vadd.f32 %v6570_v53, %v11159_v24  ;;  %s7281_s2 = sshll.u32 %s9240_s24, 4  ;;  %s7282_s2 = int_to_ptr.vmem [resolvable:$true] %s7281_s2 }
0x309d   :  { %v8783_v16 = vpop.f32.mrf.mxu0  ;;  %p9210_p1 = scmp.lt.s32.totalorder %s7282_s2, %s7282_s2 }
0x309e   :  { %v11306_v16 = vld [vmem:[%s11398_s10 + $0x1] ss:$0 sm:$0xff] }
0x309f   :  { %v6575_v4 = vpop.f32.mrf.mxu0 }
0x30a0   :  { %v11231_v34 = vadd.f32 %v6575_v4, %v11162_v51 }
0x30a1   :  { %v8786_v32 = vpop.f32.mrf.mxu0 }
0x30a2   :  { %v11312_v32 = vld [vmem:[%s11399_s11 + $0x1] ss:$0 sm:$0xff] }
0x30a3   :  { %v6580_v49 = vpop.f32.mrf.mxu0 }
0x30a4   :  { %v11234_v52 = vadd.f32 %v6580_v49, %v11178_v18  ;;  %v9201_v18 = vld [vmem:[%s11400_s12 + $0x20] sm:$0xff] }
0x30a5   :  { %v8789_v54 = vpop.f32.mrf.mxu0 }
0x310e   :  { %v6711_v55 = vpop.xlane.xlu0 %6710 }
0x310f   :  { %9140 = vrcp.f32 %v6711_v55 }
0x3112   :  { %v6590_v57 = vpop.permute.xlu0 %6589 }
0x3113   :  { %8800 = vmatmul.mubr.msk.f32.gmra.mxu1 %vm415_vm6, %v6590_v57 }
0x3114   :  { %8802 = vmatprep.mubr.msk.f32.mxu1 %vm9228_vm5, %v9227_v48 }
0x3117   :  { %8803 = vmatmul.mubr.msk.f32.gmra.mxu1 %vm415_vm6, %v6592_v17 }
0x3118   :  { %8822 = vmatprep.mubr.msk.f32.mxu1 %vm9228_vm5, %v9227_v48 }
0x311c   :  { %v9141_v24 = vpop.eup %9140 }
0x311d   :  { %v6721_v51 = vmul.f32 %v9141_v24, %v9139_v38 }
0x311f   :  { %8812 = vmatmul.mubr.msk.f32.vlgmr.msra.gmra.mxu0 %vm511_vm7, %v6721_v51 }
0x3120   :  { %8814 = vmatprep.mubr.msk.f32.mxu0 %vm9228_vm5, %v9227_v48  ;;  %8832 = vmatpush3.msra.mxu0 %v9198_v58 }
0x3121   :  { %8833 = vmatprep.subr.mxu0 %v9227_v48 }
0x3122   :  { %8834 = vmatpush3.msra.mxu0 %v9199_v62 }
0x3123   :  { %8835 = vmatprep.subr.mxu0 %v9227_v48 }
0x3124   :  { %8836 = vmatpush3.msra.mxu0 %v9200_v14 }
0x3125   :  { %8837 = vmatprep.subr.mxu0 %v9227_v48 }
0x3126   :  { %8838 = vmatpush3.msra.mxu0 %v9201_v18 }
0x3127   :  { %8873 = vmatprep.subr.mxu0 %v9227_v48 }
0x31d3   :  { %v6682_v59 = vpop.f32.mrf.mxu1 }
0x31d4   :  { %v6694_v36 = vsel %vm511_vm7, %v6682_v59, -inf }
0x31d5   :  { %6695 = vmax.xlane.f32.xlu0 %v6694_v36  ;;  %v8801_v40 = vpop.f32.mrf.mxu1 }
0x31d7   :  { %v6687_v41 = vpop.f32.mrf.mxu1 }
0x31d8   :  { %v6697_v43 = vsel %vm518_vm8, %v6687_v41, -inf }
0x31d9   :  { %6698 = vmax.xlane.f32.xlu1 %v6697_v43  ;;  %v8804_v28 = vpop.f32.mrf.mxu1 }
0x31df   :  { %v6809_v30 = vpop.f32.mrf.mxu0 }
0x31e0   :  { %8823 = vmatmul.mubr.msk.f32.vlgmr.msra.gmra.mxu1 %vm415_vm6, %v6809_v30 }
0x31e1   :  { %v8813_v0 = vpop.f32.mrf.mxu0  ;;  %8825 = vmatprep.mubr.msk.f32.mxu1 %vm9228_vm5, %v9227_v48  ;;  %8849 = vmatpush3.msra.mxu1 %v10895_v3 }
0x31e2   :  { %8850 = vmatprep.subr.mxu1 %v9227_v48 }
0x31e3   :  { %8851 = vmatpush3.msra.mxu1 %v10902_v8 }
0x31e4   :  { %8852 = vmatprep.subr.mxu1 %v9227_v48 }
0x31e5   :  { %8853 = vmatpush3.msra.mxu1 %v10909_v44 }
0x31e6   :  { %8854 = vmatprep.subr.mxu1 %v9227_v48 }
0x31e7   :  { %8855 = vmatpush3.msra.mxu1 %v10916_v45 }
0x31e8   :  { %8856 = vmatprep.subr.mxu1 %v9227_v48 }
0x31e9   :  { %8857 = vmatpush3.msra.mxu1 %v10923_v50 }
0x31ea   :  { %8858 = vmatprep.subr.mxu1 %v9227_v48 }
0x31eb   :  { %8859 = vmatpush3.msra.mxu1 %v10930_v47 }
0x31ec   :  { %8860 = vmatprep.subr.mxu1 %v9227_v48 }
0x31ed   :  { %8861 = vmatpush3.msra.mxu1 %v10937_v13 }
0x31ee   :  { %8862 = vmatprep.subr.mxu1 %v9227_v48 }
0x31ef   :  { %8863 = vmatpush3.msra.mxu1 %v10944_v15 }
0x325e   :  { %v6696_v3 = vpop.xlane.xlu0 %6695 }
0x325f   :  { %v6701_v8 = vsub.f32 %v6682_v59, %v6696_v3 }
0x3261   :  { %v6705_v44 = vmul.f32 1.442695, %v6701_v8 }
0x3262   :  { %v6699_v45 = vpop.xlane.xlu1 %6698 }
0x3263   :  { %9142 = vpow2.f32 %v6705_v44  ;;  %v6702_v10 = vsub.f32 %v6687_v41, %v6699_v45 }
0x3265   :  { %v6707_v46 = vmul.f32 1.442695, %v6702_v10 }
0x3267   :  { %9144 = vpow2.f32 %v6707_v46 }
0x3270   :  { %v9143_v50 = vpop.eup %9142 }
0x3271   :  { %v6712_v29 = vsel %vm511_vm7, %v9143_v50, 0.0 }
0x3272   :  { %6713 = vadd.xlane.f32.xlu0 %v6712_v29  ;;  %v7517_v29 = vld [vmem:[%s11403_s15 + $0x1] ss:$0 sm:$0xff] }
0x3274   :  { %v9145_v47 = vpop.eup %9144 }
0x3275   :  { %v6715_v26 = vsel %vm518_vm8, %v9145_v47, 0.0 }
0x3276   :  { %6716 = vadd.xlane.f32.xlu0 %v6715_v26  ;;  %v5454_v26 = vadd.f32 %v7517_v29, %v11006_v1 }
0x32a0   :  { %v6898_v13 = vpop.f32.mrf.mxu1 }
0x32a1   :  { %v6912_v42 = vadd.f32 %v6898_v13, %v11228_v61 }
0x32a2   :  { %v8824_v15 = vpop.f32.mrf.mxu1 }
0x32a3   :  { %v11285_v63 = vadd.f32 %v6912_v42, %v10779_v27 }
0x32a5   :  { %v6918_v9 = vsel %vm248_vm4, %v11285_v63, 0.0 }
0x32a6   :  { %6919 = vadd.xlane.f32.xlu0 %v6918_v9  ;;  %v5465_v9 = vadd.f32 %v5454_v26, %v10764_v33 }
0x32fb   :  { %v6714_v2 = vpop.xlane.xlu0 %6713 }
0x32fc   :  { %9146 = vrcp.f32 %v6714_v2 }
0x32ff   :  { %v6717_v5 = vpop.xlane.xlu0 %6716 }
0x3300   :  { %9148 = vrcp.f32 %v6717_v5 }
0x3309   :  { %v9147_v19 = vpop.eup %9146 }
0x330a   :  { %v6722_v22 = vmul.f32 %v9147_v19, %v9143_v50 }
0x330c   :  { %8815 = vmatmul.mubr.msk.f32.gmra.mxu0 %vm511_vm7, %v6722_v22 }
0x330d   :  { %v9149_v21 = vpop.eup %9148  ;;  %8817 = vmatprep.mubr.msk.f32.mxu0 %vm9228_vm5, %v9227_v48 }
0x330e   :  { %v6723_v11 = vmul.f32 %v9149_v21, %v9145_v47 }
0x3310   :  { %8818 = vmatmul.mubr.msk.f32.gmra.mxu0 %vm511_vm7, %v6723_v11 }
0x3311   :  { %8839 = vmatprep.mubr.msk.f32.mxu0 %vm9228_vm5, %v9227_v48 }
0x332f   :  { %v6920_v27 = vpop.xlane.xlu0 %6919 }
0x3330   :  { %v6927_v39 = vmul.f32 0.03125, %v6920_v27 }
0x3332   :  { %v6930_v23 = vsub.f32 %v11285_v63, %v6927_v39 }
0x3334   :  { %v6933_v56 = vmul.f32 %v6930_v23, %v6930_v23 }
0x3336   :  { %v6936_v7 = vsel %vm248_vm4, %v6933_v56, 0.0 }
0x3337   :  { %6937 = vadd.xlane.f32.xlu1 %v6936_v7 }
0x33c0   :  { %v6938_v25 = vpop.xlane.xlu1 %6937 }
0x33c1   :  { %v6945_v31 = vmul.f32 0.03125, %v6938_v25 }
0x33c3   :  { %v6948_v20 = vadd.f32 1e-05, %v6945_v31 }
0x33c5   :  { %9150 = vrsqrt.f32 %v6948_v20 }
0x33cc   :  { %v6814_v35 = vpop.f32.mrf.mxu0 }
0x33cd   :  { %8826 = vmatmul.mubr.msk.f32.gmra.mxu1 %vm415_vm6, %v6814_v35 }
0x33ce   :  { %v8816_v12 = vpop.f32.mrf.mxu0  ;;  %8828 = vmatprep.mubr.msk.f32.mxu1 %vm9228_vm5, %v9227_v48 }
0x33d0   :  { %v6819_v38 = vpop.f32.mrf.mxu0 }
0x33d1   :  { %8829 = vmatmul.mubr.msk.f32.gmra.mxu1 %vm415_vm6, %v6819_v38 }
0x33d2   :  { %v9151_v60 = vpop.eup %9150  ;;  %v8819_v53 = vpop.f32.mrf.mxu0  ;;  %8864 = vmatprep.mubr.msk.f32.mxu1 %vm9228_vm5, %v9227_v48 }
0x33d3   :  { %v6954_v61 = vmul.f32 %v9151_v60, %v6930_v23 }
0x33d5   :  { %v6957_v4 = vmul.f32 %v11306_v16, %v6954_v61  ;;  %v7192_v61 = vld [vmem:[%s11406_s18 + $0x18] sm:$0xff] }
0x33d7   :  { %v6960_v49 = vadd.f32 %v11312_v32, %v6957_v4  ;;  %v7190_v4 = vld [vmem:[%s11406_s18 + $0x8] sm:$0xff] }
0x33d9   :  { %8840 = vmatmul.mubr.msk.f32.vlgmr.msra.gmra.mxu0 %vm248_vm4, %v6960_v49 }
0x33da   :  { %8842 = vmatprep.mubr.msk.f32.mxu0 %vm9228_vm5, %v9227_v48  ;;  %8874 = vmatpush3.msra.mxu0 %v7192_v61 }
0x33db   :  { %8875 = vmatprep.subr.mxu0 %v9227_v48 }
0x348d   :  { %v6903_v54 = vpop.f32.mrf.mxu1 }
0x348e   :  { %v6913_v55 = vadd.f32 %v6903_v54, %v11231_v34  ;;  %v11327_v34 = vld [vmem:[%s11401_s13 + $0x1] ss:$0 sm:$0xff] }
0x348f   :  { %v8827_v57 = vpop.f32.mrf.mxu1 }
0x3490   :  { %v6916_v17 = vadd.f32 %v6913_v55, %v10767_v37 }
0x3491   :  { %v6908_v24 = vpop.f32.mrf.mxu1 }
0x3492   :  { %v6914_v51 = vadd.f32 %v6908_v24, %v11234_v52  ;;  %v6921_v58 = vsel %vm248_vm4, %v6916_v17, 0.0 }
0x3493   :  { %6922 = vadd.xlane.f32.xlu0 %v6921_v58  ;;  %v8830_v62 = vpop.f32.mrf.mxu1 }
0x3494   :  { %v6917_v14 = vadd.f32 %v6914_v51, %v10784_v6 }
0x3496   :  { %v6924_v18 = vsel %vm255_vm2, %v6917_v14, 0.0 }
0x3497   :  { %6925 = vadd.xlane.f32.xlu1 %v6924_v18 }
0x3499   :  { %v7038_v59 = vpop.f32.mrf.mxu0 }
0x349a   :  { %v7039_v37 = vadd.f32 %v11327_v34, %v7038_v59 }
0x349b   :  { %v8841_v36 = vpop.f32.mrf.mxu0 }
0x349c   :  { %v7055_v40 = vmul.f32 0.70710677, %v7039_v37  ;;  %v7052_v41 = vmul.f32 0.5, %v7039_v37 }
0x349e   :  { %9152 = verf.f32 %v7055_v40 }
0x34ab   :  { %v9153_v52 = vpop.eup %9152 }
0x34ac   :  { %v7061_v43 = vadd.f32 1.0, %v9153_v52 }
0x34ae   :  { %v7064_v28 = vmul.f32 %v7061_v43, %v7052_v41 }
0x34b0   :  { %8865 = vmatmul.mubr.msk.f32.vlgmr.msra.gmra.mxu1 %vm85_vm0, %v7064_v28 }
0x34b1   :  { %8867 = vmatprep.mubr.msk.f32.mxu1 %vm9228_vm5, %v9227_v48 }
0x351c   :  { %v6923_v6 = vpop.xlane.xlu0 %6922 }
0x351d   :  { %v6928_v30 = vmul.f32 0.03125, %v6923_v6  ;;  %v7582_v6 = vld [vmem:[%s11404_s16] ss:$0 sm:$0xff]  ;;  %s9205_s16 = scalar_lea.vmem %s7282_s2, 32 }
0x351e   :  { %p9206_p0 = scmp.ne.s32.totalorder %s7282_s2, %s9205_s16  ;;  %p9211_p2 = scmp.lt.s32.totalorder %s9205_s16, %s9205_s16 }
0x351f   :  { %v6931_v0 = vsub.f32 %v6916_v17, %v6928_v30 }
0x3520   :  { %v6926_v3 = vpop.xlane.xlu1 %6925  ;;  %p9212_p3 = por %p9211_p2, %p9210_p1 }
0x3521   :  { %v6929_v8 = vmul.f32 0.03125, %v6926_v3  ;;  %v6934_v44 = vmul.f32 %v6931_v0, %v6931_v0 }
0x3522   :  { %p9213_p4 = pnand %p9212_p3, %p9206_p0 }
0x3523   :  { %v6932_v45 = vsub.f32 %v6917_v14, %v6929_v8  ;;  %v6939_v10 = vsel %vm248_vm4, %v6934_v44, 0.0 }
0x3524   :  { %6940 = vadd.xlane.f32.xlu0 %v6939_v10 }
0x3525   :  { %v6935_v46 = vmul.f32 %v6932_v45, %v6932_v45 }
0x3527   :  { %v6942_v50 = vsel %vm255_vm2, %v6935_v46, 0.0  ;;  %v7584_v46 = vld [vmem:[%s11459_s28] ss:$0 sm:$0xff] }
0x3528   :  { %6943 = vadd.xlane.f32.xlu1 %v6942_v50 }
0x3570   :  { %v7142_v47 = vpop.f32.mrf.mxu1 }
0x3571   :  { %v7143_v13 = vadd.f32 %v7517_v29, %v7142_v47 }
0x3572   :  { %v8866_v42 = vpop.f32.mrf.mxu1 }
0x3573   :  { %v7154_v15 = vadd.f32 %v7143_v13, %v11285_v63 }
0x3575   :  { %v7156_v2 = vrot.slane %v7154_v15, 7 }
0x3577   :  { %v7158_v5 = vsel %vm201_vm3, %v5465_v9, %v7156_v2 }
0x3578   :  { %v7162_v19 = vsel %vm7161_vm9, %v7158_v5, 0.0 }
0x3579   :  { %7163 = vadd.xlane.f32.xlu0 %v7162_v19 }
0x35ad   :  { %v6941_v22 = vpop.xlane.xlu0 %6940 }
0x35ae   :  { %v6946_v21 = vmul.f32 0.03125, %v6941_v22 }
0x35b0   :  { %v6949_v11 = vadd.f32 1e-05, %v6946_v21 }
0x35b1   :  { %v6944_v27 = vpop.xlane.xlu1 %6943 }
0x35b2   :  { %9154 = vrsqrt.f32 %v6949_v11  ;;  %v6947_v39 = vmul.f32 0.03125, %v6944_v27 }
0x35b4   :  { %v6950_v1 = vadd.f32 1e-05, %v6947_v39 }
0x35b6   :  { %9156 = vrsqrt.f32 %v6950_v1 }
0x35bf   :  { %v9155_v23 = vpop.eup %9154 }
0x35c0   :  { %v6955_v56 = vmul.f32 %v9155_v23, %v6931_v0  ;;  %v7583_v0 = vld [vmem:[%s11405_s17] ss:$0 sm:$0xff] }
0x35c2   :  { %v6958_v63 = vmul.f32 %v11306_v16, %v6955_v56 }
0x35c3   :  { %v9157_v33 = vpop.eup %9156 }
0x35c4   :  { %v6956_v7 = vmul.f32 %v9157_v33, %v6932_v45  ;;  %v6961_v25 = vadd.f32 %v11312_v32, %v6958_v63 }
0x35c6   :  { %8843 = vmatmul.mubr.msk.f32.gmra.mxu0 %vm248_vm4, %v6961_v25  ;;  %v6959_v31 = vmul.f32 %v11306_v16, %v6956_v7  ;;  %v7191_v16 = vld [vmem:[%s11406_s18 + $0x10] sm:$0xff] }
0x35c7   :  { %8845 = vmatprep.mubr.msk.f32.mxu0 %vm9228_vm5, %v9227_v48  ;;  %8876 = vmatpush3.msra.mxu0 %v7191_v16 }
0x35c8   :  { %v6962_v20 = vadd.f32 %v11312_v32, %v6959_v31  ;;  %8877 = vmatprep.subr.mxu0 %v9227_v48  ;;  %v7189_v32 = vld [vmem:[%s11406_s18] sm:$0xff] }
0x35c9   :  { %8878 = vmatpush3.msra.mxu0 %v7190_v4 }
0x35ca   :  { %8846 = vmatmul.mubr.msk.f32.gmra.mxu0 %vm248_vm4, %v6962_v20  ;;  %8879 = vmatprep.subr.mxu0 %v9227_v48 }
0x35cb   :  { %8881 = vmatprep.mubr.msk.f32.mxu0 %vm9228_vm5, %v9227_v48  ;;  %8880 = vmatpush3.msra.mxu0 %v7189_v32 }
0x3602   :  { %v7164_v35 = vpop.xlane.xlu0 %7163 }
0x3603   :  { %v7165_v12 = vmul.f32 0.03125, %v7164_v35 }
0x3605   :  { %v7166_v38 = vsub.f32 %v7158_v5, %v7165_v12 }
0x3607   :  { %v7167_v60 = vmul.f32 %v7166_v38, %v7166_v38 }
0x3609   :  { %v7168_v53 = vsel %vm7161_vm9, %v7167_v60, 0.0 }
0x360a   :  { %7169 = vadd.xlane.f32.xlu1 %v7168_v53 }
0x3686   :  { %v7043_v49 = vpop.f32.mrf.mxu0 }
0x3687   :  { %v7044_v54 = vadd.f32 %v11327_v34, %v7043_v49 }
0x3688   :  { %v8844_v55 = vpop.f32.mrf.mxu0 }
0x3689   :  { %v7056_v57 = vmul.f32 0.70710677, %v7044_v54  ;;  %v7053_v37 = vmul.f32 0.5, %v7044_v54 }
0x368a   :  { %v7048_v17 = vpop.f32.mrf.mxu0 }
0x368b   :  { %9158 = verf.f32 %v7056_v57  ;;  %v7049_v24 = vadd.f32 %v11327_v34, %v7048_v17 }
0x368c   :  { %v8847_v51 = vpop.f32.mrf.mxu0 }
0x368d   :  { %v7057_v58 = vmul.f32 0.70710677, %v7049_v24  ;;  %v7054_v41 = vmul.f32 0.5, %v7049_v24 }
0x368f   :  { %9160 = verf.f32 %v7057_v58 }
0x3693   :  { %v7170_v62 = vpop.xlane.xlu1 %7169 }
0x3694   :  { %v7171_v14 = vmul.f32 0.03125, %v7170_v62 }
0x3696   :  { %v7172_v18 = vadd.f32 1e-05, %v7171_v14 }
0x3698   :  { %v9159_v59 = vpop.eup %9158  ;;  %9162 = vrsqrt.f32 %v7172_v18 }
0x3699   :  { %v7062_v36 = vadd.f32 1.0, %v9159_v59 }
0x369b   :  { %v7065_v40 = vmul.f32 %v7062_v36, %v7053_v37 }
0x369c   :  { %v9161_v52 = vpop.eup %9160 }
0x369d   :  { %v7063_v43 = vadd.f32 1.0, %v9161_v52  ;;  %8868 = vmatmul.mubr.msk.f32.gmra.mxu1 %vm85_vm0, %v7065_v40 }
0x369e   :  { %8870 = vmatprep.mubr.msk.f32.mxu1 %vm9228_vm5, %v9227_v48 }
0x369f   :  { %v7066_v34 = vmul.f32 %v7063_v43, %v7054_v41 }
0x36a1   :  { %8871 = vmatmul.mubr.msk.f32.gmra.mxu1 %vm85_vm0, %v7066_v34 }
0x36a5   :  { %v9163_v28 = vpop.eup %9162 }
0x36a6   :  { %v7174_v30 = vmul.f32 %v9163_v28, %v7166_v38 }
0x36a8   :  { %v7181_v3 = vmul.f32 %v7582_v6, %v7174_v30 }
0x36aa   :  { %v7188_v8 = vadd.f32 %v7583_v0, %v7181_v3 }
0x36ac   :  { %8882 = vmatmul.mubr.msk.f32.vlgmr.msra.gmra.mxu0 %vm248_vm4, %v7188_v8 }
0x375d   :  { %v7147_v44 = vpop.f32.mrf.mxu1 }
0x375f   :  { %v8869_v45 = vpop.f32.mrf.mxu1 }
0x3761   :  { %v7151_v48 = vpop.f32.mrf.mxu1 }
0x3763   :  { %v8872_v10 = vpop.f32.mrf.mxu1 }
0x376c   :  { %v7269_v50 = vpop.f32.mrf.mxu0 }
0x376d   :  { %v7270_v29 = vadd.f32 %v7584_v46, %v7269_v50 }
0x376e   :  { %v8883_v47 = vpop.f32.mrf.mxu0 }
0x376f   :  { %7274 = vst.msk [vmem:[#allocation2] sm:$0x3] %vm7273_vm10, %v7270_v29 }
0x3770   :  { %9216 = shalt.err (!%p9213_p4)
}
0x3771   :  { %s11460_s27 = sld [smem:[#allocation11_spill]] }
0x3777   :  { %7284 = dma.vmem_to_hbm [thread:$0]  %s7282_s2, 32, %s11460_s27, [#allocation3]  }
0x3778   :  { %9225 = dma.done.wait [#allocation3], 32  }
0x3779   :  { %9226 = vsyncadd [#allocation3], 4294967264 }
0x377a   :  { %7288 = vsyncpa [#allocation3], 1 }

</bundles_post_ra>
